<compile_context>
chip_gen: v6e
topology: v6e:2x2x1
jax: 0.10.0
libtpu: 0.0.40
codegen_flags: <defaults>
</compile_context>

<pallas_src>
import functools

import jax
import jax.numpy as jnp
from jax.experimental import pallas as pl
from jax.experimental.pallas import tpu as pltpu

COMPUTE_DTYPE = jnp.bfloat16   # MXU inputs + inter-layer activations
ACC_DTYPE = jnp.float32        # MXU accumulator + BN / activation math
BN_EPS = 1e-5
LANE = 128                     # TPU lane width; min lane tile / padding unit


def _scoped_vmem_limit():
    """32 MiB scoped on v7x (64 MiB physical), 64 MiB on v5e/v6e (128 MiB)."""
    try:
        phys = int(getattr(pltpu.get_tpu_info(), "vmem_capacity_bytes", 0))
    except Exception:
        phys = 0
    return 64 * 1024 * 1024 if phys >= 100 * 1024 * 1024 else 32 * 1024 * 1024


VMEM_LIMIT_BYTES = _scoped_vmem_limit()
VMEM_BUDGET_BYTES = (VMEM_LIMIT_BYTES * 5) // 8            # headroom for Mosaic scratch
ROW_TILE_TARGET = 2048 if VMEM_LIMIT_BYTES >= 64 * 1024 * 1024 else 1024


def _round_up(x, m):
    return -(-x // m) * m


def _lrelu(v):
    return jnp.maximum(v, 0.2 * v)     # single VPU max


def _pick_lane_tile(rows, k, cout):
    """Lane-axis (rows) tile: multiple of 128, <= target, fits the VMEM budget."""
    tile = min(_round_up(rows, LANE), ROW_TILE_TARGET)

    def working_set(t):
        x_blk = k * t * 2          # bf16 patch tile
        y_blk = cout * t * 2       # bf16 output tile
        w_blk = cout * k * 2       # bf16 weights
        acc = cout * t * 4         # f32 accumulator value
        return 2 * (x_blk + y_blk + w_blk) + acc   # blocks are double-buffered

    while tile > LANE and working_set(tile) > VMEM_BUDGET_BYTES:
        tile //= 2
    # TODO(synk): for very large K (ndf>=128 -> conv4 K=8192) the resident
    # weight block alone blows the budget; that needs a K grid axis with an f32
    # VMEM accumulator (review item) -- not required at the sizes used here.
    return tile


def _pad_lanes(p_t, tile):
    k, r = p_t.shape
    r_pad = _round_up(r, tile)
    if r_pad != r:
        p_t = jnp.pad(p_t, ((0, 0), (0, r_pad - r)))
    return p_t


# ---------------------------------------------------------------------------
# Kernels (all operands already in the transposed / lane-dense layout)
# ---------------------------------------------------------------------------
def _mm_act_kernel(x_ref, w_ref, o_ref, *, act):
    # x:(K, tile) bf16, w:(Cout, K) bf16 -> o:(Cout, tile)
    y = jnp.dot(w_ref[...], x_ref[...], preferred_element_type=ACC_DTYPE)
    if act == "lrelu":
        y = _lrelu(y)
    o_ref[...] = y.astype(o_ref.dtype)


def _mm_bn_lrelu_single_kernel(x_ref, w_ref, gamma_ref, beta_ref, o_ref, *, inv_rows):
    # Whole layer in one tile: matmul + global stats + normalize + LeakyReLU.
    y = jnp.dot(w_ref[...], x_ref[...], preferred_element_type=ACC_DTYPE)  # (Cout, R)
    s1 = jnp.sum(y, axis=1, keepdims=True)           # padded columns are exact zeros
    s2 = jnp.sum(y * y, axis=1, keepdims=True)
    mean = s1 * inv_rows                              # divide by the *true* row count
    var = jnp.maximum(s2 * inv_rows - mean * mean, 0.0)   # clamp f32 cancellation
    scale = gamma_ref[...] * jax.lax.rsqrt(var + BN_EPS)
    shift = beta_ref[...] - mean * scale
    y = y * scale + shift
    o_ref[...] = _lrelu(y).astype(o_ref.dtype)


def _mm_partial_stats_kernel(x_ref, w_ref, y_ref, stats_ref):
    # Pass 1 (multi-tile BN): matmul + per-tile (sum, sumsq) from the f32
    # accumulator; fully parallel across tiles (uses both v7x TensorCores).
    y = jnp.dot(w_ref[...], x_ref[...], preferred_element_type=ACC_DTYPE)
    y_ref[...] = y.astype(y_ref.dtype)                # bf16 intermediate
    sref = stats_ref.at[0]                            # (Cout, 2) view of this tile's slot
    sref[:, 0:1] = jnp.sum(y, axis=1, keepdims=True)
    sref[:, 1:2] = jnp.sum(y * y, axis=1, keepdims=True)


def _scale_shift_lrelu_kernel(y_ref, scale_ref, shift_ref, o_ref):
    # Pass 2 (multi-tile BN): normalize + affine + LeakyReLU.
    y = y_ref[...].astype(ACC_DTYPE) * scale_ref[...] + shift_ref[...]
    o_ref[...] = _lrelu(y).astype(o_ref.dtype)


# ---------------------------------------------------------------------------
# Row-tiled pallas_call wrappers
# ---------------------------------------------------------------------------
def fused_matmul_t(p_t, w_t, rows_true, *, act="lrelu", out_dtype=COMPUTE_DTYPE):
    """y^T = act(w^T @ x^T), lane-dense, row(lane)-tiled, fully parallel."""
    k, _ = p_t.shape
    cout = w_t.shape[0]
    tile = _pick_lane_tile(rows_true, k, cout)
    p_t = _pad_lanes(p_t, tile)
    r_pad = p_t.shape[1]
    grid = (r_pad // tile,)
    cost = pl.CostEstimate(
        flops=int(2 * k * cout * r_pad),
        transcendentals=0,
        bytes_accessed=int(2 * (k * r_pad + cout * k + cout * r_pad)))
    return pl.pallas_call(
        functools.partial(_mm_act_kernel, act=act),
        grid=grid,
        in_specs=[pl.BlockSpec((k, tile), lambda i: (0, i)),
                  pl.BlockSpec((cout, k), lambda i: (0, 0))],
        out_specs=pl.BlockSpec((cout, tile), lambda i: (0, i)),
        out_shape=jax.ShapeDtypeStruct((cout, r_pad), out_dtype),
        compiler_params=pltpu.CompilerParams(
            dimension_semantics=("parallel",),
            vmem_limit_bytes=VMEM_LIMIT_BYTES),
        cost_estimate=cost,
    )(p_t, w_t)


def matmul_bn_lrelu_t(p_t, w_t, gamma, beta, rows_true, *, out_dtype=COMPUTE_DTYPE):
    """LeakyReLU(BatchNorm(w^T @ x^T)) with exact global (N*H*W) batch stats."""
    k, _ = p_t.shape
    cout = w_t.shape[0]
    tile = _pick_lane_tile(rows_true, k, cout)
    p_t = _pad_lanes(p_t, tile)
    r_pad = p_t.shape[1]
    num_tiles = r_pad // tile
    inv_rows = 1.0 / float(rows_true)
    gamma_c = gamma.reshape(cout, 1).astype(ACC_DTYPE)
    beta_c = beta.reshape(cout, 1).astype(ACC_DTYPE)

    if num_tiles == 1:
        # Single fused kernel: no HBM round trip for y, no second launch.
        cost = pl.CostEstimate(
            flops=int(2 * k * cout * r_pad + 8 * cout * r_pad),
            transcendentals=int(cout),
            bytes_accessed=int(2 * (k * r_pad + cout * k + cout * r_pad)))
        return pl.pallas_call(
            functools.partial(_mm_bn_lrelu_single_kernel, inv_rows=inv_rows),
            grid=(1,),
            in_specs=[pl.BlockSpec((k, r_pad), lambda i: (0, 0)),
                      pl.BlockSpec((cout, k), lambda i: (0, 0)),
                      pl.BlockSpec((cout, 1), lambda i: (0, 0)),
                      pl.BlockSpec((cout, 1), lambda i: (0, 0))],
            out_specs=pl.BlockSpec((cout, r_pad), lambda i: (0, 0)),
            out_shape=jax.ShapeDtypeStruct((cout, r_pad), out_dtype),
            compiler_params=pltpu.CompilerParams(
                dimension_semantics=("arbitrary",),
                vmem_limit_bytes=VMEM_LIMIT_BYTES),
            cost_estimate=cost,
        )(p_t, w_t, gamma_c, beta_c)

    # Pass 1: parallel tiled matmul + per-tile partial (sum, sumsq) from f32 acc.
    cost1 = pl.CostEstimate(
        flops=int(2 * k * cout * r_pad + 3 * cout * r_pad),
        transcendentals=0,
        bytes_accessed=int(2 * (k * r_pad + cout * k + cout * r_pad)
                           + 4 * num_tiles * cout * 2))
    y_t, partial = pl.pallas_call(
        _mm_partial_stats_kernel,
        grid=(num_tiles,),
        in_specs=[pl.BlockSpec((k, tile), lambda i: (0, i)),
                  pl.BlockSpec((cout, k), lambda i: (0, 0))],
        out_specs=(pl.BlockSpec((cout, tile), lambda i: (0, i)),
                   pl.BlockSpec((1, cout, 2), lambda i: (i, 0, 0))),
        out_shape=(jax.ShapeDtypeStruct((cout, r_pad), COMPUTE_DTYPE),
                   jax.ShapeDtypeStruct((num_tiles, cout, 2), ACC_DTYPE)),
        compiler_params=pltpu.CompilerParams(
            dimension_semantics=("parallel",),
            vmem_limit_bytes=VMEM_LIMIT_BYTES),
        cost_estimate=cost1,
    )(p_t, w_t)

    # Tiny partial-stat reduction + scale/shift prep: plain JAX (num_tiles*Cout*2
    # elements -- not worth a pallas_call).
    sums = jnp.sum(partial, axis=0)                          # (Cout, 2)
    mean = sums[:, 0:1] * inv_rows
    var = jnp.maximum(sums[:, 1:2] * inv_rows - mean * mean, 0.0)
    scale = gamma_c * jax.lax.rsqrt(var + BN_EPS)
    shift = beta_c - mean * scale

    # Pass 2: parallel normalize + affine + LeakyReLU over the bf16 y.
    return pl.pallas_call(
        _scale_shift_lrelu_kernel,
        grid=(num_tiles,),
        in_specs=[pl.BlockSpec((cout, tile), lambda i: (0, i)),
                  pl.BlockSpec((cout, 1), lambda i: (0, 0)),
                  pl.BlockSpec((cout, 1), lambda i: (0, 0))],
        out_specs=pl.BlockSpec((cout, tile), lambda i: (0, i)),
        out_shape=jax.ShapeDtypeStruct((cout, r_pad), out_dtype),
        compiler_params=pltpu.CompilerParams(
            dimension_semantics=("parallel",),
            vmem_limit_bytes=VMEM_LIMIT_BYTES),
        cost_estimate=pl.CostEstimate(
            flops=int(4 * cout * r_pad),
            transcendentals=0,
            bytes_accessed=int(4 * cout * r_pad)),
    )(y_t, scale, shift)


# ---------------------------------------------------------------------------
# Conv glue: transposed im2col (plain JAX) + kernel call + back to NHWC
# ---------------------------------------------------------------------------
def im2col_t(x, k, stride, pad):
    """x (N,H,W,C) NHWC -> patches^T (k*k*C, N*Ho*Wo); row order (kh, kw, c)."""
    if pad:
        x = jnp.pad(x, ((0, 0), (pad, pad), (pad, pad), (0, 0)))
    n, hp, wp, c = x.shape
    ho = (hp - k) // stride + 1
    wo = (wp - k) // stride + 1
    cols = []
    for kh in range(k):
        for kw in range(k):
            cols.append(x[:, kh:kh + stride * ho:stride,
                            kw:kw + stride * wo:stride, :])
    p = jnp.stack(cols, axis=0)              # (k*k, N, Ho, Wo, C)
    p = p.transpose(0, 4, 1, 2, 3)           # (k*k, C, N, Ho, Wo)
    return p.reshape(k * k * c, n * ho * wo), n, ho, wo


def conv_block(x, w, gamma=None, beta=None, *, stride=2, pad=1):
    k, _, cin, cout = w.shape
    p_t, n, ho, wo = im2col_t(x.astype(COMPUTE_DTYPE), k, stride, pad)
    w_t = jnp.transpose(w.reshape(k * k * cin, cout)).astype(COMPUTE_DTYPE)  # (Cout,K)
    rows = n * ho * wo
    if gamma is None:
        y_t = fused_matmul_t(p_t, w_t, rows, act="lrelu")
    else:
        y_t = matmul_bn_lrelu_t(p_t, w_t, gamma, beta, rows)
    # (Cout, R) back to NHWC for the next layer; XLA fuses this transpose into
    # the next layer's patch gather.
    return jnp.transpose(y_t[:, :rows]).reshape(n, ho, wo, cout)


# ---------------------------------------------------------------------------
# Tiny ops kept in plain JAX (perf review: dispatch cost >> compute)
# ---------------------------------------------------------------------------
def _label_embed(params, labels, img_size):
    # nn.Linear(n_classes, img_size^2) + LeakyReLU(0.2); NHWC channel-last.
    n = labels.shape[0]
    emb = jnp.dot(labels.astype(jnp.float32), params["emb_w"]) + params["emb_b"]
    return _lrelu(emb).reshape(n, img_size, img_size, 1)


def _head(params, x):
    # Final full-cover 4x4 valid conv (-> 1x1 map) + Sigmoid == flat dot.
    n = x.shape[0]
    logits = jnp.dot(x.reshape(n, -1).astype(COMPUTE_DTYPE),
                     params["w5"].reshape(-1, 1).astype(COMPUTE_DTYPE),
                     preferred_element_type=jnp.float32)
    return jax.nn.sigmoid(logits).reshape(-1)


# ---------------------------------------------------------------------------
# Discriminator forward
# ---------------------------------------------------------------------------
def discriminator_forward(params, img, labels):
    # img: (N, H, W, 3) NHWC ; labels: (N, n_classes) float (e.g. one-hot)
    n, h = img.shape[0], img.shape[1]
    emb = _label_embed(params, labels, h)
    x = jnp.concatenate([img.astype(jnp.float32), emb], axis=-1)   # (N,H,W,4)
    x = conv_block(x, params["w1"])
    x = conv_block(x, params["w2"], params["g2"], params["b2"])
    x = conv_block(x, params["w3"], params["g3"], params["b3"])
    x = conv_block(x, params["w4"], params["g4"], params["b4"])
    return _head(params, x)                                        # (N,)


def init_params(key, ndf, n_classes, img_size):
    ks = jax.random.split(key, 6)

    def nrm(k, shape):
        return jax.random.normal(k, shape, jnp.float32) * 0.02

    return dict(
        emb_w=nrm(ks[0], (n_classes, img_size * img_size)),
        emb_b=jnp.zeros((img_size * img_size,), jnp.float32),
        w1=nrm(ks[1], (4, 4, 4, ndf)),
        w2=nrm(ks[2], (4, 4, ndf, ndf * 2)),
        g2=jnp.ones((ndf * 2,), jnp.float32), b2=jnp.zeros((ndf * 2,), jnp.float32),
        w3=nrm(ks[3], (4, 4, ndf * 2, ndf * 4)),
        g3=jnp.ones((ndf * 4,), jnp.float32), b3=jnp.zeros((ndf * 4,), jnp.float32),
        w4=nrm(ks[4], (4, 4, ndf * 4, ndf * 8)),
        g4=jnp.ones((ndf * 8,), jnp.float32), b4=jnp.zeros((ndf * 8,), jnp.float32),
        w5=nrm(ks[5], (4, 4, ndf * 8, 1)),
    )


# ---------------------------------------------------------------------------
# Plain-JAX reference with identical mixed-precision semantics (for checking)
# ---------------------------------------------------------------------------
def _reference_forward(params, img, labels):
    n, h = img.shape[0], img.shape[1]
    emb = _label_embed(params, labels, h)
    x = jnp.concatenate([img.astype(jnp.float32), emb], axis=-1)

    def conv(x, w, gamma=None, beta=None):
        k, _, cin, cout = w.shape
        p_t, n_, ho, wo = im2col_t(x.astype(COMPUTE_DTYPE), k, 2, 1)
        w_t = jnp.transpose(w.reshape(k * k * cin, cout)).astype(COMPUTE_DTYPE)
        y = jnp.dot(w_t, p_t, preferred_element_type=jnp.float32)   # (Cout, R)
        if gamma is not None:
            mean = jnp.mean(y, axis=1, keepdims=True)
            var = jnp.maximum(jnp.mean(y * y, axis=1, keepdims=True) - mean * mean, 0.0)
            y = ((y - mean) * jax.lax.rsqrt(var + BN_EPS) * gamma[:, None]
                 + beta[:, None])
        y = _lrelu(y).astype(COMPUTE_DTYPE)
        return jnp.transpose(y).reshape(n_, ho, wo, cout)

    x = conv(x, params["w1"])
    x = conv(x, params["w2"], params["g2"], params["b2"])
    x = conv(x, params["w3"], params["g3"], params["b3"])
    x = conv(x, params["w4"], params["g4"], params["b4"])
    return _head(params, x)


if __name__ == "__main__":
    # img_size must be 64 so the final 4x4/s1/p0 conv yields a 1x1 map (standard
    # DCGAN discriminator geometry). Batch 16 keeps things small while still
    # exercising both the single-pass and the two-pass (multi-tile) BN paths.
    N, ndf, nc, n_classes, img_size = 16, 8, 3, 10, 64

    key = jax.random.PRNGKey(0)
    kp, ki, kl = jax.random.split(key, 3)
    params = init_params(kp, ndf, n_classes, img_size)

    img = jax.random.normal(ki, (N, img_size, img_size, nc), jnp.float32)
    label_idx = jax.random.randint(kl, (N,), 0, n_classes)
    labels = jax.nn.one_hot(label_idx, n_classes, dtype=jnp.float32)

    fwd = jax.jit(functools.partial(discriminator_forward, params))
    out = fwd(img, labels)
    jax.block_until_ready(out)

    assert out.shape == (N,), out.shape
    assert bool(jnp.all(jnp.isfinite(out)))

    ref = jax.jit(functools.partial(_reference_forward, params))(img, labels)
    jax.block_until_ready(ref)
    assert bool(jnp.allclose(out, ref, atol=2e-2, rtol=2e-2)), (out, ref)

    print("KERNEL_OK")
</pallas_src>

<mosaic_0001>
module attributes {stable_mosaic.version = 11 : i64} {
  func.func @_mm_act_kernel(%arg0: i32, %arg1: memref<64x1024xbf16, #tpu.memory_space<vmem>>, %arg2: memref<8x64xbf16, #tpu.memory_space<vmem>>, %arg3: memref<8x1024xbf16, #tpu.memory_space<vmem>>) attributes {dimension_semantics = [#tpu.dimension_semantics<parallel>], iteration_bounds = array<i64: 16>, scalar_prefetch = 0 : i64, scratch_operands = 0 : i64, tpu.core_type = #tpu.core_type<tc>, window_params = [{transform_indices = @transform_0, window_bounds = array<i64: 64, 1024>}, {pipeline_mode = #tpu.pipeline_mode<synchronous>, transform_indices = @transform_1, window_bounds = array<i64: 8, 64>}, {transform_indices = @transform_2, window_bounds = array<i64: 8, 1024>}]} {
    %c0 = arith.constant 0 : index
    %c0_0 = arith.constant 0 : index
    %0 = vector.load %arg2[%c0, %c0_0] : memref<8x64xbf16, #tpu.memory_space<vmem>>, vector<8x64xbf16>
    %c0_1 = arith.constant 0 : index
    %c0_2 = arith.constant 0 : index
    %1 = vector.load %arg1[%c0_1, %c0_2] : memref<64x1024xbf16, #tpu.memory_space<vmem>>, vector<64x1024xbf16>
    %cst = arith.constant dense<0.000000e+00> : vector<8x1024xf32>
    %2 = tpu.matmul %0, %1, %cst {dimension_numbers = #tpu.dot_dimension_numbers<[1], [0], [0], [1], [0, 0, 1, 1], [], []>} : vector<8x64xbf16>, vector<64x1024xbf16>, vector<8x1024xf32> -> vector<8x1024xf32>
    %cst_3 = arith.constant 2.000000e-01 : f32
    %3 = vector.broadcast %cst_3 : f32 to vector<8x1024xf32>
    %4 = arith.mulf %3, %2 : vector<8x1024xf32>
    %5 = arith.maximumf %2, %4 : vector<8x1024xf32>
    %6 = arith.truncf %5 : vector<8x1024xf32> to vector<8x1024xbf16>
    %c0_4 = arith.constant 0 : index
    %c0_5 = arith.constant 0 : index
    %7 = vector.load %arg3[%c0_4, %c0_5] : memref<8x1024xbf16, #tpu.memory_space<vmem>>, vector<8x1024xbf16>
    tpu.vector_store %arg3[%c0_4, %c0_5], %6 {strides = array<i32>} : memref<8x1024xbf16, #tpu.memory_space<vmem>>, vector<8x1024xbf16>,
    return
  }
  func.func @transform_0(%arg0: i32) -> (i32, i32) {
    %c0_i32 = arith.constant 0 : i32
    %c0_i32_0 = arith.constant 0 : i32
    return %c0_i32, %arg0 : i32, i32
  }
  func.func @transform_1(%arg0: i32) -> (i32, i32) {
    %c0_i32 = arith.constant 0 : i32
    %c0_i32_0 = arith.constant 0 : i32
    %c0_i32_1 = arith.constant 0 : i32
    return %c0_i32, %c0_i32_0 : i32, i32
  }
  func.func @transform_2(%arg0: i32) -> (i32, i32) {
    %c0_i32 = arith.constant 0 : i32
    %c0_i32_0 = arith.constant 0 : i32
    return %c0_i32, %arg0 : i32, i32
  }
}

module attributes {stable_mosaic.version = 11 : i64} {
  func.func @_mm_partial_stats_kernel(%arg0: i32, %arg1: memref<128x1024xbf16, #tpu.memory_space<vmem>>, %arg2: memref<16x128xbf16, #tpu.memory_space<vmem>>, %arg3: memref<16x1024xbf16, #tpu.memory_space<vmem>>, %arg4: memref<1x16x2xf32, #tpu.memory_space<vmem>>) attributes {dimension_semantics = [#tpu.dimension_semantics<parallel>], iteration_bounds = array<i64: 4>, scalar_prefetch = 0 : i64, scratch_operands = 0 : i64, tpu.core_type = #tpu.core_type<tc>, window_params = [{transform_indices = @transform_0, window_bounds = array<i64: 128, 1024>}, {pipeline_mode = #tpu.pipeline_mode<synchronous>, transform_indices = @transform_1, window_bounds = array<i64: 16, 128>}, {transform_indices = @transform_2, window_bounds = array<i64: 16, 1024>}, {transform_indices = @transform_3, window_bounds = array<i64: 1, 16, 2>}]} {
    %c0 = arith.constant 0 : index
    %c0_0 = arith.constant 0 : index
    %0 = vector.load %arg2[%c0, %c0_0] : memref<16x128xbf16, #tpu.memory_space<vmem>>, vector<16x128xbf16>
    %c0_1 = arith.constant 0 : index
    %c0_2 = arith.constant 0 : index
    %1 = vector.load %arg1[%c0_1, %c0_2] : memref<128x1024xbf16, #tpu.memory_space<vmem>>, vector<128x1024xbf16>
    %cst = arith.constant dense<0.000000e+00> : vector<16x1024xf32>
    %2 = tpu.matmul %0, %1, %cst {dimension_numbers = #tpu.dot_dimension_numbers<[1], [0], [0], [1], [0, 0, 1, 1], [], []>} : vector<16x128xbf16>, vector<128x1024xbf16>, vector<16x1024xf32> -> vector<16x1024xf32>
    %3 = arith.truncf %2 : vector<16x1024xf32> to vector<16x1024xbf16>
    %c0_3 = arith.constant 0 : index
    %c0_4 = arith.constant 0 : index
    %4 = vector.load %arg3[%c0_3, %c0_4] : memref<16x1024xbf16, #tpu.memory_space<vmem>>, vector<16x1024xbf16>
    tpu.vector_store %arg3[%c0_3, %c0_4], %3 {strides = array<i32>} : memref<16x1024xbf16, #tpu.memory_space<vmem>>, vector<16x1024xbf16>,
    %cst_5 = arith.constant dense<0.000000e+00> : vector<16xf32>
    %5 = vector.multi_reduction <add>, %2, %cst_5 [1] : vector<16x1024xf32> to vector<16xf32>
    %6 = vector.shape_cast %5 : vector<16xf32> to vector<16x1xf32>
    %c0_i32 = arith.constant 0 : i32
    %c0_i32_6 = arith.constant 0 : i32
    %c0_i32_7 = arith.constant 0 : i32
    %7 = tpu.memref_slice %arg4[%c0_i32, %c0_i32_6, %c0_i32_7] : memref<1x16x2xf32, #tpu.memory_space<vmem>> -> memref<1x16x2xf32, #tpu.memory_space<vmem>>
    %8 = tpu.memref_squeeze %7 : memref<1x16x2xf32, #tpu.memory_space<vmem>> -> memref<16x2xf32, #tpu.memory_space<vmem>>
    %c0_8 = arith.constant 0 : index
    %c0_9 = arith.constant 0 : index
    %9 = vector.load %8[%c0_8, %c0_9] : memref<16x2xf32, #tpu.memory_space<vmem>>, vector<16x1xf32>
    tpu.vector_store %8[%c0_8, %c0_9], %6 {strides = array<i32>} : memref<16x2xf32, #tpu.memory_space<vmem>>, vector<16x1xf32>,
    %10 = arith.mulf %2, %2 : vector<16x1024xf32>
    %cst_10 = arith.constant dense<0.000000e+00> : vector<16xf32>
    %11 = vector.multi_reduction <add>, %10, %cst_10 [1] : vector<16x1024xf32> to vector<16xf32>
    %12 = vector.shape_cast %11 : vector<16xf32> to vector<16x1xf32>
    %c0_i32_11 = arith.constant 0 : i32
    %c0_i32_12 = arith.constant 0 : i32
    %c0_i32_13 = arith.constant 0 : i32
    %13 = tpu.memref_slice %arg4[%c0_i32_11, %c0_i32_12, %c0_i32_13] : memref<1x16x2xf32, #tpu.memory_space<vmem>> -> memref<1x16x2xf32, #tpu.memory_space<vmem>>
    %14 = tpu.memref_squeeze %13 : memref<1x16x2xf32, #tpu.memory_space<vmem>> -> memref<16x2xf32, #tpu.memory_space<vmem>>
    %c0_14 = arith.constant 0 : index
    %c1 = arith.constant 1 : index
    %15 = vector.load %14[%c0_14, %c1] : memref<16x2xf32, #tpu.memory_space<vmem>>, vector<16x1xf32>
    tpu.vector_store %14[%c0_14, %c1], %12 {strides = array<i32>} : memref<16x2xf32, #tpu.memory_space<vmem>>, vector<16x1xf32>,
    return
  }
  func.func @transform_0(%arg0: i32) -> (i32, i32) {
    %c0_i32 = arith.constant 0 : i32
    %c0_i32_0 = arith.constant 0 : i32
    return %c0_i32, %arg0 : i32, i32
  }
  func.func @transform_1(%arg0: i32) -> (i32, i32) {
    %c0_i32 = arith.constant 0 : i32
    %c0_i32_0 = arith.constant 0 : i32
    %c0_i32_1 = arith.constant 0 : i32
    return %c0_i32, %c0_i32_0 : i32, i32
  }
  func.func @transform_2(%arg0: i32) -> (i32, i32) {
    %c0_i32 = arith.constant 0 : i32
    %c0_i32_0 = arith.constant 0 : i32
    return %c0_i32, %arg0 : i32, i32
  }
  func.func @transform_3(%arg0: i32) -> (i32, i32, i32) {
    %c0_i32 = arith.constant 0 : i32
    %c0_i32_0 = arith.constant 0 : i32
    %c0_i32_1 = arith.constant 0 : i32
    return %arg0, %c0_i32, %c0_i32_0 : i32, i32, i32
  }
}

module attributes {stable_mosaic.version = 11 : i64} {
  func.func @_scale_shift_lrelu_kernel(%arg0: i32, %arg1: memref<16x1024xbf16, #tpu.memory_space<vmem>>, %arg2: memref<16x1xf32, #tpu.memory_space<vmem>>, %arg3: memref<16x1xf32, #tpu.memory_space<vmem>>, %arg4: memref<16x1024xbf16, #tpu.memory_space<vmem>>) attributes {dimension_semantics = [#tpu.dimension_semantics<parallel>], iteration_bounds = array<i64: 4>, scalar_prefetch = 0 : i64, scratch_operands = 0 : i64, tpu.core_type = #tpu.core_type<tc>, window_params = [{transform_indices = @transform_0, window_bounds = array<i64: 16, 1024>}, {pipeline_mode = #tpu.pipeline_mode<synchronous>, transform_indices = @transform_1, window_bounds = array<i64: 16, 1>}, {pipeline_mode = #tpu.pipeline_mode<synchronous>, transform_indices = @transform_2, window_bounds = array<i64: 16, 1>}, {transform_indices = @transform_3, window_bounds = array<i64: 16, 1024>}]} {
    %c0 = arith.constant 0 : index
    %c0_0 = arith.constant 0 : index
    %0 = vector.load %arg1[%c0, %c0_0] : memref<16x1024xbf16, #tpu.memory_space<vmem>>, vector<16x1024xbf16>
    %1 = arith.extf %0 : vector<16x1024xbf16> to vector<16x1024xf32>
    %c0_1 = arith.constant 0 : index
    %c0_2 = arith.constant 0 : index
    %2 = vector.load %arg2[%c0_1, %c0_2] : memref<16x1xf32, #tpu.memory_space<vmem>>, vector<16x1xf32>
    %3 = vector.broadcast %2 : vector<16x1xf32> to vector<16x1024xf32>
    %4 = arith.mulf %1, %3 : vector<16x1024xf32>
    %c0_3 = arith.constant 0 : index
    %c0_4 = arith.constant 0 : index
    %5 = vector.load %arg3[%c0_3, %c0_4] : memref<16x1xf32, #tpu.memory_space<vmem>>, vector<16x1xf32>
    %6 = vector.broadcast %5 : vector<16x1xf32> to vector<16x1024xf32>
    %7 = arith.addf %4, %6 : vector<16x1024xf32>
    %cst = arith.constant 2.000000e-01 : f32
    %8 = vector.broadcast %cst : f32 to vector<16x1024xf32>
    %9 = arith.mulf %8, %7 : vector<16x1024xf32>
    %10 = arith.maximumf %7, %9 : vector<16x1024xf32>
    %11 = arith.truncf %10 : vector<16x1024xf32> to vector<16x1024xbf16>
    %c0_5 = arith.constant 0 : index
    %c0_6 = arith.constant 0 : index
    %12 = vector.load %arg4[%c0_5, %c0_6] : memref<16x1024xbf16, #tpu.memory_space<vmem>>, vector<16x1024xbf16>
    tpu.vector_store %arg4[%c0_5, %c0_6], %11 {strides = array<i32>} : memref<16x1024xbf16, #tpu.memory_space<vmem>>, vector<16x1024xbf16>,
    return
  }
  func.func @transform_0(%arg0: i32) -> (i32, i32) {
    %c0_i32 = arith.constant 0 : i32
    %c0_i32_0 = arith.constant 0 : i32
    return %c0_i32, %arg0 : i32, i32
  }
  func.func @transform_1(%arg0: i32) -> (i32, i32) {
    %c0_i32 = arith.constant 0 : i32
    %c0_i32_0 = arith.constant 0 : i32
    %c0_i32_1 = arith.constant 0 : i32
    return %c0_i32, %c0_i32_0 : i32, i32
  }
  func.func @transform_2(%arg0: i32) -> (i32, i32) {
    %c0_i32 = arith.constant 0 : i32
    %c0_i32_0 = arith.constant 0 : i32
    %c0_i32_1 = arith.constant 0 : i32
    return %c0_i32, %c0_i32_0 : i32, i32
  }
  func.func @transform_3(%arg0: i32) -> (i32, i32) {
    %c0_i32 = arith.constant 0 : i32
    %c0_i32_0 = arith.constant 0 : i32
    return %c0_i32, %arg0 : i32, i32
  }
}

module attributes {stable_mosaic.version = 11 : i64} {
  func.func @_mm_bn_lrelu_single_kernel(%arg0: i32, %arg1: memref<256x1024xbf16, #tpu.memory_space<vmem>>, %arg2: memref<32x256xbf16, #tpu.memory_space<vmem>>, %arg3: memref<32x1xf32, #tpu.memory_space<vmem>>, %arg4: memref<32x1xf32, #tpu.memory_space<vmem>>, %arg5: memref<32x1024xbf16, #tpu.memory_space<vmem>>) attributes {dimension_semantics = [#tpu.dimension_semantics<arbitrary>], iteration_bounds = array<i64: 1>, scalar_prefetch = 0 : i64, scratch_operands = 0 : i64, tpu.core_type = #tpu.core_type<tc>, window_params = [{pipeline_mode = #tpu.pipeline_mode<synchronous>, transform_indices = @transform_0, window_bounds = array<i64: 256, 1024>}, {pipeline_mode = #tpu.pipeline_mode<synchronous>, transform_indices = @transform_1, window_bounds = array<i64: 32, 256>}, {pipeline_mode = #tpu.pipeline_mode<synchronous>, transform_indices = @transform_2, window_bounds = array<i64: 32, 1>}, {pipeline_mode = #tpu.pipeline_mode<synchronous>, transform_indices = @transform_3, window_bounds = array<i64: 32, 1>}, {pipeline_mode = #tpu.pipeline_mode<synchronous>, transform_indices = @transform_4, window_bounds = array<i64: 32, 1024>}]} {
    %c0 = arith.constant 0 : index
    %c0_0 = arith.constant 0 : index
    %0 = vector.load %arg2[%c0, %c0_0] : memref<32x256xbf16, #tpu.memory_space<vmem>>, vector<32x256xbf16>
    %c0_1 = arith.constant 0 : index
    %c0_2 = arith.constant 0 : index
    %1 = vector.load %arg1[%c0_1, %c0_2] : memref<256x1024xbf16, #tpu.memory_space<vmem>>, vector<256x1024xbf16>
    %cst = arith.constant dense<0.000000e+00> : vector<32x1024xf32>
    %2 = tpu.matmul %0, %1, %cst {dimension_numbers = #tpu.dot_dimension_numbers<[1], [0], [0], [1], [0, 0, 1, 1], [], []>} : vector<32x256xbf16>, vector<256x1024xbf16>, vector<32x1024xf32> -> vector<32x1024xf32>
    %cst_3 = arith.constant dense<0.000000e+00> : vector<32xf32>
    %3 = vector.multi_reduction <add>, %2, %cst_3 [1] : vector<32x1024xf32> to vector<32xf32>
    %4 = vector.shape_cast %3 : vector<32xf32> to vector<32x1xf32>
    %5 = arith.mulf %2, %2 : vector<32x1024xf32>
    %cst_4 = arith.constant dense<0.000000e+00> : vector<32xf32>
    %6 = vector.multi_reduction <add>, %5, %cst_4 [1] : vector<32x1024xf32> to vector<32xf32>
    %7 = vector.shape_cast %6 : vector<32xf32> to vector<32x1xf32>
    %cst_5 = arith.constant 9.765625E-4 : f32
    %8 = vector.broadcast %cst_5 : f32 to vector<32x1xf32>
    %9 = arith.mulf %4, %8 : vector<32x1xf32>
    %cst_6 = arith.constant 9.765625E-4 : f32
    %10 = vector.broadcast %cst_6 : f32 to vector<32x1xf32>
    %11 = arith.mulf %7, %10 : vector<32x1xf32>
    %12 = arith.mulf %9, %9 : vector<32x1xf32>
    %13 = arith.subf %11, %12 : vector<32x1xf32>
    %cst_7 = arith.constant 0.000000e+00 : f32
    %14 = vector.broadcast %cst_7 : f32 to vector<32x1xf32>
    %15 = arith.maximumf %13, %14 : vector<32x1xf32>
    %c0_8 = arith.constant 0 : index
    %c0_9 = arith.constant 0 : index
    %16 = vector.load %arg3[%c0_8, %c0_9] : memref<32x1xf32, #tpu.memory_space<vmem>>, vector<32x1xf32>
    %cst_10 = arith.constant 9.99999974E-6 : f32
    %17 = vector.broadcast %cst_10 : f32 to vector<32x1xf32>
    %18 = arith.addf %15, %17 : vector<32x1xf32>
    %19 = math.rsqrt %18 : vector<32x1xf32>
    %20 = arith.mulf %16, %19 : vector<32x1xf32>
    %c0_11 = arith.constant 0 : index
    %c0_12 = arith.constant 0 : index
    %21 = vector.load %arg4[%c0_11, %c0_12] : memref<32x1xf32, #tpu.memory_space<vmem>>, vector<32x1xf32>
    %22 = arith.mulf %9, %20 : vector<32x1xf32>
    %23 = arith.subf %21, %22 : vector<32x1xf32>
    %24 = vector.broadcast %20 : vector<32x1xf32> to vector<32x1024xf32>
    %25 = arith.mulf %2, %24 : vector<32x1024xf32>
    %26 = vector.broadcast %23 : vector<32x1xf32> to vector<32x1024xf32>
    %27 = arith.addf %25, %26 : vector<32x1024xf32>
    %cst_13 = arith.constant 2.000000e-01 : f32
    %28 = vector.broadcast %cst_13 : f32 to vector<32x1024xf32>
    %29 = arith.mulf %28, %27 : vector<32x1024xf32>
    %30 = arith.maximumf %27, %29 : vector<32x1024xf32>
    %31 = arith.truncf %30 : vector<32x1024xf32> to vector<32x1024xbf16>
    %c0_14 = arith.constant 0 : index
    %c0_15 = arith.constant 0 : index
    %32 = vector.load %arg5[%c0_14, %c0_15] : memref<32x1024xbf16, #tpu.memory_space<vmem>>, vector<32x1024xbf16>
    tpu.vector_store %arg5[%c0_14, %c0_15], %31 {strides = array<i32>} : memref<32x1024xbf16, #tpu.memory_space<vmem>>, vector<32x1024xbf16>,
    return
  }
  func.func @transform_0(%arg0: i32) -> (i32, i32) {
    %c0_i32 = arith.constant 0 : i32
    %c0_i32_0 = arith.constant 0 : i32
    %c0_i32_1 = arith.constant 0 : i32
    return %c0_i32, %c0_i32_0 : i32, i32
  }
  func.func @transform_1(%arg0: i32) -> (i32, i32) {
    %c0_i32 = arith.constant 0 : i32
    %c0_i32_0 = arith.constant 0 : i32
    %c0_i32_1 = arith.constant 0 : i32
    return %c0_i32, %c0_i32_0 : i32, i32
  }
  func.func @transform_2(%arg0: i32) -> (i32, i32) {
    %c0_i32 = arith.constant 0 : i32
    %c0_i32_0 = arith.constant 0 : i32
    %c0_i32_1 = arith.constant 0 : i32
    return %c0_i32, %c0_i32_0 : i32, i32
  }
  func.func @transform_3(%arg0: i32) -> (i32, i32) {
    %c0_i32 = arith.constant 0 : i32
    %c0_i32_0 = arith.constant 0 : i32
    %c0_i32_1 = arith.constant 0 : i32
    return %c0_i32, %c0_i32_0 : i32, i32
  }
  func.func @transform_4(%arg0: i32) -> (i32, i32) {
    %c0_i32 = arith.constant 0 : i32
    %c0_i32_0 = arith.constant 0 : i32
    %c0_i32_1 = arith.constant 0 : i32
    return %c0_i32, %c0_i32_0 : i32, i32
  }
}

module attributes {stable_mosaic.version = 11 : i64} {
  func.func @_mm_bn_lrelu_single_kernel(%arg0: i32, %arg1: memref<512x256xbf16, #tpu.memory_space<vmem>>, %arg2: memref<64x512xbf16, #tpu.memory_space<vmem>>, %arg3: memref<64x1xf32, #tpu.memory_space<vmem>>, %arg4: memref<64x1xf32, #tpu.memory_space<vmem>>, %arg5: memref<64x256xbf16, #tpu.memory_space<vmem>>) attributes {dimension_semantics = [#tpu.dimension_semantics<arbitrary>], iteration_bounds = array<i64: 1>, scalar_prefetch = 0 : i64, scratch_operands = 0 : i64, tpu.core_type = #tpu.core_type<tc>, window_params = [{pipeline_mode = #tpu.pipeline_mode<synchronous>, transform_indices = @transform_0, window_bounds = array<i64: 512, 256>}, {pipeline_mode = #tpu.pipeline_mode<synchronous>, transform_indices = @transform_1, window_bounds = array<i64: 64, 512>}, {pipeline_mode = #tpu.pipeline_mode<synchronous>, transform_indices = @transform_2, window_bounds = array<i64: 64, 1>}, {pipeline_mode = #tpu.pipeline_mode<synchronous>, transform_indices = @transform_3, window_bounds = array<i64: 64, 1>}, {pipeline_mode = #tpu.pipeline_mode<synchronous>, transform_indices = @transform_4, window_bounds = array<i64: 64, 256>}]} {
    %c0 = arith.constant 0 : index
    %c0_0 = arith.constant 0 : index
    %0 = vector.load %arg2[%c0, %c0_0] : memref<64x512xbf16, #tpu.memory_space<vmem>>, vector<64x512xbf16>
    %c0_1 = arith.constant 0 : index
    %c0_2 = arith.constant 0 : index
    %1 = vector.load %arg1[%c0_1, %c0_2] : memref<512x256xbf16, #tpu.memory_space<vmem>>, vector<512x256xbf16>
    %cst = arith.constant dense<0.000000e+00> : vector<64x256xf32>
    %2 = tpu.matmul %0, %1, %cst {dimension_numbers = #tpu.dot_dimension_numbers<[1], [0], [0], [1], [0, 0, 1, 1], [], []>} : vector<64x512xbf16>, vector<512x256xbf16>, vector<64x256xf32> -> vector<64x256xf32>
    %cst_3 = arith.constant dense<0.000000e+00> : vector<64xf32>
    %3 = vector.multi_reduction <add>, %2, %cst_3 [1] : vector<64x256xf32> to vector<64xf32>
    %4 = vector.shape_cast %3 : vector<64xf32> to vector<64x1xf32>
    %5 = arith.mulf %2, %2 : vector<64x256xf32>
    %cst_4 = arith.constant dense<0.000000e+00> : vector<64xf32>
    %6 = vector.multi_reduction <add>, %5, %cst_4 [1] : vector<64x256xf32> to vector<64xf32>
    %7 = vector.shape_cast %6 : vector<64xf32> to vector<64x1xf32>
    %cst_5 = arith.constant 3.906250e-03 : f32
    %8 = vector.broadcast %cst_5 : f32 to vector<64x1xf32>
    %9 = arith.mulf %4, %8 : vector<64x1xf32>
    %cst_6 = arith.constant 3.906250e-03 : f32
    %10 = vector.broadcast %cst_6 : f32 to vector<64x1xf32>
    %11 = arith.mulf %7, %10 : vector<64x1xf32>
    %12 = arith.mulf %9, %9 : vector<64x1xf32>
    %13 = arith.subf %11, %12 : vector<64x1xf32>
    %cst_7 = arith.constant 0.000000e+00 : f32
    %14 = vector.broadcast %cst_7 : f32 to vector<64x1xf32>
    %15 = arith.maximumf %13, %14 : vector<64x1xf32>
    %c0_8 = arith.constant 0 : index
    %c0_9 = arith.constant 0 : index
    %16 = vector.load %arg3[%c0_8, %c0_9] : memref<64x1xf32, #tpu.memory_space<vmem>>, vector<64x1xf32>
    %cst_10 = arith.constant 9.99999974E-6 : f32
    %17 = vector.broadcast %cst_10 : f32 to vector<64x1xf32>
    %18 = arith.addf %15, %17 : vector<64x1xf32>
    %19 = math.rsqrt %18 : vector<64x1xf32>
    %20 = arith.mulf %16, %19 : vector<64x1xf32>
    %c0_11 = arith.constant 0 : index
    %c0_12 = arith.constant 0 : index
    %21 = vector.load %arg4[%c0_11, %c0_12] : memref<64x1xf32, #tpu.memory_space<vmem>>, vector<64x1xf32>
    %22 = arith.mulf %9, %20 : vector<64x1xf32>
    %23 = arith.subf %21, %22 : vector<64x1xf32>
    %24 = vector.broadcast %20 : vector<64x1xf32> to vector<64x256xf32>
    %25 = arith.mulf %2, %24 : vector<64x256xf32>
    %26 = vector.broadcast %23 : vector<64x1xf32> to vector<64x256xf32>
    %27 = arith.addf %25, %26 : vector<64x256xf32>
    %cst_13 = arith.constant 2.000000e-01 : f32
    %28 = vector.broadcast %cst_13 : f32 to vector<64x256xf32>
    %29 = arith.mulf %28, %27 : vector<64x256xf32>
    %30 = arith.maximumf %27, %29 : vector<64x256xf32>
    %31 = arith.truncf %30 : vector<64x256xf32> to vector<64x256xbf16>
    %c0_14 = arith.constant 0 : index
    %c0_15 = arith.constant 0 : index
    %32 = vector.load %arg5[%c0_14, %c0_15] : memref<64x256xbf16, #tpu.memory_space<vmem>>, vector<64x256xbf16>
    tpu.vector_store %arg5[%c0_14, %c0_15], %31 {strides = array<i32>} : memref<64x256xbf16, #tpu.memory_space<vmem>>, vector<64x256xbf16>,
    return
  }
  func.func @transform_0(%arg0: i32) -> (i32, i32) {
    %c0_i32 = arith.constant 0 : i32
    %c0_i32_0 = arith.constant 0 : i32
    %c0_i32_1 = arith.constant 0 : i32
    return %c0_i32, %c0_i32_0 : i32, i32
  }
  func.func @transform_1(%arg0: i32) -> (i32, i32) {
    %c0_i32 = arith.constant 0 : i32
    %c0_i32_0 = arith.constant 0 : i32
    %c0_i32_1 = arith.constant 0 : i32
    return %c0_i32, %c0_i32_0 : i32, i32
  }
  func.func @transform_2(%arg0: i32) -> (i32, i32) {
    %c0_i32 = arith.constant 0 : i32
    %c0_i32_0 = arith.constant 0 : i32
    %c0_i32_1 = arith.constant 0 : i32
    return %c0_i32, %c0_i32_0 : i32, i32
  }
  func.func @transform_3(%arg0: i32) -> (i32, i32) {
    %c0_i32 = arith.constant 0 : i32
    %c0_i32_0 = arith.constant 0 : i32
    %c0_i32_1 = arith.constant 0 : i32
    return %c0_i32, %c0_i32_0 : i32, i32
  }
  func.func @transform_4(%arg0: i32) -> (i32, i32) {
    %c0_i32 = arith.constant 0 : i32
    %c0_i32_0 = arith.constant 0 : i32
    %c0_i32_1 = arith.constant 0 : i32
    return %c0_i32, %c0_i32_0 : i32, i32
  }
}

</mosaic_0001>

<bundles_post_ra>
// kernel: discriminator_forward.5
= control target key start
LH: loop header
LB: loop body
LE: loop exit
PB: predicated region body
PF: predicated region fallthrough
CT: control target
= control target key end

     0   :  { %s827_s9 = smov 0   ;;  %s829_s10 = smov 0   ;;  %s992_s0 = inlined_call_operand.vmem [shape: bf16[64,16384], index: 0, kind: input, shape index: {}]   ;;  %s993_s1 = inlined_call_operand.vmem [shape: bf16[8,64], index: 1, kind: input, shape index: {}]   ;;  %s994_s2 = inlined_call_operand.vmem [shape: bf16[8,16384], index: 2, kind: output, shape index: {}]  }
   0x1   :  { %s831_s11 = smov 0  }
   0x2 LB: > { %s704_s12 = sadd.s32 4294967295, %s809_s11   ;;  %s844_s13 = sadd.s32 1, %s809_s11   ;;  %s809_s11 = sphi %s831_s11, %s997_s11   ;;  %s805_s10 = sphi %s829_s10, %s996_s10   ;;  %s801_s9 = sphi %s827_s9, %s995_s9  }
   0x3   : > { %s16_s14 = ssub.s32 %s809_s11, %s844_s13  ;;  %s19_s15 = sadd.s32 1, %s805_s10 }
   0x4   : > { %p17_p0 = scmp.eq.s32.totalorder %s16_s14, 0  ;;  %p26_p1 = scmp.ne.s32.totalorder %s805_s10, %s801_s9 }
   0x5   : > { %p27_p2 = scmp.eq.s32.totalorder %s809_s11, 0  ;;  %p707_p4 = scmp.ge.s32.totalorder %s809_s11, 16 }
   0x6   : > { %s853_s16 = scalar_select %p17_p0, %s805_s10, %s19_s15  }
   0x7   : > { %p28_p3 = por %p27_p2, %p26_p1  ;;  %102 = sbr.rel (%p707_p4) target bundleno = 32 (0x20), region = 20 }
   0xc   : > { %105 = sbr.rel (!%p28_p3) target bundleno = 32 (0x20), region = 24  ;;  %s107_s17 = sand.u32 (%p28_p3), 1, %s805_s10  }
   0xd   : > { %s757_s18 = sshll.u32 (%p28_p3), %s809_s11, 5  ;;  %s708_s19 = sshll.u32 (%p28_p3), %s107_s17, 8 }
   0xe   : > { %s861_s22 = scalar_lea.vmem (%p28_p3), %s992_s0, %s757_s18  ;;  %s866_s23 = scalar_lea.vmem (%p28_p3), [#allocation2], %s708_s19 }
   0xf   : > { %v125_v0 = vld [vmem:[%s861_s22] sm:$0xff] (%p28_p3)  ;;  %v127_v1 = vld [vmem:[%s861_s22 + $0x8] sm:$0xff] (%p28_p3)  ;;  %v129_v2 = vld [vmem:[%s861_s22 + $0x10] sm:$0xff] (%p28_p3) }
  0x10   : > { %126 = vst [vmem:[%s866_s23] sm:$0xff] (%p28_p3), %v125_v0  ;;  %128 = vst [vmem:[%s866_s23 + $0x8] sm:$0xff] (%p28_p3), %v127_v1  ;;  %v131_v3 = vld [vmem:[%s861_s22 + $0x18] sm:$0xff] (%p28_p3)  ;;  %v133_v4 = vld [vmem:[%s861_s22 + $0x200] sm:$0xff] (%p28_p3) }
  0x11   : > { %130 = vst [vmem:[%s866_s23 + $0x10] sm:$0xff] %v129_v2  ;;  %v135_v5 = vld [vmem:[%s861_s22 + $0x208] sm:$0xff]  ;;  %132 = vst [vmem:[%s866_s23 + $0x18] sm:$0xff] %v131_v3  ;;  %v137_v6 = vld [vmem:[%s861_s22 + $0x210] sm:$0xff] }
  0x12   : > { %134 = vst [vmem:[%s866_s23 + $0x20] sm:$0xff] %v133_v4  ;;  %136 = vst [vmem:[%s866_s23 + $0x28] sm:$0xff] %v135_v5  ;;  %v139_v7 = vld [vmem:[%s861_s22 + $0x218] sm:$0xff]  ;;  %v141_v8 = vld [vmem:[%s861_s22 + $0x400] sm:$0xff] }
  0x13   : > { %138 = vst [vmem:[%s866_s23 + $0x30] sm:$0xff] %v137_v6  ;;  %140 = vst [vmem:[%s866_s23 + $0x38] sm:$0xff] %v139_v7  ;;  %v143_v9 = vld [vmem:[%s861_s22 + $0x408] sm:$0xff]  ;;  %v145_v10 = vld [vmem:[%s861_s22 + $0x410] sm:$0xff] }
  0x14   : > { %142 = vst [vmem:[%s866_s23 + $0x40] sm:$0xff] %v141_v8  ;;  %v147_v11 = vld [vmem:[%s861_s22 + $0x418] sm:$0xff]  ;;  %144 = vst [vmem:[%s866_s23 + $0x48] sm:$0xff] %v143_v9  ;;  %v149_v12 = vld [vmem:[%s861_s22 + $0x600] sm:$0xff] }
  0x15   : > { %146 = vst [vmem:[%s866_s23 + $0x50] sm:$0xff] %v145_v10  ;;  %148 = vst [vmem:[%s866_s23 + $0x58] sm:$0xff] %v147_v11  ;;  %v151_v13 = vld [vmem:[%s861_s22 + $0x608] sm:$0xff]  ;;  %v153_v14 = vld [vmem:[%s861_s22 + $0x610] sm:$0xff] }
  0x16   : > { %150 = vst [vmem:[%s866_s23 + $0x60] sm:$0xff] %v149_v12  ;;  %152 = vst [vmem:[%s866_s23 + $0x68] sm:$0xff] %v151_v13  ;;  %v155_v15 = vld [vmem:[%s861_s22 + $0x618] sm:$0xff]  ;;  %v157_v16 = vld [vmem:[%s861_s22 + $0x800] sm:$0xff] }
  0x17   : > { %154 = vst [vmem:[%s866_s23 + $0x70] sm:$0xff] %v153_v14  ;;  %v159_v17 = vld [vmem:[%s861_s22 + $0x808] sm:$0xff]  ;;  %156 = vst [vmem:[%s866_s23 + $0x78] sm:$0xff] %v155_v15  ;;  %v161_v18 = vld [vmem:[%s861_s22 + $0x810] sm:$0xff] }
  0x18   : > { %158 = vst [vmem:[%s866_s23 + $0x80] sm:$0xff] %v157_v16  ;;  %160 = vst [vmem:[%s866_s23 + $0x88] sm:$0xff] %v159_v17  ;;  %v163_v19 = vld [vmem:[%s861_s22 + $0x818] sm:$0xff]  ;;  %v165_v20 = vld [vmem:[%s861_s22 + $0xa00] sm:$0xff] }
  0x19   : > { %162 = vst [vmem:[%s866_s23 + $0x90] sm:$0xff] %v161_v18  ;;  %164 = vst [vmem:[%s866_s23 + $0x98] sm:$0xff] %v163_v19  ;;  %v167_v21 = vld [vmem:[%s861_s22 + $0xa08] sm:$0xff]  ;;  %v169_v22 = vld [vmem:[%s861_s22 + $0xa10] sm:$0xff] }
  0x1a   : > { %166 = vst [vmem:[%s866_s23 + $0xa0] sm:$0xff] %v165_v20  ;;  %v171_v23 = vld [vmem:[%s861_s22 + $0xa18] sm:$0xff]  ;;  %168 = vst [vmem:[%s866_s23 + $0xa8] sm:$0xff] %v167_v21  ;;  %v173_v24 = vld [vmem:[%s861_s22 + $0xc00] sm:$0xff] }
  0x1b   : > { %170 = vst [vmem:[%s866_s23 + $0xb0] sm:$0xff] %v169_v22  ;;  %172 = vst [vmem:[%s866_s23 + $0xb8] sm:$0xff] %v171_v23  ;;  %v175_v25 = vld [vmem:[%s861_s22 + $0xc08] sm:$0xff]  ;;  %v177_v26 = vld [vmem:[%s861_s22 + $0xc10] sm:$0xff] }
  0x1c   : > { %174 = vst [vmem:[%s866_s23 + $0xc0] sm:$0xff] %v173_v24  ;;  %176 = vst [vmem:[%s866_s23 + $0xc8] sm:$0xff] %v175_v25  ;;  %v179_v27 = vld [vmem:[%s861_s22 + $0xc18] sm:$0xff]  ;;  %v181_v28 = vld [vmem:[%s861_s22 + $0xe00] sm:$0xff] }
  0x1d   : > { %178 = vst [vmem:[%s866_s23 + $0xd0] sm:$0xff] %v177_v26  ;;  %v183_v29 = vld [vmem:[%s861_s22 + $0xe08] sm:$0xff]  ;;  %180 = vst [vmem:[%s866_s23 + $0xd8] sm:$0xff] %v179_v27  ;;  %v185_v30 = vld [vmem:[%s861_s22 + $0xe10] sm:$0xff] }
  0x1e   : > { %182 = vst [vmem:[%s866_s23 + $0xe0] sm:$0xff] %v181_v28  ;;  %184 = vst [vmem:[%s866_s23 + $0xe8] sm:$0xff] %v183_v29  ;;  %v187_v31 = vld [vmem:[%s861_s22 + $0xe18] sm:$0xff] }
  0x1f   : > { %186 = vst [vmem:[%s866_s23 + $0xf0] sm:$0xff] %v185_v30  ;;  %188 = vst [vmem:[%s866_s23 + $0xf8] sm:$0xff] %v187_v31 }
  0x20 PF: > { %p711_p5 = scmp.ge.s32.totalorder %s809_s11, 1  ;;  %p193_p6 = scmp.lt.s32.totalorder %s809_s11, 17 }
  0x22   : > { %p194_p7 = pnand %p711_p5, %p193_p6 }
  0x23   : > { %s200_s24 = sand.u32 (!%p194_p7), 1, %s801_s9   ;;  %s713_s29 = sshll.u32 (!%p194_p7), %s704_s12, 3 }
  0x24   : > { %197 = sbr.rel (%p194_p7) target bundleno = 279 (0x117), region = 47  ;;  %s712_s25 = sshll.u32 (!%p194_p7), %s200_s24, 8 }
  0x25   : > { %s934_s26 = scalar_lea.vmem (!%p194_p7), [#allocation2], %s712_s25  ;;  %p223_p8 = scmp.lt.s32.totalorder (!%p194_p7), %s713_s29, 127 }
  0x29   : > { %v811_v32 = vmov 0   ;;  %v254_v33 = vld [vmem:[%s934_s26 + $0xc0] sm:$0xff]  ;;  %v255_v35 = vld [vmem:[%s934_s26 + $0xc8] sm:$0xff]  ;;  %v256_v63 = vld [vmem:[%s934_s26 + $0xd0] sm:$0xff]  ;;  %vm422_vm0 = vcmask 523264   ;;  %s999_s29 = smov (!%p223_p8, %s713_s29), 127 }
  0x2a   : > { %458 = vmatprep.mubr.bf16.mxu0 %v811_v32  ;;  %499 = vmatprep.mubr.bf16.mxu1 %v811_v32  ;;  %v258_v34 = vld [vmem:[%s934_s26 + $0xe0] sm:$0xff]  ;;  %v259_v37 = vld [vmem:[%s934_s26 + $0xe8] sm:$0xff]  ;;  %v260_v0 = vld [vmem:[%s934_s26 + $0xf0] sm:$0xff]  ;;  %s714_s30 = sshll.u32 %s999_s29, 2 }
  0x2b   : > { %v740_v36 = vcombine.high %v254_v33, %v258_v34  ;;  %v739_v38 = vcombine.low %v254_v33, %v258_v34  ;;  %v246_v39 = vld [vmem:[%s934_s26 + $0x80] sm:$0xff]  ;;  %v742_v41 = vcombine.high %v255_v35, %v259_v37  ;;  %v741_v42 = vcombine.low %v255_v35, %v259_v37  ;;  %v247_v44 = vld [vmem:[%s934_s26 + $0x88] sm:$0xff]  ;;  %v257_v1 = vld [vmem:[%s934_s26 + $0xd8] sm:$0xff]  ;;  %s226_s5 = scalar_lea.vmem %s994_s2, %s714_s30 }
  0x2c   : > { %v250_v40 = vld [vmem:[%s934_s26 + $0xa0] sm:$0xff]  ;;  %v251_v45 = vld [vmem:[%s934_s26 + $0xa8] sm:$0xff]  ;;  %v261_v2 = vld [vmem:[%s934_s26 + $0xf8] sm:$0xff]  ;;  %v744_v5 = vcombine.high %v256_v63, %v260_v0  ;;  %v743_v12 = vcombine.low %v256_v63, %v260_v0 }
  0x2d   : > { %v732_v43 = vcombine.high %v246_v39, %v250_v40  ;;  %v238_v46 = vld [vmem:[%s934_s26 + $0x40] sm:$0xff]  ;;  %434 = vmatprep.subr.bf16.mxu0 %v740_v36  ;;  %v734_v47 = vcombine.high %v247_v44, %v251_v45  ;;  %v239_v49 = vld [vmem:[%s934_s26 + $0x48] sm:$0xff]  ;;  %475 = vmatprep.subr.bf16.mxu1 %v742_v41  ;;  %v731_v51 = vcombine.low %v246_v39, %v250_v40  ;;  %v248_v7 = vld [vmem:[%s934_s26 + $0x90] sm:$0xff] }
  0x2e   : > { %v242_v48 = vld [vmem:[%s934_s26 + $0x60] sm:$0xff]  ;;  %v243_v50 = vld [vmem:[%s934_s26 + $0x68] sm:$0xff]  ;;  %435 = vmatpush1.bf16.msra.mxu0 %v739_v38  ;;  %476 = vmatpush1.bf16.msra.mxu1 %v741_v42  ;;  %v733_v52 = vcombine.low %v247_v44, %v251_v45  ;;  %v746_v6 = vcombine.high %v257_v1, %v261_v2  ;;  %v252_v8 = vld [vmem:[%s934_s26 + $0xb0] sm:$0xff]  ;;  %v745_v13 = vcombine.low %v257_v1, %v261_v2 }
  0x2f   : > { %436 = vmatprep.subr.bf16.mxu0 %v732_v43  ;;  %v724_v53 = vcombine.high %v238_v46, %v242_v48  ;;  %477 = vmatprep.subr.bf16.mxu1 %v734_v47  ;;  %v726_v54 = vcombine.high %v239_v49, %v243_v50  ;;  %v230_v55 = vld [vmem:[%s934_s26] sm:$0xff]  ;;  %v231_v57 = vld [vmem:[%s934_s26 + $0x8] sm:$0xff]  ;;  %v723_v59 = vcombine.low %v238_v46, %v242_v48  ;;  %v249_v9 = vld [vmem:[%s934_s26 + $0x98] sm:$0xff] }
  0x30   : > { %v234_v56 = vld [vmem:[%s934_s26 + $0x20] sm:$0xff]  ;;  %v235_v58 = vld [vmem:[%s934_s26 + $0x28] sm:$0xff]  ;;  %v725_v60 = vcombine.low %v239_v49, %v243_v50  ;;  %v253_v10 = vld [vmem:[%s934_s26 + $0xb8] sm:$0xff]  ;;  %v736_v14 = vcombine.high %v248_v7, %v252_v8  ;;  %v735_v20 = vcombine.low %v248_v7, %v252_v8 }
  0x31   : > { %v716_v61 = vcombine.high %v230_v55, %v234_v56  ;;  %v718_v62 = vcombine.high %v231_v57, %v235_v58  ;;  %v715_v3 = vcombine.low %v230_v55, %v234_v56  ;;  %v717_v4 = vcombine.low %v231_v57, %v235_v58  ;;  %v229_v11 = vld [vmem:[%s993_s1] sm:$0xf]  ;;  %v240_v16 = vld [vmem:[%s934_s26 + $0x50] sm:$0xff]  ;;  %v241_v18 = vld [vmem:[%s934_s26 + $0x58] sm:$0xff] }
  0x32   : > { %437 = vmatpush1.bf16.msra.mxu0 %v731_v51  ;;  %478 = vmatpush1.bf16.msra.mxu1 %v733_v52  ;;  %v738_v15 = vcombine.high %v249_v9, %v253_v10  ;;  %v244_v17 = vld [vmem:[%s934_s26 + $0x70] sm:$0xff]  ;;  %v245_v19 = vld [vmem:[%s934_s26 + $0x78] sm:$0xff]  ;;  %v737_v21 = vcombine.low %v249_v9, %v253_v10 }
  0x33   : > { %438 = vmatprep.subr.bf16.mxu0 %v724_v53  ;;  %479 = vmatprep.subr.bf16.mxu1 %v726_v54  ;;  %v728_v22 = vcombine.high %v240_v16, %v244_v17  ;;  %v730_v23 = vcombine.high %v241_v18, %v245_v19  ;;  %v232_v24 = vld [vmem:[%s934_s26 + $0x10] sm:$0xff]  ;;  %v233_v26 = vld [vmem:[%s934_s26 + $0x18] sm:$0xff]  ;;  %v727_v28 = vcombine.low %v240_v16, %v244_v17 }
  0x34   : > { %v236_v25 = vld [vmem:[%s934_s26 + $0x30] sm:$0xff]  ;;  %v237_v27 = vld [vmem:[%s934_s26 + $0x38] sm:$0xff]  ;;  %v729_v29 = vcombine.low %v241_v18, %v245_v19 }
  0x35   : > { %v720_v30 = vcombine.high %v232_v24, %v236_v25  ;;  %v722_v31 = vcombine.high %v233_v26, %v237_v27  ;;  %v719_v33 = vcombine.low %v232_v24, %v236_v25  ;;  %v721_v34 = vcombine.low %v233_v26, %v237_v27 }
  0x36   : > { %439 = vmatpush1.bf16.msra.mxu0 %v723_v59  ;;  %480 = vmatpush1.bf16.msra.mxu1 %v725_v60 }
  0x37   : > { %440 = vmatprep.subr.bf16.mxu0 %v716_v61  ;;  %481 = vmatprep.subr.bf16.mxu1 %v718_v62 }
  0x3a   : > { %441 = vmatpush1.bf16.msra.mxu0 %v715_v3  ;;  %482 = vmatpush1.bf16.msra.mxu1 %v717_v4 }
  0x3b   : > { %516 = vmatprep.subr.bf16.mxu0 %v744_v5  ;;  %557 = vmatprep.subr.bf16.mxu1 %v746_v6 }
  0x3d   : > { %747 = vmatmul.mubr.msk.bf16.vlgmr.msra.gmra.mxu0 %vm422_vm0, %v229_v11  ;;  %748 = vmatmul.mubr.msk.bf16.vlgmr.msra.gmra.mxu1 %vm422_vm0, %v229_v11 }
  0x3e   : > { %517 = vmatpush1.bf16.msra.mxu0 %v743_v12  ;;  %558 = vmatpush1.bf16.msra.mxu1 %v745_v13 }
  0x3f   : > { %518 = vmatprep.subr.bf16.mxu0 %v736_v14  ;;  %559 = vmatprep.subr.bf16.mxu1 %v738_v15 }
  0x40   : > { %540 = vmatprep.mubr.bf16.mxu0 %v811_v32  ;;  %581 = vmatprep.mubr.bf16.mxu1 %v811_v32 }
  0x42   : > { %519 = vmatpush1.bf16.msra.mxu0 %v735_v20  ;;  %560 = vmatpush1.bf16.msra.mxu1 %v737_v21 }
  0x43   : > { %520 = vmatprep.subr.bf16.mxu0 %v728_v22  ;;  %561 = vmatprep.subr.bf16.mxu1 %v730_v23 }
  0x46   : > { %521 = vmatpush1.bf16.msra.mxu0 %v727_v28  ;;  %562 = vmatpush1.bf16.msra.mxu1 %v729_v29 }
  0x47   : > { %522 = vmatprep.subr.bf16.mxu0 %v720_v30  ;;  %563 = vmatprep.subr.bf16.mxu1 %v722_v31 }
  0x4a   : > { %523 = vmatpush1.bf16.msra.mxu0 %v719_v33  ;;  %564 = vmatpush1.bf16.msra.mxu1 %v721_v34 }
  0x4d   : > { %749 = vmatmul.mubr.msk.bf16.vlgmr.msra.gmra.mxu0 %vm422_vm0, %v229_v11  ;;  %750 = vmatmul.mubr.msk.bf16.vlgmr.msra.gmra.mxu1 %vm422_vm0, %v229_v11 }
  0xfd   : > { %v460_v32 = vpop.f32.mrf.mxu0  ;;  %v501_v36 = vpop.f32.mrf.mxu1 }
  0xfe   : > { %v590_v35 = vmul.f32 0.2, %v460_v32  ;;  %v592_v37 = vmul.f32 0.2, %v501_v36 }
  0xff   : > { %v462_v38 = vpop.f32.mrf.mxu0  ;;  %v503_v40 = vpop.f32.mrf.mxu1 }
 0x100   : > { %v591_v39 = vmul.f32 0.2, %v462_v38  ;;  %v593_v41 = vmul.f32 0.2, %v503_v40  ;;  %v598_v43 = vmax.f32 %v460_v32, %v590_v35  ;;  %v600_v46 = vmax.f32 %v501_v36, %v592_v37 }
 0x101   : > { %v464_v42 = vpop.f32.mrf.mxu0  ;;  %v505_v45 = vpop.f32.mrf.mxu1 }
 0x102   : > { %v599_v44 = vmax.f32 %v462_v38, %v591_v39  ;;  %v601_v47 = vmax.f32 %v503_v40, %v593_v41 }
 0x103   : > { %v465_v48 = vpop.f32.mrf.mxu0  ;;  %v506_v50 = vpop.f32.mrf.mxu1 }
 0x104   : > { %v758_v49 = vpack.c.bf16 %v599_v44, %v598_v43  ;;  %v759_v51 = vpack.c.bf16 %v601_v47, %v600_v46 }
 0x106   : > { %638 = vst [vmem:[%s226_s5] sm:$0xff] %v758_v49  ;;  %639 = vst [vmem:[%s226_s5 + $0x8] sm:$0xff] %v759_v51 }
 0x10d   : > { %v542_v52 = vpop.f32.mrf.mxu0  ;;  %v583_v54 = vpop.f32.mrf.mxu1 }
 0x10e   : > { %v594_v53 = vmul.f32 0.2, %v542_v52  ;;  %v596_v55 = vmul.f32 0.2, %v583_v54 }
 0x10f   : > { %v544_v56 = vpop.f32.mrf.mxu0  ;;  %v585_v58 = vpop.f32.mrf.mxu1 }
 0x110   : > { %v595_v57 = vmul.f32 0.2, %v544_v56  ;;  %v597_v59 = vmul.f32 0.2, %v585_v58  ;;  %v602_v61 = vmax.f32 %v542_v52, %v594_v53  ;;  %v604_v0 = vmax.f32 %v583_v54, %v596_v55 }
 0x111   : > { %v546_v60 = vpop.f32.mrf.mxu0  ;;  %v587_v63 = vpop.f32.mrf.mxu1 }
 0x112   : > { %v603_v62 = vmax.f32 %v544_v56, %v595_v57  ;;  %v605_v1 = vmax.f32 %v585_v58, %v597_v59 }
 0x113   : > { %v547_v2 = vpop.f32.mrf.mxu0  ;;  %v588_v4 = vpop.f32.mrf.mxu1 }
 0x114   : > { %v760_v3 = vpack.c.bf16 %v603_v62, %v602_v61  ;;  %v761_v5 = vpack.c.bf16 %v605_v1, %v604_v0 }
 0x116   : > { %640 = vst [vmem:[%s226_s5 + $0x10] sm:$0xff] %v760_v3  ;;  %641 = vst [vmem:[%s226_s5 + $0x18] sm:$0xff] %v761_v5 }
 0x117 PF: > { %p9_p9 = scmp.ge.s32.totalorder %s844_s13, 18   ;;  %s995_s9 = smov %s805_s10 }
 0x118   : > { %s996_s10 = smov %s853_s16  ;;  %s997_s11 = smov %s844_s13 }
 0x119   :  { %11 = sbr.rel (!%p9_p9) target bundleno = 2 (0x2), region = 86 }

// kernel: discriminator_forward.7
= control target key start
LH: loop header
LB: loop body
LE: loop exit
PB: predicated region body
PF: predicated region fallthrough
CT: control target
= control target key end

     0   :  { %s571_s12 = smov 0   ;;  %s573_s13 = smov 0   ;;  %s669_s0 = inlined_call_operand.vmem [shape: bf16[16,4096], index: 0, kind: input, shape index: {}]   ;;  %s670_s1 = inlined_call_operand.vmem [shape: f32[16,1], index: 1, kind: input, shape index: {}]   ;;  %s671_s2 = inlined_call_operand.vmem [shape: f32[16,1], index: 2, kind: input, shape index: {}]   ;;  %s672_s3 = inlined_call_operand.vmem [shape: bf16[16,4096], index: 3, kind: output, shape index: {}]  }
   0x1   :  { %s575_s14 = smov 0  }
   0x2 LB: > { %s466_s15 = sadd.s32 4294967295, %s548_s14   ;;  %s588_s16 = sadd.s32 1, %s548_s14   ;;  %s548_s14 = sphi %s575_s14, %s676_s14   ;;  %s544_s13 = sphi %s573_s13, %s675_s13   ;;  %s540_s12 = sphi %s571_s12, %s674_s12  }
   0x3   : > { %s17_s17 = ssub.s32 %s548_s14, %s588_s16  ;;  %s20_s18 = sadd.s32 1, %s544_s13 }
   0x4   : > { %p18_p0 = scmp.eq.s32.totalorder %s17_s17, 0  ;;  %p27_p1 = scmp.ne.s32.totalorder %s544_s13, %s540_s12 }
   0x5   : > { %p28_p2 = scmp.eq.s32.totalorder %s548_s14, 0  ;;  %p99_p3 = scmp.eq.s32.totalorder %s466_s15, 3 }
   0x6   : > { %s599_s19 = scalar_select %p18_p0, %s544_s13, %s20_s18  }
   0x7   : > { %p29_p4 = por %p28_p2, %p27_p1  ;;  %p601_p5 = por %p99_p3, %p27_p1 }
   0x8   : > { %p469_p6 = scmp.ge.s32.totalorder %s548_s14, 4 }
   0xa   : > { %127 = sbr.rel (%p469_p6) target bundleno = 23 (0x17), region = 24 }
   0xf   : > { %130 = sbr.rel (!%p29_p4) target bundleno = 23 (0x17), region = 28  ;;  %s132_s21 = sand.u32 (%p29_p4), 1, %s544_s13  }
  0x10   : > { %s489_s22 = sshll.u32 (%p29_p4), %s548_s14, 5  ;;  %s470_s23 = sshll.u32 (%p29_p4), %s132_s21, 6 }
  0x11   : > { %s137_s26 = scalar_lea.vmem (%p29_p4), %s669_s0, %s489_s22  ;;  %s134_s27 = scalar_lea.vmem (%p29_p4), [#allocation2], %s470_s23 }
  0x12   : > { %v150_v0 = vld [vmem:[%s137_s26] sm:$0xff] (%p29_p4)  ;;  %v152_v1 = vld [vmem:[%s137_s26 + $0x8] sm:$0xff] (%p29_p4)  ;;  %v154_v2 = vld [vmem:[%s137_s26 + $0x10] sm:$0xff] (%p29_p4) }
  0x13   : > { %151 = vst [vmem:[%s134_s27] sm:$0xff] (%p29_p4), %v150_v0  ;;  %153 = vst [vmem:[%s134_s27 + $0x8] sm:$0xff] (%p29_p4), %v152_v1  ;;  %v156_v3 = vld [vmem:[%s137_s26 + $0x18] sm:$0xff] (%p29_p4)  ;;  %v158_v4 = vld [vmem:[%s137_s26 + $0x80] sm:$0xff] (%p29_p4) }
  0x14   : > { %155 = vst [vmem:[%s134_s27 + $0x10] sm:$0xff] %v154_v2  ;;  %v160_v5 = vld [vmem:[%s137_s26 + $0x88] sm:$0xff]  ;;  %157 = vst [vmem:[%s134_s27 + $0x18] sm:$0xff] %v156_v3  ;;  %v162_v6 = vld [vmem:[%s137_s26 + $0x90] sm:$0xff] }
  0x15   : > { %159 = vst [vmem:[%s134_s27 + $0x20] sm:$0xff] %v158_v4  ;;  %161 = vst [vmem:[%s134_s27 + $0x28] sm:$0xff] %v160_v5  ;;  %v164_v7 = vld [vmem:[%s137_s26 + $0x98] sm:$0xff] }
  0x16   : > { %163 = vst [vmem:[%s134_s27 + $0x30] sm:$0xff] %v162_v6  ;;  %165 = vst [vmem:[%s134_s27 + $0x38] sm:$0xff] %v164_v7 }
  0x17 PF: > { %p473_p7 = scmp.ge.s32.totalorder %s548_s14, 1  ;;  %p170_p8 = scmp.lt.s32.totalorder %s548_s14, 5 }
  0x19   : > { %p171_p9 = pnand %p473_p7, %p170_p8 }
  0x1a   : > { %s177_s9 = sand.u32 (!%p171_p9), 1, %s540_s12  }
  0x1b   : > { %174 = sbr.rel (%p171_p9) target bundleno = 188 (0xbc), region = 51  ;;  %s626_s10 = sshll.u32 (!%p171_p9), %s177_s9, 6 }
  0x1c   : > { %s179_s11 = scalar_lea.vmem (!%p171_p9), [#allocation2], %s626_s10  ;;  %s634_s12 = scalar_lea.vmem (!%p171_p9), [#allocation3], %s626_s10 }
  0x20   : > { %v253_v8 = vld [vmem:[%s671_s2] sm:$0xff]  ;;  %v550_v10 = vmov 0   ;;  %v254_v11 = vld [vmem:[%s671_s2 + $0x8] sm:$0xff]  ;;  %v203_v15 = vld [vmem:[%s179_s11 + $0x10] sm:$0xff]  ;;  %s498_s17 = sshll.u32 (%p601_p5), %s466_s15, 5 }
  0x21   : > { %v225_v9 = vld [vmem:[%s670_s1] sm:$0xff]  ;;  %525 = vset.pattern.permute.xlu1 %v550_v10  ;;  %524 = vset.pattern.permute.xlu0 %v550_v10  ;;  %v226_v12 = vld [vmem:[%s670_s1 + $0x8] sm:$0xff]  ;;  %v204_v16 = vld [vmem:[%s179_s11 + $0x18] sm:$0xff]  ;;  %v213_v25 = vunpack.c.l.bf16 %v203_v15  ;;  %v214_v26 = vunpack.c.h.bf16 %v203_v15  ;;  %s378_s22 = scalar_lea.vmem (%p601_p5), %s672_s3, %s498_s17 }
  0x22   : > { %257 = vperm.xlu1 %525, %v253_v8   ;;  %229 = vperm.xlu0 %524, %v225_v9   ;;  %v201_v13 = vld [vmem:[%s179_s11] sm:$0xff]  ;;  %v202_v14 = vld [vmem:[%s179_s11 + $0x8] sm:$0xff]  ;;  %v207_v23 = vld [vmem:[%s179_s11 + $0x30] sm:$0xff]  ;;  %v215_v27 = vunpack.c.l.bf16 %v204_v16  ;;  %v216_v28 = vunpack.c.h.bf16 %v204_v16 }
  0x23   : > { %v205_v17 = vld [vmem:[%s179_s11 + $0x20] sm:$0xff]  ;;  %v206_v18 = vld [vmem:[%s179_s11 + $0x28] sm:$0xff]  ;;  %v209_v19 = vunpack.c.l.bf16 %v201_v13  ;;  %v210_v20 = vunpack.c.h.bf16 %v201_v13  ;;  %v211_v21 = vunpack.c.l.bf16 %v202_v14  ;;  %v212_v22 = vunpack.c.h.bf16 %v202_v14  ;;  %v629_v24 = vld [vmem:[%s179_s11 + $0x38] sm:$0xff] }
  0x24   : > { %v217_v29 = vunpack.c.l.bf16 %v205_v17  ;;  %v218_v30 = vunpack.c.h.bf16 %v205_v17  ;;  %v219_v31 = vunpack.c.l.bf16 %v206_v18  ;;  %v220_v32 = vunpack.c.h.bf16 %v206_v18 }
  0x25   : > { %v221_v34 = vunpack.c.l.bf16 %v207_v23  ;;  %v222_v35 = vunpack.c.h.bf16 %v207_v23  ;;  %v223_v36 = vunpack.c.l.bf16 %v629_v24  ;;  %v224_v37 = vunpack.c.h.bf16 %v629_v24 }
  0x26   : > { %262 = vperm.xlu1 %525, %v254_v11   ;;  %234 = vperm.xlu0 %524, %v226_v12  }
  0x9d   : > { %v230_v33 = vpop.permute.xlu0 %229  ;;  %v258_v42 = vpop.permute.xlu1 %257 }
  0x9e   : > { %v237_v38 = vmul.f32 %v230_v33, %v209_v19  ;;  %v238_v39 = vmul.f32 %v230_v33, %v210_v20  ;;  %v239_v40 = vmul.f32 %v230_v33, %v211_v21  ;;  %v240_v41 = vmul.f32 %v230_v33, %v212_v22 }
  0x9f   : > { %v241_v43 = vmul.f32 %v230_v33, %v213_v25  ;;  %v242_v44 = vmul.f32 %v230_v33, %v214_v26  ;;  %v243_v45 = vmul.f32 %v230_v33, %v215_v27  ;;  %v244_v46 = vmul.f32 %v230_v33, %v216_v28 }
  0xa0   : > { %v265_v47 = vadd.f32 %v258_v42, %v237_v38  ;;  %v266_v48 = vadd.f32 %v258_v42, %v238_v39  ;;  %v267_v49 = vadd.f32 %v258_v42, %v239_v40  ;;  %v268_v50 = vadd.f32 %v258_v42, %v240_v41 }
  0xa1   : > { %v269_v51 = vadd.f32 %v258_v42, %v241_v43  ;;  %v270_v52 = vadd.f32 %v258_v42, %v242_v44  ;;  %v271_v53 = vadd.f32 %v258_v42, %v243_v45  ;;  %v272_v54 = vadd.f32 %v258_v42, %v244_v46  ;;  %v235_v55 = vpop.permute.xlu0 %234  ;;  %v263_v17 = vpop.permute.xlu1 %262 }
  0xa2   : > { %v281_v56 = vmul.f32 0.2, %v265_v47  ;;  %v282_v57 = vmul.f32 0.2, %v266_v48  ;;  %v283_v58 = vmul.f32 0.2, %v267_v49  ;;  %v245_v59 = vmul.f32 %v235_v55, %v217_v29 }
  0xa3   : > { %v284_v60 = vmul.f32 0.2, %v268_v50  ;;  %v285_v61 = vmul.f32 0.2, %v269_v51  ;;  %v286_v62 = vmul.f32 0.2, %v270_v52  ;;  %v246_v63 = vmul.f32 %v235_v55, %v218_v30 }
  0xa4   : > { %v287_v0 = vmul.f32 0.2, %v271_v53  ;;  %v288_v1 = vmul.f32 0.2, %v272_v54  ;;  %v297_v2 = vmax.f32 %v265_v47, %v281_v56  ;;  %v298_v3 = vmax.f32 %v266_v48, %v282_v57 }
  0xa5   : > { %v299_v4 = vmax.f32 %v267_v49, %v283_v58  ;;  %v300_v5 = vmax.f32 %v268_v50, %v284_v60  ;;  %v301_v6 = vmax.f32 %v269_v51, %v285_v61  ;;  %v302_v7 = vmax.f32 %v270_v52, %v286_v62 }
  0xa6   : > { %v303_v8 = vmax.f32 %v271_v53, %v287_v0  ;;  %v304_v9 = vmax.f32 %v272_v54, %v288_v1  ;;  %v490_v10 = vpack.c.bf16 %v298_v3, %v297_v2  ;;  %v247_v11 = vmul.f32 %v235_v55, %v219_v31 }
  0xa7   : > { %v491_v12 = vpack.c.bf16 %v300_v5, %v299_v4  ;;  %v492_v13 = vpack.c.bf16 %v302_v7, %v301_v6  ;;  %v248_v14 = vmul.f32 %v235_v55, %v220_v32  ;;  %v249_v15 = vmul.f32 %v235_v55, %v221_v34 }
  0xa8   : > { %v493_v16 = vpack.c.bf16 %v304_v9, %v303_v8  ;;  %361 = vst [vmem:[%s634_s12] sm:$0xff] %v490_v10  ;;  %v250_v18 = vmul.f32 %v235_v55, %v222_v35  ;;  %v251_v19 = vmul.f32 %v235_v55, %v223_v36  ;;  %v252_v20 = vmul.f32 %v235_v55, %v224_v37 }
  0xa9   : > { %362 = vst [vmem:[%s634_s12 + $0x8] sm:$0xff] %v491_v12  ;;  %363 = vst [vmem:[%s634_s12 + $0x10] sm:$0xff] %v492_v13  ;;  %v273_v21 = vadd.f32 %v263_v17, %v245_v59  ;;  %v274_v22 = vadd.f32 %v263_v17, %v246_v63  ;;  %v275_v23 = vadd.f32 %v263_v17, %v247_v11 }
  0xaa   : > { %v276_v24 = vadd.f32 %v263_v17, %v248_v14  ;;  %364 = vst [vmem:[%s634_s12 + $0x18] sm:$0xff] %v493_v16  ;;  %v277_v25 = vadd.f32 %v263_v17, %v249_v15  ;;  %v278_v26 = vadd.f32 %v263_v17, %v250_v18  ;;  %v279_v27 = vadd.f32 %v263_v17, %v251_v19 }
  0xab   : > { %v280_v28 = vadd.f32 %v263_v17, %v252_v20  ;;  %v289_v29 = vmul.f32 0.2, %v273_v21  ;;  %v290_v30 = vmul.f32 0.2, %v274_v22  ;;  %v291_v31 = vmul.f32 0.2, %v275_v23 }
  0xac   : > { %v292_v32 = vmul.f32 0.2, %v276_v24  ;;  %v293_v33 = vmul.f32 0.2, %v277_v25  ;;  %v294_v34 = vmul.f32 0.2, %v278_v26 }
  0xad   : > { %v295_v35 = vmul.f32 0.2, %v279_v27  ;;  %v296_v36 = vmul.f32 0.2, %v280_v28  ;;  %v305_v37 = vmax.f32 %v273_v21, %v289_v29  ;;  %v306_v38 = vmax.f32 %v274_v22, %v290_v30 }
  0xae   : > { %v307_v39 = vmax.f32 %v275_v23, %v291_v31  ;;  %v308_v40 = vmax.f32 %v276_v24, %v292_v32  ;;  %v309_v41 = vmax.f32 %v277_v25, %v293_v33  ;;  %v310_v42 = vmax.f32 %v278_v26, %v294_v34 }
  0xaf   : > { %v311_v43 = vmax.f32 %v279_v27, %v295_v35  ;;  %v312_v44 = vmax.f32 %v280_v28, %v296_v36  ;;  %v494_v45 = vpack.c.bf16 %v306_v38, %v305_v37  ;;  %375 = sbr.rel (!%p601_p5) target bundleno = 188 (0xbc), region = 59  ;;  %v391_v49 = vld [vmem:[%s634_s12] sm:$0xff] (%p601_p5) }
  0xb0   : > { %v495_v46 = vpack.c.bf16 %v308_v40, %v307_v39  ;;  %v496_v47 = vpack.c.bf16 %v310_v42, %v309_v41  ;;  %v393_v50 = vld [vmem:[%s634_s12 + $0x8] sm:$0xff] (%p601_p5)  ;;  %v395_v51 = vld [vmem:[%s634_s12 + $0x10] sm:$0xff] (%p601_p5)  ;;  %392 = vst [vmem:[%s378_s22] sm:$0xff] (%p601_p5), %v391_v49 }
  0xb1   : > { %v497_v48 = vpack.c.bf16 %v312_v44, %v311_v43  ;;  %365 = vst [vmem:[%s634_s12 + $0x20] sm:$0xff] %v494_v45  ;;  %v397_v52 = vld [vmem:[%s634_s12 + $0x18] sm:$0xff] (%p601_p5)  ;;  %394 = vst [vmem:[%s378_s22 + $0x8] sm:$0xff] (%p601_p5), %v393_v50 }
  0xb2   : > { %366 = vst [vmem:[%s634_s12 + $0x28] sm:$0xff] %v495_v46  ;;  %367 = vst [vmem:[%s634_s12 + $0x30] sm:$0xff] %v496_v47 }
  0xb3   : > { %368 = vst [vmem:[%s634_s12 + $0x38] sm:$0xff] %v497_v48  ;;  %396 = vst [vmem:[%s378_s22 + $0x10] sm:$0xff] (%p601_p5), %v395_v51 }
  0xb4   : > { %398 = vst [vmem:[%s378_s22 + $0x18] sm:$0xff] %v397_v52 }
  0xb8   : > { %v399_v53 = vld [vmem:[%s634_s12 + $0x20] sm:$0xff] }
  0xb9   : > { %v401_v54 = vld [vmem:[%s634_s12 + $0x28] sm:$0xff]  ;;  %400 = vst [vmem:[%s378_s22 + $0x80] sm:$0xff] %v399_v53  ;;  %v403_v55 = vld [vmem:[%s634_s12 + $0x30] sm:$0xff] }
  0xba   : > { %402 = vst [vmem:[%s378_s22 + $0x88] sm:$0xff] %v401_v54  ;;  %v405_v56 = vld [vmem:[%s634_s12 + $0x38] sm:$0xff]  ;;  %404 = vst [vmem:[%s378_s22 + $0x90] sm:$0xff] %v403_v55 }
  0xbb   : > { %406 = vst [vmem:[%s378_s22 + $0x98] sm:$0xff] %v405_v56 }
  0xbc PF: > { %p10_p10 = scmp.ge.s32.totalorder %s588_s16, 6   ;;  %s674_s12 = smov %s544_s13 }
  0xbd   : > { %s675_s13 = smov %s599_s19  ;;  %s676_s14 = smov %s588_s16 }
  0xbe   :  { %12 = sbr.rel (!%p10_p10) target bundleno = 2 (0x2), region = 113 }

// kernel: discriminator_forward.6
= control target key start
LH: loop header
LB: loop body
LE: loop exit
PB: predicated region body
PF: predicated region fallthrough
CT: control target
= control target key end

     0   :  { %s1307_s12 = smov 0   ;;  %s1309_s13 = smov 0   ;;  %s1605_s0 = inlined_call_operand.vmem [shape: bf16[128,4096], index: 0, kind: input, shape index: {}]   ;;  %s1606_s1 = inlined_call_operand.vmem [shape: bf16[16,128], index: 1, kind: input, shape index: {}]   ;;  %s1607_s2 = inlined_call_operand.vmem [shape: bf16[16,4096], index: 2, kind: output, shape index: {0}]   ;;  %s1608_s3 = inlined_call_operand.vmem [shape: f32[4,16,2], index: 3, kind: output, shape index: {1}]  }
   0x1   :  { %s1311_s14 = smov 0  }
   0x2 LB: > { %s1323_s15 = sadd.s32 4294967295, %s1284_s14   ;;  %s1326_s16 = sadd.s32 1, %s1284_s14   ;;  %s1284_s14 = sphi %s1311_s14, %s1612_s14   ;;  %s1280_s13 = sphi %s1309_s13, %s1611_s13   ;;  %s1276_s12 = sphi %s1307_s12, %s1610_s12  }
   0x3   : > { %s18_s17 = ssub.s32 %s1284_s14, %s1326_s16  ;;  %s21_s18 = sadd.s32 1, %s1280_s13 }
   0x4   : > { %p19_p0 = scmp.eq.s32.totalorder %s18_s17, 0  ;;  %p28_p1 = scmp.ne.s32.totalorder %s1280_s13, %s1276_s12 }
   0x5   : > { %p29_p2 = scmp.eq.s32.totalorder %s1284_s14, 0  ;;  %p79_p3 = scmp.eq.s32.totalorder %s1323_s15, 3 }
   0x6   : > { %s1336_s19 = scalar_select %p19_p0, %s1280_s13, %s21_s18  }
   0x7   : > { %p30_p4 = por %p29_p2, %p28_p1  ;;  %p1338_p5 = por %p79_p3, %p28_p1 }
   0x8   : > { %p1138_p6 = scmp.ge.s32.totalorder %s1284_s14, 4 }
   0xa   : > { %130 = sbr.rel (%p1138_p6) target bundleno = 51 (0x33), region = 20 }
   0xf   : > { %133 = sbr.rel (!%p30_p4) target bundleno = 51 (0x33), region = 24  ;;  %s135_s21 = sand.u32 (%p30_p4), 1, %s1280_s13  }
  0x10   : > { %s1225_s22 = sshll.u32 (%p30_p4), %s1284_s14, 5  ;;  %s1139_s23 = sshll.u32 (%p30_p4), %s135_s21, 9 }
  0x11   : > { %s1348_s26 = scalar_lea.vmem (%p30_p4), %s1605_s0, %s1225_s22  ;;  %s1353_s27 = scalar_lea.vmem (%p30_p4), [#allocation2], %s1139_s23 }
  0x12   : > { %v153_v0 = vld [vmem:[%s1348_s26] sm:$0xff] (%p30_p4)  ;;  %v155_v1 = vld [vmem:[%s1348_s26 + $0x8] sm:$0xff] (%p30_p4)  ;;  %v157_v2 = vld [vmem:[%s1348_s26 + $0x10] sm:$0xff] (%p30_p4) }
  0x13   : > { %154 = vst [vmem:[%s1353_s27] sm:$0xff] (%p30_p4), %v153_v0  ;;  %156 = vst [vmem:[%s1353_s27 + $0x8] sm:$0xff] (%p30_p4), %v155_v1  ;;  %v159_v3 = vld [vmem:[%s1348_s26 + $0x18] sm:$0xff] (%p30_p4)  ;;  %v161_v4 = vld [vmem:[%s1348_s26 + $0x80] sm:$0xff] (%p30_p4) }
  0x14   : > { %158 = vst [vmem:[%s1353_s27 + $0x10] sm:$0xff] %v157_v2  ;;  %v163_v5 = vld [vmem:[%s1348_s26 + $0x88] sm:$0xff]  ;;  %160 = vst [vmem:[%s1353_s27 + $0x18] sm:$0xff] %v159_v3  ;;  %v165_v6 = vld [vmem:[%s1348_s26 + $0x90] sm:$0xff] }
  0x15   : > { %162 = vst [vmem:[%s1353_s27 + $0x20] sm:$0xff] %v161_v4  ;;  %164 = vst [vmem:[%s1353_s27 + $0x28] sm:$0xff] %v163_v5  ;;  %v167_v7 = vld [vmem:[%s1348_s26 + $0x98] sm:$0xff]  ;;  %v169_v8 = vld [vmem:[%s1348_s26 + $0x100] sm:$0xff] }
  0x16   : > { %166 = vst [vmem:[%s1353_s27 + $0x30] sm:$0xff] %v165_v6  ;;  %168 = vst [vmem:[%s1353_s27 + $0x38] sm:$0xff] %v167_v7  ;;  %v171_v9 = vld [vmem:[%s1348_s26 + $0x108] sm:$0xff]  ;;  %v173_v10 = vld [vmem:[%s1348_s26 + $0x110] sm:$0xff] }
  0x17   : > { %170 = vst [vmem:[%s1353_s27 + $0x40] sm:$0xff] %v169_v8  ;;  %v175_v11 = vld [vmem:[%s1348_s26 + $0x118] sm:$0xff]  ;;  %172 = vst [vmem:[%s1353_s27 + $0x48] sm:$0xff] %v171_v9  ;;  %v177_v12 = vld [vmem:[%s1348_s26 + $0x180] sm:$0xff] }
  0x18   : > { %174 = vst [vmem:[%s1353_s27 + $0x50] sm:$0xff] %v173_v10  ;;  %176 = vst [vmem:[%s1353_s27 + $0x58] sm:$0xff] %v175_v11  ;;  %v179_v13 = vld [vmem:[%s1348_s26 + $0x188] sm:$0xff]  ;;  %v181_v14 = vld [vmem:[%s1348_s26 + $0x190] sm:$0xff] }
  0x19   : > { %178 = vst [vmem:[%s1353_s27 + $0x60] sm:$0xff] %v177_v12  ;;  %180 = vst [vmem:[%s1353_s27 + $0x68] sm:$0xff] %v179_v13  ;;  %v183_v15 = vld [vmem:[%s1348_s26 + $0x198] sm:$0xff]  ;;  %v185_v16 = vld [vmem:[%s1348_s26 + $0x200] sm:$0xff] }
  0x1a   : > { %182 = vst [vmem:[%s1353_s27 + $0x70] sm:$0xff] %v181_v14  ;;  %v187_v17 = vld [vmem:[%s1348_s26 + $0x208] sm:$0xff]  ;;  %184 = vst [vmem:[%s1353_s27 + $0x78] sm:$0xff] %v183_v15  ;;  %v189_v18 = vld [vmem:[%s1348_s26 + $0x210] sm:$0xff] }
  0x1b   : > { %186 = vst [vmem:[%s1353_s27 + $0x80] sm:$0xff] %v185_v16  ;;  %188 = vst [vmem:[%s1353_s27 + $0x88] sm:$0xff] %v187_v17  ;;  %v191_v19 = vld [vmem:[%s1348_s26 + $0x218] sm:$0xff]  ;;  %v193_v20 = vld [vmem:[%s1348_s26 + $0x280] sm:$0xff] }
  0x1c   : > { %190 = vst [vmem:[%s1353_s27 + $0x90] sm:$0xff] %v189_v18  ;;  %192 = vst [vmem:[%s1353_s27 + $0x98] sm:$0xff] %v191_v19  ;;  %v195_v21 = vld [vmem:[%s1348_s26 + $0x288] sm:$0xff]  ;;  %v197_v22 = vld [vmem:[%s1348_s26 + $0x290] sm:$0xff] }
  0x1d   : > { %194 = vst [vmem:[%s1353_s27 + $0xa0] sm:$0xff] %v193_v20  ;;  %v199_v23 = vld [vmem:[%s1348_s26 + $0x298] sm:$0xff]  ;;  %196 = vst [vmem:[%s1353_s27 + $0xa8] sm:$0xff] %v195_v21  ;;  %v201_v24 = vld [vmem:[%s1348_s26 + $0x300] sm:$0xff] }
  0x1e   : > { %198 = vst [vmem:[%s1353_s27 + $0xb0] sm:$0xff] %v197_v22  ;;  %200 = vst [vmem:[%s1353_s27 + $0xb8] sm:$0xff] %v199_v23  ;;  %v203_v25 = vld [vmem:[%s1348_s26 + $0x308] sm:$0xff]  ;;  %v205_v26 = vld [vmem:[%s1348_s26 + $0x310] sm:$0xff] }
  0x1f   : > { %202 = vst [vmem:[%s1353_s27 + $0xc0] sm:$0xff] %v201_v24  ;;  %204 = vst [vmem:[%s1353_s27 + $0xc8] sm:$0xff] %v203_v25  ;;  %v207_v27 = vld [vmem:[%s1348_s26 + $0x318] sm:$0xff]  ;;  %v209_v28 = vld [vmem:[%s1348_s26 + $0x380] sm:$0xff] }
  0x20   : > { %206 = vst [vmem:[%s1353_s27 + $0xd0] sm:$0xff] %v205_v26  ;;  %v211_v29 = vld [vmem:[%s1348_s26 + $0x388] sm:$0xff]  ;;  %208 = vst [vmem:[%s1353_s27 + $0xd8] sm:$0xff] %v207_v27  ;;  %v213_v30 = vld [vmem:[%s1348_s26 + $0x390] sm:$0xff] }
  0x21   : > { %210 = vst [vmem:[%s1353_s27 + $0xe0] sm:$0xff] %v209_v28  ;;  %212 = vst [vmem:[%s1353_s27 + $0xe8] sm:$0xff] %v211_v29  ;;  %v215_v31 = vld [vmem:[%s1348_s26 + $0x398] sm:$0xff]  ;;  %v217_v32 = vld [vmem:[%s1348_s26 + $0x400] sm:$0xff] }
  0x22   : > { %214 = vst [vmem:[%s1353_s27 + $0xf0] sm:$0xff] %v213_v30  ;;  %216 = vst [vmem:[%s1353_s27 + $0xf8] sm:$0xff] %v215_v31  ;;  %v219_v33 = vld [vmem:[%s1348_s26 + $0x408] sm:$0xff]  ;;  %v221_v34 = vld [vmem:[%s1348_s26 + $0x410] sm:$0xff] }
  0x23   : > { %218 = vst [vmem:[%s1353_s27 + $0x100] sm:$0xff] %v217_v32  ;;  %v223_v35 = vld [vmem:[%s1348_s26 + $0x418] sm:$0xff]  ;;  %220 = vst [vmem:[%s1353_s27 + $0x108] sm:$0xff] %v219_v33  ;;  %v225_v36 = vld [vmem:[%s1348_s26 + $0x480] sm:$0xff] }
  0x24   : > { %222 = vst [vmem:[%s1353_s27 + $0x110] sm:$0xff] %v221_v34  ;;  %224 = vst [vmem:[%s1353_s27 + $0x118] sm:$0xff] %v223_v35  ;;  %v227_v37 = vld [vmem:[%s1348_s26 + $0x488] sm:$0xff]  ;;  %v229_v38 = vld [vmem:[%s1348_s26 + $0x490] sm:$0xff] }
  0x25   : > { %226 = vst [vmem:[%s1353_s27 + $0x120] sm:$0xff] %v225_v36  ;;  %228 = vst [vmem:[%s1353_s27 + $0x128] sm:$0xff] %v227_v37  ;;  %v231_v39 = vld [vmem:[%s1348_s26 + $0x498] sm:$0xff]  ;;  %v233_v40 = vld [vmem:[%s1348_s26 + $0x500] sm:$0xff] }
  0x26   : > { %230 = vst [vmem:[%s1353_s27 + $0x130] sm:$0xff] %v229_v38  ;;  %v235_v41 = vld [vmem:[%s1348_s26 + $0x508] sm:$0xff]  ;;  %232 = vst [vmem:[%s1353_s27 + $0x138] sm:$0xff] %v231_v39  ;;  %v237_v42 = vld [vmem:[%s1348_s26 + $0x510] sm:$0xff] }
  0x27   : > { %234 = vst [vmem:[%s1353_s27 + $0x140] sm:$0xff] %v233_v40  ;;  %236 = vst [vmem:[%s1353_s27 + $0x148] sm:$0xff] %v235_v41  ;;  %v239_v43 = vld [vmem:[%s1348_s26 + $0x518] sm:$0xff]  ;;  %v241_v44 = vld [vmem:[%s1348_s26 + $0x580] sm:$0xff] }
  0x28   : > { %238 = vst [vmem:[%s1353_s27 + $0x150] sm:$0xff] %v237_v42  ;;  %240 = vst [vmem:[%s1353_s27 + $0x158] sm:$0xff] %v239_v43  ;;  %v243_v45 = vld [vmem:[%s1348_s26 + $0x588] sm:$0xff]  ;;  %v245_v46 = vld [vmem:[%s1348_s26 + $0x590] sm:$0xff] }
  0x29   : > { %242 = vst [vmem:[%s1353_s27 + $0x160] sm:$0xff] %v241_v44  ;;  %v247_v47 = vld [vmem:[%s1348_s26 + $0x598] sm:$0xff]  ;;  %244 = vst [vmem:[%s1353_s27 + $0x168] sm:$0xff] %v243_v45  ;;  %v249_v48 = vld [vmem:[%s1348_s26 + $0x600] sm:$0xff] }
  0x2a   : > { %246 = vst [vmem:[%s1353_s27 + $0x170] sm:$0xff] %v245_v46  ;;  %248 = vst [vmem:[%s1353_s27 + $0x178] sm:$0xff] %v247_v47  ;;  %v251_v49 = vld [vmem:[%s1348_s26 + $0x608] sm:$0xff]  ;;  %v253_v50 = vld [vmem:[%s1348_s26 + $0x610] sm:$0xff] }
  0x2b   : > { %250 = vst [vmem:[%s1353_s27 + $0x180] sm:$0xff] %v249_v48  ;;  %252 = vst [vmem:[%s1353_s27 + $0x188] sm:$0xff] %v251_v49  ;;  %v255_v51 = vld [vmem:[%s1348_s26 + $0x618] sm:$0xff]  ;;  %v257_v52 = vld [vmem:[%s1348_s26 + $0x680] sm:$0xff] }
  0x2c   : > { %254 = vst [vmem:[%s1353_s27 + $0x190] sm:$0xff] %v253_v50  ;;  %v259_v53 = vld [vmem:[%s1348_s26 + $0x688] sm:$0xff]  ;;  %256 = vst [vmem:[%s1353_s27 + $0x198] sm:$0xff] %v255_v51  ;;  %v261_v54 = vld [vmem:[%s1348_s26 + $0x690] sm:$0xff] }
  0x2d   : > { %258 = vst [vmem:[%s1353_s27 + $0x1a0] sm:$0xff] %v257_v52  ;;  %260 = vst [vmem:[%s1353_s27 + $0x1a8] sm:$0xff] %v259_v53  ;;  %v263_v55 = vld [vmem:[%s1348_s26 + $0x698] sm:$0xff]  ;;  %v265_v56 = vld [vmem:[%s1348_s26 + $0x700] sm:$0xff] }
  0x2e   : > { %262 = vst [vmem:[%s1353_s27 + $0x1b0] sm:$0xff] %v261_v54  ;;  %264 = vst [vmem:[%s1353_s27 + $0x1b8] sm:$0xff] %v263_v55  ;;  %v267_v57 = vld [vmem:[%s1348_s26 + $0x708] sm:$0xff]  ;;  %v269_v58 = vld [vmem:[%s1348_s26 + $0x710] sm:$0xff] }
  0x2f   : > { %266 = vst [vmem:[%s1353_s27 + $0x1c0] sm:$0xff] %v265_v56  ;;  %v271_v59 = vld [vmem:[%s1348_s26 + $0x718] sm:$0xff]  ;;  %268 = vst [vmem:[%s1353_s27 + $0x1c8] sm:$0xff] %v267_v57  ;;  %v273_v60 = vld [vmem:[%s1348_s26 + $0x780] sm:$0xff] }
  0x30   : > { %270 = vst [vmem:[%s1353_s27 + $0x1d0] sm:$0xff] %v269_v58  ;;  %272 = vst [vmem:[%s1353_s27 + $0x1d8] sm:$0xff] %v271_v59  ;;  %v275_v61 = vld [vmem:[%s1348_s26 + $0x788] sm:$0xff]  ;;  %v277_v62 = vld [vmem:[%s1348_s26 + $0x790] sm:$0xff] }
  0x31   : > { %274 = vst [vmem:[%s1353_s27 + $0x1e0] sm:$0xff] %v273_v60  ;;  %276 = vst [vmem:[%s1353_s27 + $0x1e8] sm:$0xff] %v275_v61  ;;  %v279_v63 = vld [vmem:[%s1348_s26 + $0x798] sm:$0xff] }
  0x32   : > { %278 = vst [vmem:[%s1353_s27 + $0x1f0] sm:$0xff] %v277_v62  ;;  %280 = vst [vmem:[%s1353_s27 + $0x1f8] sm:$0xff] %v279_v63 }
  0x33 PF: > { %p1142_p7 = scmp.ge.s32.totalorder %s1284_s14, 1  ;;  %p285_p8 = scmp.lt.s32.totalorder %s1284_s14, 5 }
  0x35   : > { %p286_p9 = pnand %p1142_p7, %p285_p8 }
  0x36   : > { %s292_s28 = sand.u32 (!%p286_p9), 1, %s1276_s12   ;;  %p321_p10 = scmp.lt.s32.totalorder (!%p286_p9), %s1323_s15, 3 }
  0x37   : > { %289 = sbr.rel (%p286_p9) target bundleno = 475 (0x1db), region = 47  ;;  %s1143_s29 = sshll.u32 (!%p286_p9), %s292_s28, 9 }
  0x38   : > { %s1487_s30 = scalar_lea.vmem (!%p286_p9), [#allocation2], %s1143_s29  ;;  %s1144_s6 = sshll.u32 (!%p286_p9), %s292_s28, 6 }
  0x39   : > { %s1566_s7 = scalar_lea.vmem (!%p286_p9), [#allocation3], %s1144_s6 }
  0x3c   : > { %v1286_v0 = vmov 0   ;;  %v385_v1 = vld [vmem:[%s1487_s30 + $0x1c0] sm:$0xff]  ;;  %v386_v3 = vld [vmem:[%s1487_s30 + $0x1c8] sm:$0xff]  ;;  %v387_v63 = vld [vmem:[%s1487_s30 + $0x1d0] sm:$0xff]  ;;  %s322_s8 = scalar_select %p321_p10, %s1323_s15, 3  ;;  %vm965_vm0 = vcmask 7168  }
  0x3d   : > { %751 = vmatprep.mubr.bf16.mxu0 %v1286_v0  ;;  %794 = vmatprep.mubr.bf16.mxu1 %v1286_v0  ;;  %v389_v2 = vld [vmem:[%s1487_s30 + $0x1e0] sm:$0xff]  ;;  %v390_v5 = vld [vmem:[%s1487_s30 + $0x1e8] sm:$0xff]  ;;  %vm1002_vm1 = vcmask 15368   ;;  %s1235_s14 = sshll.u32 (%p1338_p5), %s1323_s15, 5 }
  0x3e   : > { %v1205_v4 = vcombine.high %v385_v1, %v389_v2  ;;  %v1204_v6 = vcombine.low %v385_v1, %v389_v2  ;;  %v377_v7 = vld [vmem:[%s1487_s30 + $0x180] sm:$0xff]  ;;  %v1207_v9 = vcombine.high %v386_v3, %v390_v5  ;;  %v1206_v10 = vcombine.low %v386_v3, %v390_v5  ;;  %v378_v12 = vld [vmem:[%s1487_s30 + $0x188] sm:$0xff]  ;;  %v391_v1 = vld [vmem:[%s1487_s30 + $0x1f0] sm:$0xff]  ;;  %s1226_s9 = sshll.u32 %s322_s8, 4  ;;  %s1019_s21 = scalar_lea.vmem (%p1338_p5), %s1607_s2, %s1235_s14 }
  0x3f   : > { %v381_v8 = vld [vmem:[%s1487_s30 + $0x1a0] sm:$0xff]  ;;  %v382_v13 = vld [vmem:[%s1487_s30 + $0x1a8] sm:$0xff]  ;;  %v388_v2 = vld [vmem:[%s1487_s30 + $0x1d8] sm:$0xff]  ;;  %s325_s12 = scalar_lea.vmem %s1608_s3, %s1226_s9 }
  0x40   : > { %v1197_v11 = vcombine.high %v377_v7, %v381_v8  ;;  %v369_v14 = vld [vmem:[%s1487_s30 + $0x140] sm:$0xff]  ;;  %719 = vmatprep.subr.bf16.mxu0 %v1205_v4  ;;  %v1199_v15 = vcombine.high %v378_v12, %v382_v13  ;;  %v370_v17 = vld [vmem:[%s1487_s30 + $0x148] sm:$0xff]  ;;  %762 = vmatprep.subr.bf16.mxu1 %v1207_v9  ;;  %v1196_v19 = vcombine.low %v377_v7, %v381_v8  ;;  %v392_v3 = vld [vmem:[%s1487_s30 + $0x1f8] sm:$0xff] }
  0x41   : > { %v373_v16 = vld [vmem:[%s1487_s30 + $0x160] sm:$0xff]  ;;  %v374_v18 = vld [vmem:[%s1487_s30 + $0x168] sm:$0xff]  ;;  %720 = vmatpush1.bf16.msra.mxu0 %v1204_v6  ;;  %763 = vmatpush1.bf16.msra.mxu1 %v1206_v10  ;;  %v1198_v20 = vcombine.low %v378_v12, %v382_v13  ;;  %v1209_v6 = vcombine.high %v387_v63, %v391_v1  ;;  %v1211_v7 = vcombine.high %v388_v2, %v392_v3  ;;  %v379_v8 = vld [vmem:[%s1487_s30 + $0x190] sm:$0xff] }
  0x42   : > { %721 = vmatprep.subr.bf16.mxu0 %v1197_v11  ;;  %v1189_v21 = vcombine.high %v369_v14, %v373_v16  ;;  %764 = vmatprep.subr.bf16.mxu1 %v1199_v15  ;;  %v1191_v22 = vcombine.high %v370_v17, %v374_v18  ;;  %v361_v23 = vld [vmem:[%s1487_s30 + $0x100] sm:$0xff]  ;;  %v362_v25 = vld [vmem:[%s1487_s30 + $0x108] sm:$0xff]  ;;  %v1188_v27 = vcombine.low %v369_v14, %v373_v16  ;;  %v383_v9 = vld [vmem:[%s1487_s30 + $0x1b0] sm:$0xff] }
  0x43   : > { %v365_v24 = vld [vmem:[%s1487_s30 + $0x120] sm:$0xff]  ;;  %v366_v26 = vld [vmem:[%s1487_s30 + $0x128] sm:$0xff]  ;;  %v1190_v28 = vcombine.low %v370_v17, %v374_v18  ;;  %v380_v11 = vld [vmem:[%s1487_s30 + $0x198] sm:$0xff]  ;;  %v1208_v13 = vcombine.low %v387_v63, %v391_v1  ;;  %v1210_v14 = vcombine.low %v388_v2, %v392_v3  ;;  %v1201_v15 = vcombine.high %v379_v8, %v383_v9 }
  0x44   : > { %v1181_v29 = vcombine.high %v361_v23, %v365_v24  ;;  %v1183_v30 = vcombine.high %v362_v25, %v366_v26  ;;  %v353_v31 = vld [vmem:[%s1487_s30 + $0xc0] sm:$0xff]  ;;  %v354_v33 = vld [vmem:[%s1487_s30 + $0xc8] sm:$0xff]  ;;  %v1180_v35 = vcombine.low %v361_v23, %v365_v24  ;;  %v1182_v36 = vcombine.low %v362_v25, %v366_v26  ;;  %v384_v12 = vld [vmem:[%s1487_s30 + $0x1b8] sm:$0xff] }
  0x45   : > { %722 = vmatpush1.bf16.msra.mxu0 %v1196_v19  ;;  %765 = vmatpush1.bf16.msra.mxu1 %v1198_v20  ;;  %v357_v32 = vld [vmem:[%s1487_s30 + $0xe0] sm:$0xff]  ;;  %v358_v34 = vld [vmem:[%s1487_s30 + $0xe8] sm:$0xff]  ;;  %v1203_v16 = vcombine.high %v380_v11, %v384_v12  ;;  %v371_v17 = vld [vmem:[%s1487_s30 + $0x150] sm:$0xff] }
  0x46   : > { %723 = vmatprep.subr.bf16.mxu0 %v1189_v21  ;;  %766 = vmatprep.subr.bf16.mxu1 %v1191_v22  ;;  %v1173_v37 = vcombine.high %v353_v31, %v357_v32  ;;  %v1175_v38 = vcombine.high %v354_v33, %v358_v34  ;;  %v345_v39 = vld [vmem:[%s1487_s30 + $0x80] sm:$0xff]  ;;  %v346_v41 = vld [vmem:[%s1487_s30 + $0x88] sm:$0xff]  ;;  %v1172_v43 = vcombine.low %v353_v31, %v357_v32  ;;  %v375_v18 = vld [vmem:[%s1487_s30 + $0x170] sm:$0xff] }
  0x47   : > { %v349_v40 = vld [vmem:[%s1487_s30 + $0xa0] sm:$0xff]  ;;  %v350_v42 = vld [vmem:[%s1487_s30 + $0xa8] sm:$0xff]  ;;  %v1174_v44 = vcombine.low %v354_v33, %v358_v34  ;;  %v372_v19 = vld [vmem:[%s1487_s30 + $0x158] sm:$0xff]  ;;  %v1200_v21 = vcombine.low %v379_v8, %v383_v9  ;;  %v1202_v22 = vcombine.low %v380_v11, %v384_v12  ;;  %v1193_v23 = vcombine.high %v371_v17, %v375_v18 }
  0x48   : > { %v1165_v45 = vcombine.high %v345_v39, %v349_v40  ;;  %v1167_v46 = vcombine.high %v346_v41, %v350_v42  ;;  %v337_v47 = vld [vmem:[%s1487_s30 + $0x40] sm:$0xff]  ;;  %v338_v49 = vld [vmem:[%s1487_s30 + $0x48] sm:$0xff]  ;;  %v1164_v51 = vcombine.low %v345_v39, %v349_v40  ;;  %v1166_v52 = vcombine.low %v346_v41, %v350_v42  ;;  %v376_v20 = vld [vmem:[%s1487_s30 + $0x178] sm:$0xff] }
  0x49   : > { %724 = vmatpush1.bf16.msra.mxu0 %v1188_v27  ;;  %767 = vmatpush1.bf16.msra.mxu1 %v1190_v28  ;;  %v341_v48 = vld [vmem:[%s1487_s30 + $0x60] sm:$0xff]  ;;  %v342_v50 = vld [vmem:[%s1487_s30 + $0x68] sm:$0xff]  ;;  %v1195_v24 = vcombine.high %v372_v19, %v376_v20  ;;  %v363_v25 = vld [vmem:[%s1487_s30 + $0x110] sm:$0xff] }
  0x4a   : > { %725 = vmatprep.subr.bf16.mxu0 %v1181_v29  ;;  %768 = vmatprep.subr.bf16.mxu1 %v1183_v30  ;;  %v1157_v53 = vcombine.high %v337_v47, %v341_v48  ;;  %v1159_v54 = vcombine.high %v338_v49, %v342_v50  ;;  %v329_v55 = vld [vmem:[%s1487_s30] sm:$0xff]  ;;  %v330_v57 = vld [vmem:[%s1487_s30 + $0x8] sm:$0xff]  ;;  %v1156_v59 = vcombine.low %v337_v47, %v341_v48  ;;  %v367_v26 = vld [vmem:[%s1487_s30 + $0x130] sm:$0xff] }
  0x4b   : > { %v333_v56 = vld [vmem:[%s1487_s30 + $0x20] sm:$0xff]  ;;  %v334_v58 = vld [vmem:[%s1487_s30 + $0x28] sm:$0xff]  ;;  %v1158_v60 = vcombine.low %v338_v49, %v342_v50  ;;  %v364_v27 = vld [vmem:[%s1487_s30 + $0x118] sm:$0xff]  ;;  %v1192_v29 = vcombine.low %v371_v17, %v375_v18  ;;  %v1194_v30 = vcombine.low %v372_v19, %v376_v20  ;;  %v1185_v31 = vcombine.high %v363_v25, %v367_v26 }
  0x4c   : > { %v1149_v61 = vcombine.high %v329_v55, %v333_v56  ;;  %v1151_v62 = vcombine.high %v330_v57, %v334_v58  ;;  %v1148_v4 = vcombine.low %v329_v55, %v333_v56  ;;  %v1150_v5 = vcombine.low %v330_v57, %v334_v58  ;;  %v1530_v10 = vld [vmem:[%s1606_s1] sm:$0xff]   ;;  %v368_v28 = vld [vmem:[%s1487_s30 + $0x138] sm:$0xff]  ;;  %v355_v33 = vld [vmem:[%s1487_s30 + $0xd0] sm:$0xff] }
  0x4d   : > { %726 = vmatpush1.bf16.msra.mxu0 %v1180_v35  ;;  %769 = vmatpush1.bf16.msra.mxu1 %v1182_v36  ;;  %v1187_v32 = vcombine.high %v364_v27, %v368_v28  ;;  %v359_v34 = vld [vmem:[%s1487_s30 + $0xf0] sm:$0xff]  ;;  %v356_v35 = vld [vmem:[%s1487_s30 + $0xd8] sm:$0xff] }
  0x4e   : > { %727 = vmatprep.subr.bf16.mxu0 %v1173_v37  ;;  %770 = vmatprep.subr.bf16.mxu1 %v1175_v38  ;;  %v360_v36 = vld [vmem:[%s1487_s30 + $0xf8] sm:$0xff]  ;;  %v1184_v37 = vcombine.low %v363_v25, %v367_v26  ;;  %v1177_v38 = vcombine.high %v355_v33, %v359_v34  ;;  %v347_v40 = vld [vmem:[%s1487_s30 + $0x90] sm:$0xff] }
  0x4f   : > { %v1179_v39 = vcombine.high %v356_v35, %v360_v36  ;;  %v351_v41 = vld [vmem:[%s1487_s30 + $0xb0] sm:$0xff]  ;;  %v348_v42 = vld [vmem:[%s1487_s30 + $0x98] sm:$0xff] }
  0x50   : > { %v339_v48 = vld [vmem:[%s1487_s30 + $0x50] sm:$0xff]  ;;  %v340_v50 = vld [vmem:[%s1487_s30 + $0x58] sm:$0xff] }
  0x51   : > { %728 = vmatpush1.bf16.msra.mxu0 %v1172_v43  ;;  %771 = vmatpush1.bf16.msra.mxu1 %v1174_v44  ;;  %v352_v43 = vld [vmem:[%s1487_s30 + $0xb8] sm:$0xff]  ;;  %v1176_v44 = vcombine.low %v355_v33, %v359_v34  ;;  %v343_v49 = vld [vmem:[%s1487_s30 + $0x70] sm:$0xff] }
  0x52   : > { %729 = vmatprep.subr.bf16.mxu0 %v1165_v45  ;;  %772 = vmatprep.subr.bf16.mxu1 %v1167_v46  ;;  %v1178_v45 = vcombine.low %v356_v35, %v360_v36  ;;  %v1169_v46 = vcombine.high %v347_v40, %v351_v41  ;;  %v1171_v47 = vcombine.high %v348_v42, %v352_v43  ;;  %v331_v56 = vld [vmem:[%s1487_s30 + $0x10] sm:$0xff]  ;;  %v332_v58 = vld [vmem:[%s1487_s30 + $0x18] sm:$0xff] }
  0x53   : > { %v335_v57 = vld [vmem:[%s1487_s30 + $0x30] sm:$0xff] }
  0x54   : > { %v1152_v1 = vcombine.low %v331_v56, %v335_v57 }
  0x55   : > { %730 = vmatpush1.bf16.msra.mxu0 %v1164_v51  ;;  %773 = vmatpush1.bf16.msra.mxu1 %v1166_v52  ;;  %v344_v51 = vld [vmem:[%s1487_s30 + $0x78] sm:$0xff]  ;;  %v1168_v52 = vcombine.low %v347_v40, %v351_v41 }
  0x56   : > { %731 = vmatprep.subr.bf16.mxu0 %v1157_v53  ;;  %774 = vmatprep.subr.bf16.mxu1 %v1159_v54  ;;  %v1170_v53 = vcombine.low %v348_v42, %v352_v43  ;;  %v1161_v54 = vcombine.high %v339_v48, %v343_v49  ;;  %v1163_v55 = vcombine.high %v340_v50, %v344_v51 }
  0x59   : > { %732 = vmatpush1.bf16.msra.mxu0 %v1156_v59  ;;  %775 = vmatpush1.bf16.msra.mxu1 %v1158_v60  ;;  %v336_v59 = vld [vmem:[%s1487_s30 + $0x38] sm:$0xff]  ;;  %v1160_v60 = vcombine.low %v339_v48, %v343_v49 }
  0x5a   : > { %733 = vmatprep.subr.bf16.mxu0 %v1149_v61  ;;  %776 = vmatprep.subr.bf16.mxu1 %v1151_v62  ;;  %v1162_v61 = vcombine.low %v340_v50, %v344_v51  ;;  %v1153_v62 = vcombine.high %v331_v56, %v335_v57  ;;  %v1155_v63 = vcombine.high %v332_v58, %v336_v59 }
  0x5b   : > { %v1154_v2 = vcombine.low %v332_v58, %v336_v59 }
  0x5d   : > { %734 = vmatpush1.bf16.msra.mxu0 %v1148_v4  ;;  %777 = vmatpush1.bf16.msra.mxu1 %v1150_v5 }
  0x5e   : > { %805 = vmatprep.subr.bf16.mxu0 %v1209_v6  ;;  %848 = vmatprep.subr.bf16.mxu1 %v1211_v7 }
  0x60   : > { %752 = vmatmul.mubr.bf16.vlgmr.msra.gmra.mxu0 %v1530_v10  ;;  %795 = vmatmul.mubr.bf16.vlgmr.msra.gmra.mxu1 %v1530_v10 }
  0x61   : > { %806 = vmatpush1.bf16.msra.mxu0 %v1208_v13  ;;  %849 = vmatpush1.bf16.msra.mxu1 %v1210_v14 }
  0x62   : > { %807 = vmatprep.subr.bf16.mxu0 %v1201_v15  ;;  %850 = vmatprep.subr.bf16.mxu1 %v1203_v16 }
  0x63   : > { %837 = vmatprep.mubr.bf16.mxu0 %v1286_v0  ;;  %880 = vmatprep.mubr.bf16.mxu1 %v1286_v0  ;;  %v1186_v0 = vcombine.low %v364_v27, %v368_v28 }
  0x65   : > { %808 = vmatpush1.bf16.msra.mxu0 %v1200_v21  ;;  %851 = vmatpush1.bf16.msra.mxu1 %v1202_v22 }
  0x66   : > { %809 = vmatprep.subr.bf16.mxu0 %v1193_v23  ;;  %852 = vmatprep.subr.bf16.mxu1 %v1195_v24 }
  0x69   : > { %810 = vmatpush1.bf16.msra.mxu0 %v1192_v29  ;;  %853 = vmatpush1.bf16.msra.mxu1 %v1194_v30 }
  0x6a   : > { %811 = vmatprep.subr.bf16.mxu0 %v1185_v31  ;;  %854 = vmatprep.subr.bf16.mxu1 %v1187_v32 }
  0x6d   : > { %812 = vmatpush1.bf16.msra.mxu0 %v1184_v37  ;;  %855 = vmatpush1.bf16.msra.mxu1 %v1186_v0 }
  0x6e   : > { %813 = vmatprep.subr.bf16.mxu0 %v1177_v38  ;;  %856 = vmatprep.subr.bf16.mxu1 %v1179_v39 }
  0x71   : > { %814 = vmatpush1.bf16.msra.mxu0 %v1176_v44  ;;  %857 = vmatpush1.bf16.msra.mxu1 %v1178_v45 }
  0x72   : > { %815 = vmatprep.subr.bf16.mxu0 %v1169_v46  ;;  %858 = vmatprep.subr.bf16.mxu1 %v1171_v47 }
  0x75   : > { %816 = vmatpush1.bf16.msra.mxu0 %v1168_v52  ;;  %859 = vmatpush1.bf16.msra.mxu1 %v1170_v53 }
  0x76   : > { %817 = vmatprep.subr.bf16.mxu0 %v1161_v54  ;;  %860 = vmatprep.subr.bf16.mxu1 %v1163_v55 }
  0x79   : > { %818 = vmatpush1.bf16.msra.mxu0 %v1160_v60  ;;  %861 = vmatpush1.bf16.msra.mxu1 %v1162_v61 }
  0x7a   : > { %819 = vmatprep.subr.bf16.mxu0 %v1153_v62  ;;  %862 = vmatprep.subr.bf16.mxu1 %v1155_v63 }
  0x7d   : > { %820 = vmatpush1.bf16.msra.mxu0 %v1152_v1  ;;  %863 = vmatpush1.bf16.msra.mxu1 %v1154_v2 }
  0x80   : > { %838 = vmatmul.mubr.bf16.vlgmr.msra.gmra.mxu0 %v1530_v10  ;;  %881 = vmatmul.mubr.bf16.vlgmr.msra.gmra.mxu1 %v1530_v10 }
 0x120   : > { %v753_v3 = vpop.f32.mrf.mxu0  ;;  %v796_v4 = vpop.f32.mrf.mxu1 }
 0x121   : > { %v968_v15 = vmul.f32 %v753_v3, %v753_v3  ;;  %v970_v19 = vmul.f32 %v796_v4, %v796_v4 }
 0x122   : > { %v755_v5 = vpop.f32.mrf.mxu0  ;;  %v798_v7 = vpop.f32.mrf.mxu1 }
 0x123   : > { %v1227_v6 = vpack.c.bf16 %v755_v5, %v753_v3  ;;  %v1228_v8 = vpack.c.bf16 %v798_v7, %v796_v4  ;;  %v969_v16 = vmul.f32 %v755_v5, %v755_v5  ;;  %v947_v17 = vadd.f32 %v755_v5, %v753_v3 }
 0x124   : > { %v757_v9 = vpop.f32.mrf.mxu0  ;;  %v800_v11 = vpop.f32.mrf.mxu1  ;;  %v971_v25 = vmul.f32 %v798_v7, %v798_v7 }
 0x125   : > { %939 = vst [vmem:[%s1566_s7] sm:$0xff] %v1227_v6  ;;  %940 = vst [vmem:[%s1566_s7 + $0x8] sm:$0xff] %v1228_v8  ;;  %v984_v20 = vadd.f32 %v969_v16, %v968_v15  ;;  %v976_v21 = vmul.f32 %v757_v9, %v757_v9  ;;  %v948_v23 = vadd.f32 %v947_v17, %v796_v4 }
 0x126   : > { %v759_v12 = vpop.f32.mrf.mxu0  ;;  %v802_v13 = vpop.f32.mrf.mxu1  ;;  %v978_v27 = vmul.f32 %v800_v11, %v800_v11 }
 0x127   : > { %v1231_v10 = vpack.c.bf16 %v759_v12, %v757_v9  ;;  %v1232_v14 = vpack.c.bf16 %v802_v13, %v800_v11  ;;  %v977_v18 = vmul.f32 %v759_v12, %v759_v12  ;;  %v956_v22 = vadd.f32 %v759_v12, %v757_v9 }
 0x128   : > { %v985_v26 = vadd.f32 %v984_v20, %v970_v19  ;;  %v949_v29 = vadd.f32 %v948_v23, %v798_v7  ;;  %v979_v37 = vmul.f32 %v802_v13, %v802_v13 }
 0x129   : > { %943 = vst [vmem:[%s1566_s7 + $0x20] sm:$0xff] %v1231_v10  ;;  %944 = vst [vmem:[%s1566_s7 + $0x28] sm:$0xff] %v1232_v14  ;;  %v993_v24 = vadd.f32 %v977_v18, %v976_v21  ;;  %v957_v28 = vadd.f32 %v956_v22, %v800_v11 }
 0x12a   : > { %v986_v32 = vadd.f32 %v985_v26, %v971_v25 }
 0x12b   : > { %v994_v30 = vadd.f32 %v993_v24, %v978_v27  ;;  %v958_v36 = vadd.f32 %v957_v28, %v802_v13 }
 0x12c   : > { %v1032_v12 = vld [vmem:[%s1566_s7] sm:$0xff] (%p1338_p5)  ;;  %v1034_v10 = vld [vmem:[%s1566_s7 + $0x8] sm:$0xff] (%p1338_p5) }
 0x12d   : > { %v995_v43 = vadd.f32 %v994_v30, %v979_v37  ;;  %1033 = vst [vmem:[%s1019_s21] sm:$0xff] (%p1338_p5), %v1032_v12  ;;  %1035 = vst [vmem:[%s1019_s21 + $0x8] sm:$0xff] (%p1338_p5), %v1034_v10 }
 0x130   : > { %v1040_v15 = vld [vmem:[%s1566_s7 + $0x20] sm:$0xff] (%p1338_p5)  ;;  %v1042_v16 = vld [vmem:[%s1566_s7 + $0x28] sm:$0xff] (%p1338_p5) }
 0x131   : > { %1041 = vst [vmem:[%s1019_s21 + $0x80] sm:$0xff] (%p1338_p5), %v1040_v15  ;;  %1043 = vst [vmem:[%s1019_s21 + $0x88] sm:$0xff] (%p1338_p5), %v1042_v16 }
 0x140   : > { %v839_v31 = vpop.f32.mrf.mxu0  ;;  %v882_v35 = vpop.f32.mrf.mxu1 }
 0x141   : > { %v950_v33 = vadd.f32 %v949_v29, %v839_v31  ;;  %v972_v34 = vmul.f32 %v839_v31, %v839_v31  ;;  %v974_v44 = vmul.f32 %v882_v35, %v882_v35 }
 0x142   : > { %v841_v0 = vpop.f32.mrf.mxu0  ;;  %v884_v42 = vpop.f32.mrf.mxu1 }
 0x143   : > { %v987_v38 = vadd.f32 %v986_v32, %v972_v34  ;;  %v1229_v39 = vpack.c.bf16 %v841_v0, %v839_v31  ;;  %v951_v40 = vadd.f32 %v950_v33, %v841_v0  ;;  %v973_v41 = vmul.f32 %v841_v0, %v841_v0 }
 0x144   : > { %v1230_v45 = vpack.c.bf16 %v884_v42, %v882_v35  ;;  %v843_v46 = vpop.f32.mrf.mxu0  ;;  %v886_v49 = vpop.f32.mrf.mxu1  ;;  %v975_v60 = vmul.f32 %v884_v42, %v884_v42 }
 0x145   : > { %941 = vst [vmem:[%s1566_s7 + $0x10] sm:$0xff] %v1229_v39  ;;  %v959_v47 = vadd.f32 %v958_v36, %v843_v46  ;;  %v980_v48 = vmul.f32 %v843_v46, %v843_v46  ;;  %v952_v50 = vadd.f32 %v951_v40, %v882_v35  ;;  %v988_v51 = vadd.f32 %v987_v38, %v973_v41 }
 0x146   : > { %942 = vst [vmem:[%s1566_s7 + $0x18] sm:$0xff] %v1230_v45  ;;  %v845_v52 = vpop.f32.mrf.mxu0  ;;  %v888_v57 = vpop.f32.mrf.mxu1  ;;  %v982_v62 = vmul.f32 %v886_v49, %v886_v49 }
 0x147   : > { %v996_v53 = vadd.f32 %v995_v43, %v980_v48  ;;  %v1233_v54 = vpack.c.bf16 %v845_v52, %v843_v46  ;;  %v960_v55 = vadd.f32 %v959_v47, %v845_v52  ;;  %v981_v56 = vmul.f32 %v845_v52, %v845_v52 }
 0x148   : > { %v1234_v58 = vpack.c.bf16 %v888_v57, %v886_v49  ;;  %v953_v59 = vadd.f32 %v952_v50, %v884_v42  ;;  %v989_v61 = vadd.f32 %v988_v51, %v974_v44  ;;  %v983_v3 = vmul.f32 %v888_v57, %v888_v57 }
 0x149   : > { %945 = vst [vmem:[%s1566_s7 + $0x30] sm:$0xff] %v1233_v54  ;;  %v997_v63 = vadd.f32 %v996_v53, %v981_v56  ;;  %v961_v1 = vadd.f32 %v960_v55, %v886_v49 }
 0x14a   : > { %946 = vst [vmem:[%s1566_s7 + $0x38] sm:$0xff] %v1234_v58  ;;  %954 = vadd.xlane.f32.xlu0 %v953_v59  ;;  %v990_v2 = vadd.f32 %v989_v61, %v975_v60 }
 0x14b   : > { %v962_v4 = vadd.f32 %v961_v1, %v888_v57  ;;  %v998_v5 = vadd.f32 %v997_v63, %v982_v62 }
 0x14c   : > { %991 = vadd.xlane.f32.xlu1 %v990_v2  ;;  %v1036_v13 = vld [vmem:[%s1566_s7 + $0x10] sm:$0xff] (%p1338_p5) }
 0x14d   : > { %v999_v6 = vadd.f32 %v998_v5, %v983_v3  ;;  %v1038_v14 = vld [vmem:[%s1566_s7 + $0x18] sm:$0xff] (%p1338_p5)  ;;  %1037 = vst [vmem:[%s1019_s21 + $0x10] sm:$0xff] (%p1338_p5), %v1036_v13 }
 0x14e   : > { %963 = vadd.xlane.f32.xlu0 %v962_v4  ;;  %1039 = vst [vmem:[%s1019_s21 + $0x18] sm:$0xff] (%p1338_p5), %v1038_v14 }
 0x150   : > { %1000 = vadd.xlane.f32.xlu1 %v999_v6  ;;  %v1044_v17 = vld [vmem:[%s1566_s7 + $0x30] sm:$0xff] (%p1338_p5) }
 0x151   : > { %v1046_v18 = vld [vmem:[%s1566_s7 + $0x38] sm:$0xff] (%p1338_p5)  ;;  %1045 = vst [vmem:[%s1019_s21 + $0x90] sm:$0xff] (%p1338_p5), %v1044_v17 }
 0x152   : > { %1047 = vst [vmem:[%s1019_s21 + $0x98] sm:$0xff] (%p1338_p5), %v1046_v18 }
 0x1d3   : > { %v955_v7 = vpop.xlane.xlu0 %954 }
 0x1d4   : > { %966 = vst.msk [vmem:[%s325_s12] sm:$0xff] %vm965_vm0, %v955_v7 }
 0x1d5   : > { %v992_v8 = vpop.xlane.xlu1 %991 }
 0x1d6   : > { %1003 = vst.msk [vmem:[%s325_s12] sm:$0xff] %vm1002_vm1, %v992_v8  ;;  %1016 = sbr.rel (!%p1338_p5) target bundleno = 475 (0x1db), region = 55 }
 0x1d7   : > { %v964_v9 = vpop.xlane.xlu0 %963 }
 0x1d8   : > { %967 = vst.msk [vmem:[%s325_s12 + $0x8] sm:$0xff] %vm965_vm0, %v964_v9 }
 0x1d9   : > { %v1001_v11 = vpop.xlane.xlu1 %1000 }
 0x1da   : > { %1004 = vst.msk [vmem:[%s325_s12 + $0x8] sm:$0xff] %vm1002_vm1, %v1001_v11 }
 0x1db PF: > { %p11_p11 = scmp.ge.s32.totalorder %s1326_s16, 6   ;;  %s1610_s12 = smov %s1280_s13 }
 0x1dc   : > { %s1611_s13 = smov %s1336_s19  ;;  %s1612_s14 = smov %s1326_s16 }
 0x1dd   :  { %13 = sbr.rel (!%p11_p11) target bundleno = 2 (0x2), region = 121 }

// kernel: discriminator_forward.8
= control target key start
LH: loop header
LB: loop body
LE: loop exit
PB: predicated region body
PF: predicated region fallthrough
CT: control target
= control target key end

     0   :  { %s2348_s0 = inlined_call_operand.vmem [shape: bf16[256,1024], index: 0, kind: input, shape index: {}]   ;;  %s2349_s1 = inlined_call_operand.vmem [shape: bf16[32,256], index: 1, kind: input, shape index: {}]   ;;  %s2350_s2 = inlined_call_operand.vmem [shape: f32[32,1], index: 2, kind: input, shape index: {}]   ;;  %s2351_s3 = inlined_call_operand.vmem [shape: f32[32,1], index: 3, kind: input, shape index: {}]   ;;  %s2352_s4 = inlined_call_operand.vmem [shape: bf16[32,1024], index: 4, kind: output, shape index: {}]  }
   0x1   :  { %v77_v0 = vld [vmem:[%s2348_s0 + $0x1c0] sm:$0xff]  ;;  %v78_v2 = vld [vmem:[%s2348_s0 + $0x1c8] sm:$0xff] }
   0x2   :  { %v81_v1 = vld [vmem:[%s2348_s0 + $0x1e0] sm:$0xff]  ;;  %v82_v4 = vld [vmem:[%s2348_s0 + $0x1e8] sm:$0xff] }
   0x3   :  { %v1518_v3 = vcombine.high %v77_v0, %v81_v1  ;;  %v1517_v5 = vcombine.low %v77_v0, %v81_v1  ;;  %v69_v6 = vld [vmem:[%s2348_s0 + $0x180] sm:$0xff]  ;;  %v1520_v8 = vcombine.high %v78_v2, %v82_v4  ;;  %v1519_v9 = vcombine.low %v78_v2, %v82_v4  ;;  %v70_v11 = vld [vmem:[%s2348_s0 + $0x188] sm:$0xff] }
   0x4   :  { %v73_v7 = vld [vmem:[%s2348_s0 + $0x1a0] sm:$0xff]  ;;  %v74_v12 = vld [vmem:[%s2348_s0 + $0x1a8] sm:$0xff] }
   0x5   :  { %v1510_v10 = vcombine.high %v69_v6, %v73_v7  ;;  %v61_v13 = vld [vmem:[%s2348_s0 + $0x140] sm:$0xff]  ;;  %809 = vmatprep.subr.bf16.mxu0 %v1518_v3  ;;  %v1512_v14 = vcombine.high %v70_v11, %v74_v12  ;;  %v62_v16 = vld [vmem:[%s2348_s0 + $0x148] sm:$0xff]  ;;  %862 = vmatprep.subr.bf16.mxu1 %v1520_v8  ;;  %v1509_v18 = vcombine.low %v69_v6, %v73_v7 }
   0x6   :  { %v65_v15 = vld [vmem:[%s2348_s0 + $0x160] sm:$0xff]  ;;  %v66_v17 = vld [vmem:[%s2348_s0 + $0x168] sm:$0xff]  ;;  %810 = vmatpush1.bf16.msra.mxu0 %v1517_v5  ;;  %863 = vmatpush1.bf16.msra.mxu1 %v1519_v9  ;;  %v1511_v19 = vcombine.low %v70_v11, %v74_v12 }
   0x7   :  { %811 = vmatprep.subr.bf16.mxu0 %v1510_v10  ;;  %v1502_v20 = vcombine.high %v61_v13, %v65_v15  ;;  %864 = vmatprep.subr.bf16.mxu1 %v1512_v14  ;;  %v1504_v21 = vcombine.high %v62_v16, %v66_v17  ;;  %v53_v22 = vld [vmem:[%s2348_s0 + $0x100] sm:$0xff]  ;;  %v54_v24 = vld [vmem:[%s2348_s0 + $0x108] sm:$0xff]  ;;  %v1501_v26 = vcombine.low %v61_v13, %v65_v15 }
   0x8   :  { %v57_v23 = vld [vmem:[%s2348_s0 + $0x120] sm:$0xff]  ;;  %v58_v25 = vld [vmem:[%s2348_s0 + $0x128] sm:$0xff]  ;;  %v1503_v27 = vcombine.low %v62_v16, %v66_v17 }
   0x9   :  { %v1494_v28 = vcombine.high %v53_v22, %v57_v23  ;;  %v1496_v29 = vcombine.high %v54_v24, %v58_v25  ;;  %v45_v30 = vld [vmem:[%s2348_s0 + $0xc0] sm:$0xff]  ;;  %v46_v32 = vld [vmem:[%s2348_s0 + $0xc8] sm:$0xff]  ;;  %v1493_v34 = vcombine.low %v53_v22, %v57_v23  ;;  %v1495_v35 = vcombine.low %v54_v24, %v58_v25 }
   0xa   :  { %812 = vmatpush1.bf16.msra.mxu0 %v1509_v18  ;;  %865 = vmatpush1.bf16.msra.mxu1 %v1511_v19  ;;  %v49_v31 = vld [vmem:[%s2348_s0 + $0xe0] sm:$0xff]  ;;  %v50_v33 = vld [vmem:[%s2348_s0 + $0xe8] sm:$0xff] }
   0xb   :  { %813 = vmatprep.subr.bf16.mxu0 %v1502_v20  ;;  %866 = vmatprep.subr.bf16.mxu1 %v1504_v21  ;;  %v1486_v36 = vcombine.high %v45_v30, %v49_v31  ;;  %v1488_v37 = vcombine.high %v46_v32, %v50_v33  ;;  %v37_v38 = vld [vmem:[%s2348_s0 + $0x80] sm:$0xff]  ;;  %v38_v40 = vld [vmem:[%s2348_s0 + $0x88] sm:$0xff]  ;;  %v1485_v42 = vcombine.low %v45_v30, %v49_v31 }
   0xc   :  { %v41_v39 = vld [vmem:[%s2348_s0 + $0xa0] sm:$0xff]  ;;  %v42_v41 = vld [vmem:[%s2348_s0 + $0xa8] sm:$0xff]  ;;  %v1487_v43 = vcombine.low %v46_v32, %v50_v33 }
   0xd   :  { %v1478_v44 = vcombine.high %v37_v38, %v41_v39  ;;  %v1480_v45 = vcombine.high %v38_v40, %v42_v41  ;;  %v29_v46 = vld [vmem:[%s2348_s0 + $0x40] sm:$0xff]  ;;  %v30_v48 = vld [vmem:[%s2348_s0 + $0x48] sm:$0xff]  ;;  %v1477_v50 = vcombine.low %v37_v38, %v41_v39  ;;  %v1479_v51 = vcombine.low %v38_v40, %v42_v41 }
   0xe   :  { %814 = vmatpush1.bf16.msra.mxu0 %v1501_v26  ;;  %867 = vmatpush1.bf16.msra.mxu1 %v1503_v27  ;;  %v33_v47 = vld [vmem:[%s2348_s0 + $0x60] sm:$0xff]  ;;  %v34_v49 = vld [vmem:[%s2348_s0 + $0x68] sm:$0xff] }
   0xf   :  { %815 = vmatprep.subr.bf16.mxu0 %v1494_v28  ;;  %868 = vmatprep.subr.bf16.mxu1 %v1496_v29  ;;  %v1470_v52 = vcombine.high %v29_v46, %v33_v47  ;;  %v1472_v53 = vcombine.high %v30_v48, %v34_v49  ;;  %v21_v54 = vld [vmem:[%s2348_s0] sm:$0xff]  ;;  %v22_v57 = vld [vmem:[%s2348_s0 + $0x8] sm:$0xff]  ;;  %v1469_v59 = vcombine.low %v29_v46, %v33_v47 }
  0x10   :  { %v25_v55 = vld [vmem:[%s2348_s0 + $0x20] sm:$0xff]  ;;  %v26_v58 = vld [vmem:[%s2348_s0 + $0x28] sm:$0xff]  ;;  %v1471_v60 = vcombine.low %v30_v48, %v34_v49 }
  0x11   :  { %v1757_v56 = vld [vmem:[%s2349_s1 + $0x4] ss:$8 sps:$4 sm:$0xff]   ;;  %v1462_v61 = vcombine.high %v21_v54, %v25_v55  ;;  %v1464_v62 = vcombine.high %v22_v57, %v26_v58  ;;  %v1461_v3 = vcombine.low %v21_v54, %v25_v55  ;;  %v1463_v4 = vcombine.low %v22_v57, %v26_v58 }
  0x12   :  { %816 = vmatpush1.bf16.msra.mxu0 %v1493_v34  ;;  %869 = vmatpush1.bf16.msra.mxu1 %v1495_v35  ;;  %v141_v63 = vld [vmem:[%s2348_s0 + $0x3c0] sm:$0xff]  ;;  %v142_v1 = vld [vmem:[%s2348_s0 + $0x3c8] sm:$0xff] }
  0x13   :  { %817 = vmatprep.subr.bf16.mxu0 %v1486_v36  ;;  %870 = vmatprep.subr.bf16.mxu1 %v1488_v37  ;;  %v145_v0 = vld [vmem:[%s2348_s0 + $0x3e0] sm:$0xff]  ;;  %v146_v2 = vld [vmem:[%s2348_s0 + $0x3e8] sm:$0xff] }
  0x14   :  { %841 = vmatprep.mubr.bf16.mxu0 %v1757_v56  ;;  %894 = vmatprep.mubr.bf16.mxu1 %v1757_v56  ;;  %v1582_v5 = vcombine.high %v141_v63, %v145_v0  ;;  %v1584_v6 = vcombine.high %v142_v1, %v146_v2  ;;  %v133_v7 = vld [vmem:[%s2348_s0 + $0x380] sm:$0xff]  ;;  %v134_v9 = vld [vmem:[%s2348_s0 + $0x388] sm:$0xff]  ;;  %v1581_v11 = vcombine.low %v141_v63, %v145_v0  ;;  %v79_v0 = vld [vmem:[%s2348_s0 + $0x1d0] sm:$0xff] }
  0x15   :  { %v137_v8 = vld [vmem:[%s2348_s0 + $0x3a0] sm:$0xff]  ;;  %v138_v10 = vld [vmem:[%s2348_s0 + $0x3a8] sm:$0xff]  ;;  %v1583_v12 = vcombine.low %v142_v1, %v146_v2  ;;  %v83_v1 = vld [vmem:[%s2348_s0 + $0x1f0] sm:$0xff] }
  0x16   :  { %818 = vmatpush1.bf16.msra.mxu0 %v1485_v42  ;;  %871 = vmatpush1.bf16.msra.mxu1 %v1487_v43  ;;  %v1574_v13 = vcombine.high %v133_v7, %v137_v8  ;;  %v1576_v14 = vcombine.high %v134_v9, %v138_v10  ;;  %v125_v15 = vld [vmem:[%s2348_s0 + $0x340] sm:$0xff]  ;;  %v126_v17 = vld [vmem:[%s2348_s0 + $0x348] sm:$0xff]  ;;  %v1573_v19 = vcombine.low %v133_v7, %v137_v8  ;;  %v80_v2 = vld [vmem:[%s2348_s0 + $0x1d8] sm:$0xff] }
  0x17   :  { %819 = vmatprep.subr.bf16.mxu0 %v1478_v44  ;;  %872 = vmatprep.subr.bf16.mxu1 %v1480_v45  ;;  %v129_v16 = vld [vmem:[%s2348_s0 + $0x360] sm:$0xff]  ;;  %v130_v18 = vld [vmem:[%s2348_s0 + $0x368] sm:$0xff]  ;;  %v1575_v20 = vcombine.low %v134_v9, %v138_v10  ;;  %v71_v8 = vld [vmem:[%s2348_s0 + $0x190] sm:$0xff] }
  0x18   :  { %v1566_v21 = vcombine.high %v125_v15, %v129_v16  ;;  %v1568_v22 = vcombine.high %v126_v17, %v130_v18  ;;  %v117_v23 = vld [vmem:[%s2348_s0 + $0x300] sm:$0xff]  ;;  %v118_v25 = vld [vmem:[%s2348_s0 + $0x308] sm:$0xff]  ;;  %v1565_v27 = vcombine.low %v125_v15, %v129_v16  ;;  %v1567_v28 = vcombine.low %v126_v17, %v130_v18  ;;  %v75_v9 = vld [vmem:[%s2348_s0 + $0x1b0] sm:$0xff] }
  0x19   :  { %v121_v24 = vld [vmem:[%s2348_s0 + $0x320] sm:$0xff]  ;;  %v122_v26 = vld [vmem:[%s2348_s0 + $0x328] sm:$0xff]  ;;  %v1514_v15 = vcombine.high %v71_v8, %v75_v9  ;;  %v63_v17 = vld [vmem:[%s2348_s0 + $0x150] sm:$0xff] }
  0x1a   :  { %820 = vmatpush1.bf16.msra.mxu0 %v1477_v50  ;;  %873 = vmatpush1.bf16.msra.mxu1 %v1479_v51  ;;  %v1558_v29 = vcombine.high %v117_v23, %v121_v24  ;;  %v1560_v30 = vcombine.high %v118_v25, %v122_v26  ;;  %v109_v31 = vld [vmem:[%s2348_s0 + $0x2c0] sm:$0xff]  ;;  %v110_v33 = vld [vmem:[%s2348_s0 + $0x2c8] sm:$0xff]  ;;  %v1557_v35 = vcombine.low %v117_v23, %v121_v24  ;;  %v67_v18 = vld [vmem:[%s2348_s0 + $0x170] sm:$0xff] }
  0x1b   :  { %821 = vmatprep.subr.bf16.mxu0 %v1470_v52  ;;  %874 = vmatprep.subr.bf16.mxu1 %v1472_v53  ;;  %v113_v32 = vld [vmem:[%s2348_s0 + $0x2e0] sm:$0xff]  ;;  %v114_v34 = vld [vmem:[%s2348_s0 + $0x2e8] sm:$0xff]  ;;  %v1559_v36 = vcombine.low %v118_v25, %v122_v26  ;;  %v1506_v24 = vcombine.high %v63_v17, %v67_v18  ;;  %v55_v26 = vld [vmem:[%s2348_s0 + $0x110] sm:$0xff] }
  0x1c   :  { %v1550_v37 = vcombine.high %v109_v31, %v113_v32  ;;  %v1552_v38 = vcombine.high %v110_v33, %v114_v34  ;;  %v101_v39 = vld [vmem:[%s2348_s0 + $0x280] sm:$0xff]  ;;  %v102_v41 = vld [vmem:[%s2348_s0 + $0x288] sm:$0xff]  ;;  %v1549_v43 = vcombine.low %v109_v31, %v113_v32  ;;  %v1551_v44 = vcombine.low %v110_v33, %v114_v34 }
  0x1d   :  { %v105_v40 = vld [vmem:[%s2348_s0 + $0x2a0] sm:$0xff]  ;;  %v106_v42 = vld [vmem:[%s2348_s0 + $0x2a8] sm:$0xff]  ;;  %v1505_v31 = vcombine.low %v63_v17, %v67_v18 }
  0x1e   :  { %822 = vmatpush1.bf16.msra.mxu0 %v1469_v59  ;;  %875 = vmatpush1.bf16.msra.mxu1 %v1471_v60  ;;  %v1542_v45 = vcombine.high %v101_v39, %v105_v40  ;;  %v1544_v46 = vcombine.high %v102_v41, %v106_v42  ;;  %v93_v47 = vld [vmem:[%s2348_s0 + $0x240] sm:$0xff]  ;;  %v94_v49 = vld [vmem:[%s2348_s0 + $0x248] sm:$0xff]  ;;  %v1541_v51 = vcombine.low %v101_v39, %v105_v40 }
  0x1f   :  { %823 = vmatprep.subr.bf16.mxu0 %v1462_v61  ;;  %876 = vmatprep.subr.bf16.mxu1 %v1464_v62  ;;  %v97_v48 = vld [vmem:[%s2348_s0 + $0x260] sm:$0xff]  ;;  %v98_v50 = vld [vmem:[%s2348_s0 + $0x268] sm:$0xff]  ;;  %v1543_v52 = vcombine.low %v102_v41, %v106_v42 }
  0x20   :  { %v1534_v53 = vcombine.high %v93_v47, %v97_v48  ;;  %v1536_v54 = vcombine.high %v94_v49, %v98_v50  ;;  %v85_v55 = vld [vmem:[%s2348_s0 + $0x200] sm:$0xff]  ;;  %v86_v58 = vld [vmem:[%s2348_s0 + $0x208] sm:$0xff]  ;;  %v1533_v60 = vcombine.low %v93_v47, %v97_v48  ;;  %v1535_v61 = vcombine.low %v94_v49, %v98_v50 }
  0x21   :  { %v89_v57 = vld [vmem:[%s2348_s0 + $0x220] sm:$0xff]  ;;  %v90_v59 = vld [vmem:[%s2348_s0 + $0x228] sm:$0xff] }
  0x22   :  { %824 = vmatpush1.bf16.msra.mxu0 %v1461_v3  ;;  %877 = vmatpush1.bf16.msra.mxu1 %v1463_v4  ;;  %v1526_v62 = vcombine.high %v85_v55, %v89_v57  ;;  %v1528_v63 = vcombine.high %v86_v58, %v90_v59  ;;  %v84_v3 = vld [vmem:[%s2348_s0 + $0x1f8] sm:$0xff]  ;;  %v1525_v4 = vcombine.low %v85_v55, %v89_v57  ;;  %v1884_v10 = vld [vmem:[%s2349_s1] ss:$8 sps:$4 sm:$0xff]  }
  0x23   :  { %825 = vmatprep.subr.bf16.mxu0 %v1582_v5  ;;  %878 = vmatprep.subr.bf16.mxu1 %v1584_v6  ;;  %v1527_v5 = vcombine.low %v86_v58, %v90_v59  ;;  %v1522_v6 = vcombine.high %v79_v0, %v83_v1  ;;  %v1524_v7 = vcombine.high %v80_v2, %v84_v3  ;;  %v23_v59 = vld [vmem:[%s2348_s0 + $0x10] sm:$0xff] }
  0x26   :  { %826 = vmatpush2.bf16.msra.mxu0 %v1581_v11  ;;  %879 = vmatpush2.bf16.msra.mxu1 %v1583_v12  ;;  %v72_v11 = vld [vmem:[%s2348_s0 + $0x198] sm:$0xff] }
  0x27   :  { %827 = vmatprep.subr.bf16.mxu0 %v1574_v13  ;;  %880 = vmatprep.subr.bf16.mxu1 %v1576_v14  ;;  %v76_v12 = vld [vmem:[%s2348_s0 + $0x1b8] sm:$0xff]  ;;  %v1521_v13 = vcombine.low %v79_v0, %v83_v1  ;;  %v1523_v14 = vcombine.low %v80_v2, %v84_v3  ;;  %v143_v3 = vld [vmem:[%s2348_s0 + $0x3d0] sm:$0xff] }
  0x28   :  { %v1516_v16 = vcombine.high %v72_v11, %v76_v12  ;;  %v1515_v23 = vcombine.low %v72_v11, %v76_v12  ;;  %v135_v12 = vld [vmem:[%s2348_s0 + $0x390] sm:$0xff] }
  0x2a   :  { %828 = vmatpush2.bf16.msra.mxu0 %v1573_v19  ;;  %881 = vmatpush2.bf16.msra.mxu1 %v1575_v20  ;;  %v1901_v19 = vld [vmem:[%s2349_s1 + $0x14] ss:$8 sps:$4 sm:$0xff]  }
  0x2b   :  { %829 = vmatprep.subr.bf16.mxu0 %v1566_v21  ;;  %882 = vmatprep.subr.bf16.mxu1 %v1568_v22  ;;  %v64_v20 = vld [vmem:[%s2348_s0 + $0x158] sm:$0xff]  ;;  %v1513_v22 = vcombine.low %v71_v8, %v75_v9 }
  0x2c   :  { %v68_v21 = vld [vmem:[%s2348_s0 + $0x178] sm:$0xff] }
  0x2d   :  { %v1508_v25 = vcombine.high %v64_v20, %v68_v21  ;;  %v1507_v32 = vcombine.low %v64_v20, %v68_v21  ;;  %v127_v21 = vld [vmem:[%s2348_s0 + $0x350] sm:$0xff] }
  0x2e   :  { %830 = vmatpush2.bf16.msra.mxu0 %v1565_v27  ;;  %883 = vmatpush2.bf16.msra.mxu1 %v1567_v28  ;;  %v59_v27 = vld [vmem:[%s2348_s0 + $0x130] sm:$0xff]  ;;  %v56_v28 = vld [vmem:[%s2348_s0 + $0x118] sm:$0xff] }
  0x2f   :  { %831 = vmatprep.subr.bf16.mxu0 %v1558_v29  ;;  %884 = vmatprep.subr.bf16.mxu1 %v1560_v30  ;;  %v60_v29 = vld [vmem:[%s2348_s0 + $0x138] sm:$0xff]  ;;  %v1498_v33 = vcombine.high %v55_v26, %v59_v27  ;;  %v1497_v39 = vcombine.low %v55_v26, %v59_v27 }
  0x30   :  { %v1927_v30 = vld [vmem:[%s2349_s1 + $0x10] ss:$8 sps:$4 sm:$0xff]   ;;  %v1500_v34 = vcombine.high %v56_v28, %v60_v29  ;;  %v1499_v40 = vcombine.low %v56_v28, %v60_v29 }
  0x31   :  { %v119_v29 = vld [vmem:[%s2348_s0 + $0x310] sm:$0xff] }
  0x32   :  { %832 = vmatpush2.bf16.msra.mxu0 %v1557_v35  ;;  %885 = vmatpush2.bf16.msra.mxu1 %v1559_v36  ;;  %v47_v35 = vld [vmem:[%s2348_s0 + $0xd0] sm:$0xff] }
  0x33   :  { %833 = vmatprep.subr.bf16.mxu0 %v1550_v37  ;;  %886 = vmatprep.subr.bf16.mxu1 %v1552_v38  ;;  %v51_v36 = vld [vmem:[%s2348_s0 + $0xf0] sm:$0xff]  ;;  %v48_v37 = vld [vmem:[%s2348_s0 + $0xd8] sm:$0xff] }
  0x34   :  { %v52_v38 = vld [vmem:[%s2348_s0 + $0xf8] sm:$0xff]  ;;  %v1490_v41 = vcombine.high %v47_v35, %v51_v36  ;;  %v1489_v47 = vcombine.low %v47_v35, %v51_v36 }
  0x35   :  { %v1492_v42 = vcombine.high %v48_v37, %v52_v38  ;;  %v1491_v48 = vcombine.low %v48_v37, %v52_v38  ;;  %v111_v38 = vld [vmem:[%s2348_s0 + $0x2d0] sm:$0xff] }
  0x36   :  { %834 = vmatpush2.bf16.msra.mxu0 %v1549_v43  ;;  %887 = vmatpush2.bf16.msra.mxu1 %v1551_v44  ;;  %v39_v43 = vld [vmem:[%s2348_s0 + $0x90] sm:$0xff] }
  0x37   :  { %835 = vmatprep.subr.bf16.mxu0 %v1542_v45  ;;  %888 = vmatprep.subr.bf16.mxu1 %v1544_v46  ;;  %v43_v44 = vld [vmem:[%s2348_s0 + $0xb0] sm:$0xff]  ;;  %v40_v45 = vld [vmem:[%s2348_s0 + $0x98] sm:$0xff] }
  0x38   :  { %v44_v46 = vld [vmem:[%s2348_s0 + $0xb8] sm:$0xff]  ;;  %v1482_v49 = vcombine.high %v39_v43, %v43_v44 }
  0x39   :  { %v1484_v50 = vcombine.high %v40_v45, %v44_v46  ;;  %v1483_v55 = vcombine.low %v40_v45, %v44_v46  ;;  %v103_v46 = vld [vmem:[%s2348_s0 + $0x290] sm:$0xff] }
  0x3a   :  { %836 = vmatpush2.bf16.msra.mxu0 %v1541_v51  ;;  %889 = vmatpush2.bf16.msra.mxu1 %v1543_v52  ;;  %v31_v51 = vld [vmem:[%s2348_s0 + $0x50] sm:$0xff] }
  0x3b   :  { %837 = vmatprep.subr.bf16.mxu0 %v1534_v53  ;;  %890 = vmatprep.subr.bf16.mxu1 %v1536_v54  ;;  %v35_v52 = vld [vmem:[%s2348_s0 + $0x70] sm:$0xff]  ;;  %v36_v53 = vld [vmem:[%s2348_s0 + $0x78] sm:$0xff]  ;;  %v1481_v54 = vcombine.low %v39_v43, %v43_v44 }
  0x3c   :  { %v1474_v57 = vcombine.high %v31_v51, %v35_v52 }
  0x3e   :  { %838 = vmatpush2.bf16.msra.mxu0 %v1533_v60  ;;  %891 = vmatpush2.bf16.msra.mxu1 %v1535_v61  ;;  %v27_v60 = vld [vmem:[%s2348_s0 + $0x30] sm:$0xff]  ;;  %v24_v61 = vld [vmem:[%s2348_s0 + $0x18] sm:$0xff] }
  0x3f   :  { %839 = vmatprep.subr.bf16.mxu0 %v1526_v62  ;;  %892 = vmatprep.subr.bf16.mxu1 %v1528_v63  ;;  %v28_v62 = vld [vmem:[%s2348_s0 + $0x38] sm:$0xff]  ;;  %v1473_v63 = vcombine.low %v31_v51, %v35_v52  ;;  %v1466_v1 = vcombine.high %v23_v59, %v27_v60 }
  0x40   :  { %v1468_v2 = vcombine.high %v24_v61, %v28_v62  ;;  %v1467_v8 = vcombine.low %v24_v61, %v28_v62  ;;  %v87_v62 = vld [vmem:[%s2348_s0 + $0x210] sm:$0xff] }
  0x42   :  { %840 = vmatpush2.bf16.msra.mxu0 %v1525_v4  ;;  %893 = vmatpush2.bf16.msra.mxu1 %v1527_v5  ;;  %v147_v4 = vld [vmem:[%s2348_s0 + $0x3f0] sm:$0xff]  ;;  %v144_v5 = vld [vmem:[%s2348_s0 + $0x3d8] sm:$0xff] }
  0x43   :  { %915 = vmatprep.subr.bf16.mxu0 %v1522_v6  ;;  %968 = vmatprep.subr.bf16.mxu1 %v1524_v7  ;;  %v148_v6 = vld [vmem:[%s2348_s0 + $0x3f8] sm:$0xff]  ;;  %v1465_v7 = vcombine.low %v23_v59, %v27_v60  ;;  %v1586_v9 = vcombine.high %v143_v3, %v147_v4 }
  0x44   :  { %v1588_v11 = vcombine.high %v144_v5, %v148_v6  ;;  %v1587_v17 = vcombine.low %v144_v5, %v148_v6 }
  0x45   :  { %842 = vmatmul.mubr.bf16.vlgmr.msra.gmra.mxu0 %v1884_v10  ;;  %895 = vmatmul.mubr.bf16.vlgmr.msra.gmra.mxu1 %v1884_v10 }
  0x46   :  { %916 = vmatpush1.bf16.msra.mxu0 %v1521_v13  ;;  %969 = vmatpush1.bf16.msra.mxu1 %v1523_v14  ;;  %v139_v13 = vld [vmem:[%s2348_s0 + $0x3b0] sm:$0xff]  ;;  %v136_v14 = vld [vmem:[%s2348_s0 + $0x398] sm:$0xff] }
  0x47   :  { %917 = vmatprep.subr.bf16.mxu0 %v1514_v15  ;;  %970 = vmatprep.subr.bf16.mxu1 %v1516_v16  ;;  %v140_v15 = vld [vmem:[%s2348_s0 + $0x3b8] sm:$0xff]  ;;  %v1585_v16 = vcombine.low %v143_v3, %v147_v4  ;;  %v1578_v18 = vcombine.high %v135_v12, %v139_v13 }
  0x48   :  { %851 = vmatprep.mubr.bf16.mxu0 %v1901_v19  ;;  %904 = vmatprep.mubr.bf16.mxu1 %v1901_v19  ;;  %v1580_v20 = vcombine.high %v136_v14, %v140_v15  ;;  %v1579_v26 = vcombine.low %v136_v14, %v140_v15 }
  0x4a   :  { %918 = vmatpush1.bf16.msra.mxu0 %v1513_v22  ;;  %971 = vmatpush1.bf16.msra.mxu1 %v1515_v23  ;;  %v131_v22 = vld [vmem:[%s2348_s0 + $0x370] sm:$0xff]  ;;  %v128_v23 = vld [vmem:[%s2348_s0 + $0x358] sm:$0xff] }
  0x4b   :  { %919 = vmatprep.subr.bf16.mxu0 %v1506_v24  ;;  %972 = vmatprep.subr.bf16.mxu1 %v1508_v25  ;;  %v132_v24 = vld [vmem:[%s2348_s0 + $0x378] sm:$0xff]  ;;  %v1577_v25 = vcombine.low %v135_v12, %v139_v13  ;;  %v1570_v27 = vcombine.high %v127_v21, %v131_v22 }
  0x4c   :  { %v1572_v28 = vcombine.high %v128_v23, %v132_v24  ;;  %v1571_v35 = vcombine.low %v128_v23, %v132_v24 }
  0x4d   :  { %852 = vmatmul.mubr.bf16.gmra.mxu0 %v1927_v30  ;;  %905 = vmatmul.mubr.bf16.gmra.mxu1 %v1927_v30 }
  0x4e   :  { %920 = vmatpush1.bf16.msra.mxu0 %v1505_v31  ;;  %973 = vmatpush1.bf16.msra.mxu1 %v1507_v32  ;;  %v123_v31 = vld [vmem:[%s2348_s0 + $0x330] sm:$0xff]  ;;  %v120_v32 = vld [vmem:[%s2348_s0 + $0x318] sm:$0xff] }
  0x4f   :  { %921 = vmatprep.subr.bf16.mxu0 %v1498_v33  ;;  %974 = vmatprep.subr.bf16.mxu1 %v1500_v34  ;;  %v124_v33 = vld [vmem:[%s2348_s0 + $0x338] sm:$0xff]  ;;  %v1569_v34 = vcombine.low %v127_v21, %v131_v22  ;;  %v1562_v36 = vcombine.high %v119_v29, %v123_v31 }
  0x50   :  { %947 = vmatprep.mubr.bf16.mxu0 %v1757_v56  ;;  %1000 = vmatprep.mubr.bf16.mxu1 %v1757_v56  ;;  %v32_v56 = vld [vmem:[%s2348_s0 + $0x58] sm:$0xff]  ;;  %v1564_v37 = vcombine.high %v120_v32, %v124_v33  ;;  %v1563_v43 = vcombine.low %v120_v32, %v124_v33 }
  0x51   :  { %v1476_v58 = vcombine.high %v32_v56, %v36_v53  ;;  %v1475_v0 = vcombine.low %v32_v56, %v36_v53  ;;  %v95_v53 = vld [vmem:[%s2348_s0 + $0x250] sm:$0xff] }
  0x52   :  { %922 = vmatpush1.bf16.msra.mxu0 %v1497_v39  ;;  %975 = vmatpush1.bf16.msra.mxu1 %v1499_v40  ;;  %v115_v39 = vld [vmem:[%s2348_s0 + $0x2f0] sm:$0xff]  ;;  %v112_v40 = vld [vmem:[%s2348_s0 + $0x2d8] sm:$0xff] }
  0x53   :  { %923 = vmatprep.subr.bf16.mxu0 %v1490_v41  ;;  %976 = vmatprep.subr.bf16.mxu1 %v1492_v42  ;;  %v116_v41 = vld [vmem:[%s2348_s0 + $0x2f8] sm:$0xff]  ;;  %v1561_v42 = vcombine.low %v119_v29, %v123_v31  ;;  %v1554_v44 = vcombine.high %v111_v38, %v115_v39 }
  0x54   :  { %v1556_v45 = vcombine.high %v112_v40, %v116_v41  ;;  %v1555_v51 = vcombine.low %v112_v40, %v116_v41 }
  0x56   :  { %924 = vmatpush1.bf16.msra.mxu0 %v1489_v47  ;;  %977 = vmatpush1.bf16.msra.mxu1 %v1491_v48  ;;  %v107_v47 = vld [vmem:[%s2348_s0 + $0x2b0] sm:$0xff]  ;;  %v104_v48 = vld [vmem:[%s2348_s0 + $0x298] sm:$0xff] }
  0x57   :  { %925 = vmatprep.subr.bf16.mxu0 %v1482_v49  ;;  %978 = vmatprep.subr.bf16.mxu1 %v1484_v50  ;;  %v108_v49 = vld [vmem:[%s2348_s0 + $0x2b8] sm:$0xff]  ;;  %v1553_v50 = vcombine.low %v111_v38, %v115_v39  ;;  %v1546_v52 = vcombine.high %v103_v46, %v107_v47 }
  0x58   :  { %v1548_v56 = vcombine.high %v104_v48, %v108_v49  ;;  %v1547_v59 = vcombine.low %v104_v48, %v108_v49 }
  0x5a   :  { %926 = vmatpush1.bf16.msra.mxu0 %v1481_v54  ;;  %979 = vmatpush1.bf16.msra.mxu1 %v1483_v55  ;;  %v99_v54 = vld [vmem:[%s2348_s0 + $0x270] sm:$0xff]  ;;  %v96_v55 = vld [vmem:[%s2348_s0 + $0x258] sm:$0xff] }
  0x5b   :  { %927 = vmatprep.subr.bf16.mxu0 %v1474_v57  ;;  %980 = vmatprep.subr.bf16.mxu1 %v1476_v58  ;;  %v100_v57 = vld [vmem:[%s2348_s0 + $0x278] sm:$0xff]  ;;  %v1545_v58 = vcombine.low %v103_v46, %v107_v47  ;;  %v1538_v60 = vcombine.high %v95_v53, %v99_v54 }
  0x5c   :  { %v1540_v61 = vcombine.high %v96_v55, %v100_v57  ;;  %v1539_v3 = vcombine.low %v96_v55, %v100_v57 }
  0x5e   :  { %928 = vmatpush1.bf16.msra.mxu0 %v1473_v63  ;;  %981 = vmatpush1.bf16.msra.mxu1 %v1475_v0  ;;  %v91_v63 = vld [vmem:[%s2348_s0 + $0x230] sm:$0xff]  ;;  %v88_v0 = vld [vmem:[%s2348_s0 + $0x218] sm:$0xff] }
  0x5f   :  { %929 = vmatprep.subr.bf16.mxu0 %v1466_v1  ;;  %982 = vmatprep.subr.bf16.mxu1 %v1468_v2  ;;  %v92_v1 = vld [vmem:[%s2348_s0 + $0x238] sm:$0xff]  ;;  %v1537_v2 = vcombine.low %v95_v53, %v99_v54  ;;  %v1530_v4 = vcombine.high %v87_v62, %v91_v63  ;;  %v1529_v6 = vcombine.low %v87_v62, %v91_v63 }
  0x60   :  { %v1532_v5 = vcombine.high %v88_v0, %v92_v1 }
  0x62   :  { %930 = vmatpush1.bf16.msra.mxu0 %v1465_v7  ;;  %983 = vmatpush1.bf16.msra.mxu1 %v1467_v8  ;;  %v1531_v7 = vcombine.low %v88_v0, %v92_v1 }
  0x63   :  { %931 = vmatprep.subr.bf16.mxu0 %v1586_v9  ;;  %984 = vmatprep.subr.bf16.mxu1 %v1588_v11 }
  0x66   :  { %932 = vmatpush2.bf16.msra.mxu0 %v1585_v16  ;;  %985 = vmatpush2.bf16.msra.mxu1 %v1587_v17 }
  0x67   :  { %933 = vmatprep.subr.bf16.mxu0 %v1578_v18  ;;  %986 = vmatprep.subr.bf16.mxu1 %v1580_v20 }
  0x6a   :  { %934 = vmatpush2.bf16.msra.mxu0 %v1577_v25  ;;  %987 = vmatpush2.bf16.msra.mxu1 %v1579_v26 }
  0x6b   :  { %935 = vmatprep.subr.bf16.mxu0 %v1570_v27  ;;  %988 = vmatprep.subr.bf16.mxu1 %v1572_v28 }
  0x6e   :  { %936 = vmatpush2.bf16.msra.mxu0 %v1569_v34  ;;  %989 = vmatpush2.bf16.msra.mxu1 %v1571_v35 }
  0x6f   :  { %937 = vmatprep.subr.bf16.mxu0 %v1562_v36  ;;  %990 = vmatprep.subr.bf16.mxu1 %v1564_v37 }
  0x72   :  { %938 = vmatpush2.bf16.msra.mxu0 %v1561_v42  ;;  %991 = vmatpush2.bf16.msra.mxu1 %v1563_v43 }
  0x73   :  { %939 = vmatprep.subr.bf16.mxu0 %v1554_v44  ;;  %992 = vmatprep.subr.bf16.mxu1 %v1556_v45 }
  0x76   :  { %940 = vmatpush2.bf16.msra.mxu0 %v1553_v50  ;;  %993 = vmatpush2.bf16.msra.mxu1 %v1555_v51 }
  0x77   :  { %941 = vmatprep.subr.bf16.mxu0 %v1546_v52  ;;  %994 = vmatprep.subr.bf16.mxu1 %v1548_v56 }
  0x7a   :  { %942 = vmatpush2.bf16.msra.mxu0 %v1545_v58  ;;  %995 = vmatpush2.bf16.msra.mxu1 %v1547_v59 }
  0x7b   :  { %943 = vmatprep.subr.bf16.mxu0 %v1538_v60  ;;  %996 = vmatprep.subr.bf16.mxu1 %v1540_v61 }
  0x7e   :  { %944 = vmatpush2.bf16.msra.mxu0 %v1537_v2  ;;  %997 = vmatpush2.bf16.msra.mxu1 %v1539_v3 }
  0x7f   :  { %945 = vmatprep.subr.bf16.mxu0 %v1530_v4  ;;  %998 = vmatprep.subr.bf16.mxu1 %v1532_v5 }
  0x82   :  { %946 = vmatpush2.bf16.msra.mxu0 %v1529_v6  ;;  %999 = vmatpush2.bf16.msra.mxu1 %v1531_v7 }
  0x85   :  { %948 = vmatmul.mubr.bf16.vlgmr.msra.gmra.mxu0 %v1884_v10  ;;  %1001 = vmatmul.mubr.bf16.vlgmr.msra.gmra.mxu1 %v1884_v10 }
  0x86   :  { %957 = vmatprep.mubr.bf16.mxu0 %v1901_v19  ;;  %1010 = vmatprep.mubr.bf16.mxu1 %v1901_v19 }
  0x8d   :  { %958 = vmatmul.mubr.bf16.gmra.mxu0 %v1927_v30  ;;  %1011 = vmatmul.mubr.bf16.gmra.mxu1 %v1927_v30 }
 0x105   :  { %v2084_v8 = vpop.f32.mrf.mxu0  ;;  %v2086_v9 = vpop.f32.mrf.mxu1 }
 0x106   :  { %v1057_v30 = vmul.f32 %v2084_v8, %v2084_v8  ;;  %v1059_v23 = vmul.f32 %v2086_v9, %v2086_v9 }
 0x107   :  { %v2088_v11 = vpop.f32.mrf.mxu0  ;;  %v2090_v12 = vpop.f32.mrf.mxu1 }
 0x108   :  { %v1058_v17 = vmul.f32 %v2088_v11, %v2088_v11  ;;  %v1021_v20 = vadd.f32 %v2088_v11, %v2084_v8  ;;  %v1060_v34 = vmul.f32 %v2090_v12, %v2090_v12 }
 0x109   :  { %v2092_v13 = vpop.f32.mrf.mxu0  ;;  %v2094_v14 = vpop.f32.mrf.mxu1 }
 0x10a   :  { %v1089_v24 = vadd.f32 %v1058_v17, %v1057_v30  ;;  %v1065_v25 = vmul.f32 %v2092_v13, %v2092_v13  ;;  %v1022_v28 = vadd.f32 %v1021_v20, %v2086_v9  ;;  %v1067_v36 = vmul.f32 %v2094_v14, %v2094_v14 }
 0x10b   :  { %v2096_v10 = vpop.f32.mrf.mxu0  ;;  %v2098_v15 = vpop.f32.mrf.mxu1 }
 0x10c   :  { %v1066_v21 = vmul.f32 %v2096_v10, %v2096_v10  ;;  %v1030_v27 = vadd.f32 %v2096_v10, %v2092_v13  ;;  %v1090_v35 = vadd.f32 %v1089_v24, %v1059_v23  ;;  %v1023_v40 = vadd.f32 %v1022_v28, %v2090_v12 }
 0x10d   :  { %v2100_v19 = vpop.f32.mrf.mxu0  ;;  %v2102_v16 = vpop.f32.mrf.mxu1  ;;  %v1068_v49 = vmul.f32 %v2098_v15, %v2098_v15 }
 0x10e   :  { %v1098_v29 = vadd.f32 %v1066_v21, %v1065_v25  ;;  %v1073_v32 = vmul.f32 %v2100_v19, %v2100_v19  ;;  %v1031_v38 = vadd.f32 %v1030_v27, %v2094_v14  ;;  %v1075_v45 = vmul.f32 %v2102_v16, %v2102_v16 }
 0x10f   :  { %v2108_v18 = vpop.f32.mrf.mxu0  ;;  %v2114_v22 = vpop.f32.mrf.mxu1  ;;  %v1091_v48 = vadd.f32 %v1090_v35, %v1060_v34 }
 0x110   :  { %v1074_v33 = vmul.f32 %v2108_v18, %v2108_v18  ;;  %v1039_v39 = vadd.f32 %v2108_v18, %v2100_v19  ;;  %v1099_v41 = vadd.f32 %v1098_v29, %v1067_v36  ;;  %v1032_v56 = vadd.f32 %v1031_v38, %v2098_v15 }
 0x111   :  { %v2120_v26 = vpop.f32.mrf.mxu0  ;;  %v2125_v31 = vpop.f32.mrf.mxu1  ;;  %v1076_v55 = vmul.f32 %v2114_v22, %v2114_v22 }
 0x112   :  { %v1107_v43 = vadd.f32 %v1074_v33, %v1073_v32  ;;  %v1081_v44 = vmul.f32 %v2120_v26, %v2120_v26  ;;  %v1040_v53 = vadd.f32 %v1039_v39, %v2102_v16  ;;  %v1100_v58 = vadd.f32 %v1099_v41, %v1068_v49 }
 0x113   :  { %v2135_v37 = vpop.f32.mrf.mxu0  ;;  %v2141_v42 = vpop.f32.mrf.mxu1  ;;  %v1083_v1 = vmul.f32 %v2125_v31, %v2125_v31 }
 0x114   :  { %v1082_v46 = vmul.f32 %v2135_v37, %v2135_v37  ;;  %v1048_v54 = vadd.f32 %v2135_v37, %v2120_v26  ;;  %v1108_v63 = vadd.f32 %v1107_v43, %v1075_v45  ;;  %v1041_v17 = vadd.f32 %v1040_v53, %v2114_v22 }
 0x115   :  { %v1084_v21 = vmul.f32 %v2141_v42, %v2141_v42 }
 0x116   :  { %v1116_v0 = vadd.f32 %v1082_v46, %v1081_v44  ;;  %v1049_v20 = vadd.f32 %v1048_v54, %v2125_v31  ;;  %v1109_v32 = vadd.f32 %v1108_v63, %v1076_v55 }
 0x118   :  { %v1117_v33 = vadd.f32 %v1116_v0, %v1083_v1  ;;  %v1050_v44 = vadd.f32 %v1049_v20, %v2141_v42 }
 0x11a   :  { %v1118_v55 = vadd.f32 %v1117_v33, %v1084_v21 }
 0x145   :  { %v2149_v47 = vpop.f32.mrf.mxu0  ;;  %v2156_v52 = vpop.f32.mrf.mxu1 }
 0x146   :  { %v1024_v50 = vadd.f32 %v1023_v40, %v2149_v47  ;;  %v1061_v51 = vmul.f32 %v2149_v47, %v2149_v47  ;;  %v1063_v2 = vmul.f32 %v2156_v52, %v2156_v52 }
 0x147   :  { %v2164_v57 = vpop.f32.mrf.mxu0  ;;  %v2169_v62 = vpop.f32.mrf.mxu1 }
 0x148   :  { %v1092_v59 = vadd.f32 %v1091_v48, %v1061_v51  ;;  %v1025_v60 = vadd.f32 %v1024_v50, %v2164_v57  ;;  %v1062_v61 = vmul.f32 %v2164_v57, %v2164_v57  ;;  %v1064_v35 = vmul.f32 %v2169_v62, %v2169_v62 }
 0x149   :  { %v2175_v3 = vpop.f32.mrf.mxu0  ;;  %v2180_v6 = vpop.f32.mrf.mxu1 }
 0x14a   :  { %v1033_v4 = vadd.f32 %v1032_v56, %v2175_v3  ;;  %v1069_v5 = vmul.f32 %v2175_v3, %v2175_v3  ;;  %v1026_v7 = vadd.f32 %v1025_v60, %v2156_v52  ;;  %v1093_v30 = vadd.f32 %v1092_v59, %v1062_v61 }
 0x14b   :  { %v2187_v23 = vpop.f32.mrf.mxu0  ;;  %v2192_v28 = vpop.f32.mrf.mxu1  ;;  %v1071_v38 = vmul.f32 %v2180_v6, %v2180_v6 }
 0x14c   :  { %v1101_v24 = vadd.f32 %v1100_v58, %v1069_v5  ;;  %v1034_v25 = vadd.f32 %v1033_v4, %v2187_v23  ;;  %v1070_v27 = vmul.f32 %v2187_v23, %v2187_v23  ;;  %v1027_v29 = vadd.f32 %v1026_v7, %v2169_v62 }
 0x14d   :  { %v2195_v34 = vpop.f32.mrf.mxu0  ;;  %v1094_v36 = vadd.f32 %v1093_v30, %v1063_v2  ;;  %v2204_v41 = vpop.f32.mrf.mxu1  ;;  %v1072_v48 = vmul.f32 %v2192_v28, %v2192_v28 }
 0x14e   :  { %v1042_v39 = vadd.f32 %v1041_v17, %v2195_v34  ;;  %v1077_v40 = vmul.f32 %v2195_v34, %v2195_v34  ;;  %1028 = vadd.xlane.f32.xlu0 %v1027_v29  ;;  %v1102_v43 = vadd.f32 %v1101_v24, %v1070_v27  ;;  %v1035_v49 = vadd.f32 %v1034_v25, %v2180_v6 }
 0x14f   :  { %v2207_v45 = vpop.f32.mrf.mxu0  ;;  %v1095_v46 = vadd.f32 %v1094_v36, %v1064_v35  ;;  %v2215_v53 = vpop.f32.mrf.mxu1  ;;  %v1079_v59 = vmul.f32 %v2204_v41, %v2204_v41 }
 0x150   :  { %v1110_v50 = vadd.f32 %v1109_v32, %v1077_v40  ;;  %v1043_v51 = vadd.f32 %v1042_v39, %v2207_v45  ;;  %v1078_v56 = vmul.f32 %v2207_v45, %v2207_v45  ;;  %v1103_v54 = vadd.f32 %v1102_v43, %v1071_v38 }
 0x151   :  { %v2217_v58 = vpop.f32.mrf.mxu0  ;;  %v2227_v2 = vpop.f32.mrf.mxu1  ;;  %v1036_v4 = vadd.f32 %v1035_v49, %v2192_v28  ;;  %v1080_v20 = vmul.f32 %v2215_v53, %v2215_v53  ;;  %v1638_v40 = vmov 0  }
 0x152   :  { %v1051_v60 = vadd.f32 %v1050_v44, %v2217_v58  ;;  %v1085_v61 = vmul.f32 %v2217_v58, %v2217_v58  ;;  %1096 = vadd.xlane.f32.xlu0 %v1095_v46  ;;  %v1104_v63 = vadd.f32 %v1103_v54, %v1072_v48  ;;  %v1044_v0 = vadd.f32 %v1043_v51, %v2204_v41 }
 0x153   :  { %v2225_v1 = vpop.f32.mrf.mxu0  ;;  %v1111_v5 = vadd.f32 %v1110_v50, %v1078_v56  ;;  %v1087_v25 = vmul.f32 %v2227_v2, %v2227_v2  ;;  %v2239_v32 = vpop.f32.mrf.mxu1  ;;  %1622 = vset.pattern.permute.xlu0 %v1638_v40  ;;  %1623 = vset.pattern.permute.xlu1 %v1638_v40 }
 0x154   :  { %v1119_v7 = vadd.f32 %v1118_v55, %v1085_v61  ;;  %v1052_v30 = vadd.f32 %v1051_v60, %v2225_v1  ;;  %v1086_v17 = vmul.f32 %v2225_v1, %v2225_v1  ;;  %1105 = vadd.xlane.f32.xlu1 %v1104_v63  ;;  %v1045_v27 = vadd.f32 %v1044_v0, %v2215_v53 }
 0x155   :  { %v1112_v21 = vadd.f32 %v1111_v5, %v1079_v59  ;;  %v1088_v35 = vmul.f32 %v2239_v32, %v2239_v32 }
 0x156   :  { %v1120_v24 = vadd.f32 %v1119_v7, %v1086_v17  ;;  %1037 = vadd.xlane.f32.xlu0 %v1036_v4  ;;  %v1053_v29 = vadd.f32 %v1052_v30, %v2227_v2 }
 0x157   :  { %v1113_v33 = vadd.f32 %v1112_v21, %v1080_v20 }
 0x158   :  { %1046 = vadd.xlane.f32.xlu1 %v1045_v27  ;;  %v1054_v36 = vadd.f32 %v1053_v29, %v2239_v32  ;;  %v1121_v38 = vadd.f32 %v1120_v24, %v1087_v25 }
 0x15a   :  { %1114 = vadd.xlane.f32.xlu0 %v1113_v33  ;;  %v1122_v39 = vadd.f32 %v1121_v38, %v1088_v35 }
 0x15c   :  { %1055 = vadd.xlane.f32.xlu1 %v1054_v36 }
 0x160   :  { %1123 = vadd.xlane.f32.xlu1 %v1122_v39  ;;  %v1145_v39 = vld [vmem:[%s2350_s2] sm:$0xff] }
 0x1d7   :  { %v1029_v43 = vpop.xlane.xlu0 %1028 }
 0x1d8   :  { %v1125_v44 = vmul.f32 0.0009765625, %v1029_v43 }
 0x1da   :  { %v1133_v48 = vmul.f32 %v1125_v44, %v1125_v44 }
 0x1db   :  { %v1097_v46 = vpop.xlane.xlu0 %1096 }
 0x1dc   :  { %v1129_v49 = vmul.f32 0.0009765625, %v1097_v46 }
 0x1dd   :  { %v1106_v50 = vpop.xlane.xlu1 %1105 }
 0x1de   :  { %v1137_v51 = vsub.f32 %v1129_v49, %v1133_v48  ;;  %v1130_v61 = vmul.f32 0.0009765625, %v1106_v50  ;;  %v1146_v49 = vld [vmem:[%s2350_s2 + $0x8] sm:$0xff] }
 0x1df   :  { %v1038_v56 = vpop.xlane.xlu0 %1037 }
 0x1e0   :  { %v1141_v54 = vmax.f32 %v1137_v51, 0.0  ;;  %v1126_v55 = vmul.f32 0.0009765625, %v1038_v56 }
 0x1e1   :  { %v1047_v59 = vpop.xlane.xlu1 %1046 }
 0x1e2   :  { %v1149_v60 = vadd.f32 1e-05, %v1141_v54  ;;  %v1134_v63 = vmul.f32 %v1126_v55, %v1126_v55  ;;  %v1127_v0 = vmul.f32 0.0009765625, %v1047_v59  ;;  %v1161_v54 = vld [vmem:[%s2351_s3] sm:$0xff] }
 0x1e3   :  { %v1115_v4 = vpop.xlane.xlu0 %1114 }
 0x1e4   :  { %1630 = vrsqrt.f32 %v1149_v60  ;;  %v1138_v5 = vsub.f32 %v1130_v61, %v1134_v63  ;;  %v1135_v7 = vmul.f32 %v1127_v0, %v1127_v0  ;;  %v1131_v30 = vmul.f32 0.0009765625, %v1115_v4  ;;  %v1147_v61 = vld [vmem:[%s2350_s2 + $0x10] sm:$0xff] }
 0x1e5   :  { %v1056_v17 = vpop.xlane.xlu1 %1055 }
 0x1e6   :  { %v1142_v20 = vmax.f32 %v1138_v5, 0.0  ;;  %v1139_v21 = vsub.f32 %v1131_v30, %v1135_v7  ;;  %v1128_v24 = vmul.f32 0.0009765625, %v1056_v17  ;;  %v1162_v5 = vld [vmem:[%s2351_s3 + $0x8] sm:$0xff]  ;;  %v1148_v30 = vld [vmem:[%s2350_s2 + $0x18] sm:$0xff] }
 0x1e8   :  { %v1150_v25 = vadd.f32 1e-05, %v1142_v20  ;;  %v1143_v27 = vmax.f32 %v1139_v21, 0.0  ;;  %v1136_v33 = vmul.f32 %v1128_v24, %v1128_v24  ;;  %v1163_v21 = vld [vmem:[%s2351_s3 + $0x10] sm:$0xff] }
 0x1e9   :  { %v1124_v29 = vpop.xlane.xlu1 %1123 }
 0x1ea   :  { %1632 = vrsqrt.f32 %v1150_v25  ;;  %v1132_v35 = vmul.f32 0.0009765625, %v1124_v29  ;;  %v1151_v36 = vadd.f32 1e-05, %v1143_v27  ;;  %v1164_v27 = vld [vmem:[%s2351_s3 + $0x18] sm:$0xff] }
 0x1ec   :  { %v1140_v38 = vsub.f32 %v1132_v35, %v1136_v33  ;;  %1634 = vrsqrt.f32 %v1151_v36 }
 0x1ee   :  { %v1144_v40 = vmax.f32 %v1140_v38, 0.0 }
 0x1f0   :  { %v1152_v48 = vadd.f32 1e-05, %v1144_v40 }
 0x1f1   :  { %v1631_v43 = vpop.eup %1630 }
 0x1f2   :  { %v1157_v46 = vmul.f32 %v1631_v43, %v1145_v39  ;;  %1636 = vrsqrt.f32 %v1152_v48 }
 0x1f4   :  { %1175 = vperm.xlu0 %1622, %v1157_v46   ;;  %v1165_v56 = vmul.f32 %v1157_v46, %v1125_v44 }
 0x1f6   :  { %v1169_v59 = vsub.f32 %v1161_v54, %v1165_v56 }
 0x1f7   :  { %v1633_v50 = vpop.eup %1632 }
 0x1f8   :  { %v1158_v51 = vmul.f32 %v1633_v50, %v1146_v49 }
 0x1f9   :  { %v1635_v60 = vpop.eup %1634 }
 0x1fa   :  { %1180 = vperm.xlu1 %1623, %v1158_v51   ;;  %v1166_v63 = vmul.f32 %v1158_v51, %v1126_v55  ;;  %v1159_v4 = vmul.f32 %v1635_v60, %v1147_v61 }
 0x1fc   :  { %v1170_v44 = vsub.f32 %v1162_v5, %v1166_v63  ;;  %v1167_v20 = vmul.f32 %v1159_v4, %v1127_v0 }
 0x1fe   :  { %1227 = vperm.xlu1 %1623, %v1169_v59   ;;  %v1171_v55 = vsub.f32 %v1163_v21, %v1167_v20 }
 0x1ff   :  { %v1637_v7 = vpop.eup %1636 }
 0x200   :  { %v1160_v17 = vmul.f32 %v1637_v7, %v1148_v30 }
 0x202   :  { %1185 = vperm.xlu1 %1623, %v1159_v4   ;;  %v1168_v25 = vmul.f32 %v1160_v17, %v1128_v24 }
 0x204   :  { %v1172_v29 = vsub.f32 %v1164_v27, %v1168_v25 }
 0x206   :  { %1232 = vperm.xlu1 %1623, %v1170_v44  }
 0x20a   :  { %1190 = vperm.xlu1 %1623, %v1160_v17  }
 0x20e   :  { %1237 = vperm.xlu1 %1623, %v1171_v55  }
 0x212   :  { %1242 = vperm.xlu1 %1623, %v1172_v29  }
 0x26f   :  { %v1176_v33 = vpop.permute.xlu0 %1175 }
 0x270   :  { %v1193_v36 = vmul.f32 %v1176_v33, %v2084_v8  ;;  %v1194_v0 = vmul.f32 %v1176_v33, %v2088_v11  ;;  %v1195_v38 = vmul.f32 %v1176_v33, %v2086_v9  ;;  %v1196_v39 = vmul.f32 %v1176_v33, %v2090_v12 }
 0x271   :  { %v1197_v40 = vmul.f32 %v1176_v33, %v2149_v47  ;;  %v1198_v24 = vmul.f32 %v1176_v33, %v2164_v57  ;;  %v1199_v43 = vmul.f32 %v1176_v33, %v2156_v52  ;;  %v1200_v46 = vmul.f32 %v1176_v33, %v2169_v62 }
 0x275   :  { %v1181_v35 = vpop.permute.xlu1 %1180 }
 0x276   :  { %v1201_v48 = vmul.f32 %v1181_v35, %v2092_v13  ;;  %v1202_v49 = vmul.f32 %v1181_v35, %v2096_v10  ;;  %v1203_v8 = vmul.f32 %v1181_v35, %v2094_v14  ;;  %v1204_v11 = vmul.f32 %v1181_v35, %v2098_v15 }
 0x277   :  { %v1205_v9 = vmul.f32 %v1181_v35, %v2175_v3  ;;  %v1206_v12 = vmul.f32 %v1181_v35, %v2187_v23  ;;  %v1207_v13 = vmul.f32 %v1181_v35, %v2180_v6  ;;  %v1208_v15 = vmul.f32 %v1181_v35, %v2192_v28 }
 0x279   :  { %v1228_v50 = vpop.permute.xlu1 %1227 }
 0x27a   :  { %v1245_v47 = vadd.f32 %v1228_v50, %v1193_v36  ;;  %v1246_v51 = vadd.f32 %v1228_v50, %v1194_v0  ;;  %v1247_v57 = vadd.f32 %v1228_v50, %v1195_v38  ;;  %v1248_v56 = vadd.f32 %v1228_v50, %v1196_v39 }
 0x27b   :  { %v1249_v52 = vadd.f32 %v1228_v50, %v1197_v40  ;;  %v1250_v54 = vadd.f32 %v1228_v50, %v1198_v24  ;;  %v1251_v62 = vadd.f32 %v1228_v50, %v1199_v43  ;;  %v1252_v59 = vadd.f32 %v1228_v50, %v1200_v46 }
 0x27c   :  { %v1277_v10 = vmul.f32 0.2, %v1245_v47  ;;  %v1278_v60 = vmul.f32 0.2, %v1246_v51  ;;  %v1279_v14 = vmul.f32 0.2, %v1247_v57 }
 0x27d   :  { %v1280_v61 = vmul.f32 0.2, %v1248_v56  ;;  %v1281_v3 = vmul.f32 0.2, %v1249_v52  ;;  %v1282_v63 = vmul.f32 0.2, %v1250_v54  ;;  %v1186_v23 = vpop.permute.xlu1 %1185 }
 0x27e   :  { %v1283_v4 = vmul.f32 0.2, %v1251_v62  ;;  %v1284_v5 = vmul.f32 0.2, %v1252_v59  ;;  %v1309_v44 = vmax.f32 %v1245_v47, %v1277_v10  ;;  %v1310_v7 = vmax.f32 %v1246_v51, %v1278_v60 }
 0x27f   :  { %v1311_v30 = vmax.f32 %v1247_v57, %v1279_v14  ;;  %v1312_v17 = vmax.f32 %v1248_v56, %v1280_v61  ;;  %v1313_v20 = vmax.f32 %v1249_v52, %v1281_v3  ;;  %v1314_v21 = vmax.f32 %v1250_v54, %v1282_v63 }
 0x280   :  { %v1315_v55 = vmax.f32 %v1251_v62, %v1283_v4  ;;  %v1316_v25 = vmax.f32 %v1252_v59, %v1284_v5  ;;  %v1605_v6 = vpack.c.bf16 %v1310_v7, %v1309_v44  ;;  %v1209_v27 = vmul.f32 %v1186_v23, %v2100_v19 }
 0x281   :  { %v1606_v29 = vpack.c.bf16 %v1312_v17, %v1311_v30  ;;  %v1607_v33 = vpack.c.bf16 %v1314_v21, %v1313_v20  ;;  %v1210_v28 = vmul.f32 %v1186_v23, %v2108_v18  ;;  %v1211_v35 = vmul.f32 %v1186_v23, %v2102_v16  ;;  %v1233_v36 = vpop.permute.xlu1 %1232 }
 0x282   :  { %v1608_v0 = vpack.c.bf16 %v1316_v25, %v1315_v55  ;;  %1437 = vst [vmem:[%s2352_s4] sm:$0xff] %v1605_v6  ;;  %v1212_v38 = vmul.f32 %v1186_v23, %v2114_v22  ;;  %v1213_v39 = vmul.f32 %v1186_v23, %v2195_v34  ;;  %v1214_v40 = vmul.f32 %v1186_v23, %v2207_v45 }
 0x283   :  { %1438 = vst [vmem:[%s2352_s4 + $0x8] sm:$0xff] %v1606_v29  ;;  %1439 = vst [vmem:[%s2352_s4 + $0x10] sm:$0xff] %v1607_v33  ;;  %v1215_v19 = vmul.f32 %v1186_v23, %v2204_v41  ;;  %v1216_v16 = vmul.f32 %v1186_v23, %v2215_v53  ;;  %v1253_v18 = vadd.f32 %v1233_v36, %v1201_v48 }
 0x284   :  { %v1254_v24 = vadd.f32 %v1233_v36, %v1202_v49  ;;  %1440 = vst [vmem:[%s2352_s4 + $0x18] sm:$0xff] %v1608_v0  ;;  %v1255_v22 = vadd.f32 %v1233_v36, %v1203_v8  ;;  %v1256_v34 = vadd.f32 %v1233_v36, %v1204_v11  ;;  %v1257_v45 = vadd.f32 %v1233_v36, %v1205_v9 }
 0x285   :  { %v1258_v43 = vadd.f32 %v1233_v36, %v1206_v12  ;;  %v1259_v46 = vadd.f32 %v1233_v36, %v1207_v13  ;;  %v1260_v50 = vadd.f32 %v1233_v36, %v1208_v15  ;;  %v1285_v47 = vmul.f32 0.2, %v1253_v18  ;;  %v1191_v57 = vpop.permute.xlu1 %1190 }
 0x286   :  { %v1286_v51 = vmul.f32 0.2, %v1254_v24  ;;  %v1287_v56 = vmul.f32 0.2, %v1255_v22  ;;  %v1288_v52 = vmul.f32 0.2, %v1256_v34  ;;  %v1217_v53 = vmul.f32 %v1191_v57, %v2120_v26 }
 0x287   :  { %v1289_v41 = vmul.f32 0.2, %v1257_v45  ;;  %v1290_v48 = vmul.f32 0.2, %v1258_v43  ;;  %v1291_v49 = vmul.f32 0.2, %v1259_v46  ;;  %v1317_v62 = vmax.f32 %v1253_v18, %v1285_v47 }
 0x288   :  { %v1292_v54 = vmul.f32 0.2, %v1260_v50  ;;  %v1318_v59 = vmax.f32 %v1254_v24, %v1286_v51  ;;  %v1319_v10 = vmax.f32 %v1255_v22, %v1287_v56  ;;  %v1320_v8 = vmax.f32 %v1256_v34, %v1288_v52 }
 0x289   :  { %v1321_v11 = vmax.f32 %v1257_v45, %v1289_v41  ;;  %v1322_v9 = vmax.f32 %v1258_v43, %v1290_v48  ;;  %v1323_v12 = vmax.f32 %v1259_v46, %v1291_v49  ;;  %v1238_v60 = vpop.permute.xlu1 %1237  ;;  %v1218_v14 = vmul.f32 %v1191_v57, %v2135_v37 }
 0x28a   :  { %v1324_v13 = vmax.f32 %v1260_v50, %v1292_v54  ;;  %v1609_v15 = vpack.c.bf16 %v1318_v59, %v1317_v62  ;;  %v1610_v61 = vpack.c.bf16 %v1320_v8, %v1319_v10  ;;  %v1261_v3 = vadd.f32 %v1238_v60, %v1209_v27 }
 0x28b   :  { %v1262_v63 = vadd.f32 %v1238_v60, %v1210_v28  ;;  %v1611_v23 = vpack.c.bf16 %v1322_v9, %v1321_v11  ;;  %v1263_v4 = vadd.f32 %v1238_v60, %v1211_v35  ;;  %v1264_v5 = vadd.f32 %v1238_v60, %v1212_v38 }
 0x28c   :  { %v1612_v26 = vpack.c.bf16 %v1324_v13, %v1323_v12  ;;  %1441 = vst [vmem:[%s2352_s4 + $0x20] sm:$0xff] %v1609_v15  ;;  %1442 = vst [vmem:[%s2352_s4 + $0x28] sm:$0xff] %v1610_v61  ;;  %v1265_v44 = vadd.f32 %v1238_v60, %v1213_v39  ;;  %v1266_v7 = vadd.f32 %v1238_v60, %v1214_v40  ;;  %v1293_v17 = vmul.f32 0.2, %v1261_v3 }
 0x28d   :  { %v1267_v30 = vadd.f32 %v1238_v60, %v1215_v19  ;;  %v1268_v37 = vadd.f32 %v1238_v60, %v1216_v16  ;;  %1443 = vst [vmem:[%s2352_s4 + $0x30] sm:$0xff] %v1611_v23  ;;  %v1294_v20 = vmul.f32 0.2, %v1262_v63  ;;  %v1295_v21 = vmul.f32 0.2, %v1263_v4  ;;  %v1243_v19 = vpop.permute.xlu1 %1242 }
 0x28e   :  { %1444 = vst [vmem:[%s2352_s4 + $0x38] sm:$0xff] %v1612_v26  ;;  %v1219_v55 = vmul.f32 %v1191_v57, %v2125_v31  ;;  %v1296_v25 = vmul.f32 0.2, %v1264_v5  ;;  %v1297_v6 = vmul.f32 0.2, %v1265_v44  ;;  %v1220_v29 = vmul.f32 %v1191_v57, %v2141_v42 }
 0x28f   :  { %v1298_v27 = vmul.f32 0.2, %v1266_v7  ;;  %v1299_v33 = vmul.f32 0.2, %v1267_v30  ;;  %v1300_v28 = vmul.f32 0.2, %v1268_v37  ;;  %v1325_v35 = vmax.f32 %v1261_v3, %v1293_v17 }
 0x290   :  { %v1326_v36 = vmax.f32 %v1262_v63, %v1294_v20  ;;  %v1327_v0 = vmax.f32 %v1263_v4, %v1295_v21  ;;  %v1328_v38 = vmax.f32 %v1264_v5, %v1296_v25  ;;  %v1329_v39 = vmax.f32 %v1265_v44, %v1297_v6 }
 0x291   :  { %v1330_v40 = vmax.f32 %v1266_v7, %v1298_v27  ;;  %v1331_v16 = vmax.f32 %v1267_v30, %v1299_v33  ;;  %v1332_v18 = vmax.f32 %v1268_v37, %v1300_v28  ;;  %v1221_v22 = vmul.f32 %v1191_v57, %v2217_v58 }
 0x292   :  { %v1613_v24 = vpack.c.bf16 %v1326_v36, %v1325_v35  ;;  %v1614_v31 = vpack.c.bf16 %v1328_v38, %v1327_v0  ;;  %v1222_v45 = vmul.f32 %v1191_v57, %v2225_v1  ;;  %v1223_v42 = vmul.f32 %v1191_v57, %v2227_v2 }
 0x293   :  { %v1615_v34 = vpack.c.bf16 %v1330_v40, %v1329_v39  ;;  %v1616_v43 = vpack.c.bf16 %v1332_v18, %v1331_v16  ;;  %v1224_v46 = vmul.f32 %v1191_v57, %v2239_v32  ;;  %v1269_v50 = vadd.f32 %v1243_v19, %v1217_v53 }
 0x294   :  { %1445 = vst [vmem:[%s2352_s4 + $0x40] sm:$0xff] %v1613_v24  ;;  %v1270_v47 = vadd.f32 %v1243_v19, %v1218_v14  ;;  %1446 = vst [vmem:[%s2352_s4 + $0x48] sm:$0xff] %v1614_v31  ;;  %v1271_v58 = vadd.f32 %v1243_v19, %v1219_v55  ;;  %v1272_v1 = vadd.f32 %v1243_v19, %v1220_v29 }
 0x295   :  { %1447 = vst [vmem:[%s2352_s4 + $0x50] sm:$0xff] %v1615_v34  ;;  %v1273_v2 = vadd.f32 %v1243_v19, %v1221_v22  ;;  %v1274_v51 = vadd.f32 %v1243_v19, %v1222_v45  ;;  %1448 = vst [vmem:[%s2352_s4 + $0x58] sm:$0xff] %v1616_v43  ;;  %v1275_v56 = vadd.f32 %v1243_v19, %v1223_v42  ;;  %v1301_v57 = vmul.f32 0.2, %v1269_v50 }
 0x296   :  { %v1276_v32 = vadd.f32 %v1243_v19, %v1224_v46  ;;  %v1302_v52 = vmul.f32 0.2, %v1270_v47  ;;  %v1303_v41 = vmul.f32 0.2, %v1271_v58  ;;  %v1304_v53 = vmul.f32 0.2, %v1272_v1 }
 0x297   :  { %v1305_v48 = vmul.f32 0.2, %v1273_v2  ;;  %v1306_v49 = vmul.f32 0.2, %v1274_v51  ;;  %v1307_v54 = vmul.f32 0.2, %v1275_v56  ;;  %v1333_v59 = vmax.f32 %v1269_v50, %v1301_v57 }
 0x298   :  { %v1308_v62 = vmul.f32 0.2, %v1276_v32  ;;  %v1334_v10 = vmax.f32 %v1270_v47, %v1302_v52  ;;  %v1335_v8 = vmax.f32 %v1271_v58, %v1303_v41  ;;  %v1336_v11 = vmax.f32 %v1272_v1, %v1304_v53 }
 0x299   :  { %v1337_v9 = vmax.f32 %v1273_v2, %v1305_v48  ;;  %v1338_v12 = vmax.f32 %v1274_v51, %v1306_v49  ;;  %v1339_v13 = vmax.f32 %v1275_v56, %v1307_v54 }
 0x29a   :  { %v1340_v60 = vmax.f32 %v1276_v32, %v1308_v62  ;;  %v1617_v14 = vpack.c.bf16 %v1334_v10, %v1333_v59  ;;  %v1618_v15 = vpack.c.bf16 %v1336_v11, %v1335_v8 }
 0x29b   :  { %v1619_v61 = vpack.c.bf16 %v1338_v12, %v1337_v9 }
 0x29c   :  { %v1620_v3 = vpack.c.bf16 %v1340_v60, %v1339_v13  ;;  %1449 = vst [vmem:[%s2352_s4 + $0x60] sm:$0xff] %v1617_v14  ;;  %1450 = vst [vmem:[%s2352_s4 + $0x68] sm:$0xff] %v1618_v15 }
 0x29d   :  { %1451 = vst [vmem:[%s2352_s4 + $0x70] sm:$0xff] %v1619_v61 }
 0x29e   :  { %1452 = vst [vmem:[%s2352_s4 + $0x78] sm:$0xff] %v1620_v3 }

// kernel: discriminator_forward.9
= control target key start
LH: loop header
LB: loop body
LE: loop exit
PB: predicated region body
PF: predicated region fallthrough
CT: control target
= control target key end

     0   :  { %s1716_s0 = inlined_call_operand.vmem [shape: bf16[512,256], index: 0, kind: input, shape index: {}]   ;;  %s1717_s1 = inlined_call_operand.vmem [shape: bf16[64,512], index: 1, kind: input, shape index: {}]   ;;  %s1718_s2 = inlined_call_operand.vmem [shape: f32[64,1], index: 2, kind: input, shape index: {}]   ;;  %s1719_s3 = inlined_call_operand.vmem [shape: f32[64,1], index: 3, kind: input, shape index: {}]   ;;  %s1720_s4 = inlined_call_operand.vmem [shape: bf16[64,256], index: 4, kind: output, shape index: {}]  }
   0x1   :  { %v1106_v0 = vld [vmem:[%s1716_s0 + $0x74] ss:$8 sps:$4 sm:$0xff]   ;;  %v1110_v2 = vld [vmem:[%s1716_s0 + $0x70] ss:$8 sps:$4 sm:$0xff]   ;;  %v1112_v4 = vld [vmem:[%s1716_s0 + $0x64] ss:$8 sps:$4 sm:$0xff]  }
   0x2   :  { %v1108_v1 = vld [vmem:[%s1716_s0 + $0x174] ss:$8 sps:$4 sm:$0xff]   ;;  %497 = vmatprep.subr.bf16.mxu0 %v1106_v0  ;;  %v1111_v3 = vld [vmem:[%s1716_s0 + $0x170] ss:$8 sps:$4 sm:$0xff]   ;;  %v1114_v5 = vld [vmem:[%s1716_s0 + $0x164] ss:$8 sps:$4 sm:$0xff]  }
   0x3   :  { %570 = vmatprep.subr.bf16.mxu1 %v1108_v1  ;;  %498 = vmatpush1.bf16.msra.mxu0 %v1110_v2  ;;  %v1116_v6 = vld [vmem:[%s1716_s0 + $0x60] ss:$8 sps:$4 sm:$0xff]   ;;  %v1118_v8 = vld [vmem:[%s1716_s0 + $0x54] ss:$8 sps:$4 sm:$0xff]   ;;  %v1122_v10 = vld [vmem:[%s1716_s0 + $0x50] ss:$8 sps:$4 sm:$0xff]  }
   0x4   :  { %571 = vmatpush1.bf16.msra.mxu1 %v1111_v3  ;;  %499 = vmatprep.subr.bf16.mxu0 %v1112_v4  ;;  %v1117_v7 = vld [vmem:[%s1716_s0 + $0x160] ss:$8 sps:$4 sm:$0xff]   ;;  %v1120_v9 = vld [vmem:[%s1716_s0 + $0x154] ss:$8 sps:$4 sm:$0xff]   ;;  %v1123_v11 = vld [vmem:[%s1716_s0 + $0x150] ss:$8 sps:$4 sm:$0xff]  }
   0x5   :  { %572 = vmatprep.subr.bf16.mxu1 %v1114_v5  ;;  %v1124_v12 = vld [vmem:[%s1716_s0 + $0x44] ss:$8 sps:$4 sm:$0xff]   ;;  %v1128_v14 = vld [vmem:[%s1716_s0 + $0x40] ss:$8 sps:$4 sm:$0xff]   ;;  %v1130_v16 = vld [vmem:[%s1716_s0 + $0x34] ss:$8 sps:$4 sm:$0xff]  }
   0x6   :  { %v1126_v13 = vld [vmem:[%s1716_s0 + $0x144] ss:$8 sps:$4 sm:$0xff]   ;;  %v1129_v15 = vld [vmem:[%s1716_s0 + $0x140] ss:$8 sps:$4 sm:$0xff]   ;;  %v1132_v17 = vld [vmem:[%s1716_s0 + $0x134] ss:$8 sps:$4 sm:$0xff]  }
   0x7   :  { %500 = vmatpush1.bf16.msra.mxu0 %v1116_v6  ;;  %v1134_v18 = vld [vmem:[%s1716_s0 + $0x30] ss:$8 sps:$4 sm:$0xff]   ;;  %v1136_v20 = vld [vmem:[%s1716_s0 + $0x24] ss:$8 sps:$4 sm:$0xff]   ;;  %v1140_v22 = vld [vmem:[%s1716_s0 + $0x20] ss:$8 sps:$4 sm:$0xff]  }
   0x8   :  { %573 = vmatpush1.bf16.msra.mxu1 %v1117_v7  ;;  %501 = vmatprep.subr.bf16.mxu0 %v1118_v8  ;;  %v1135_v19 = vld [vmem:[%s1716_s0 + $0x130] ss:$8 sps:$4 sm:$0xff]   ;;  %v1138_v21 = vld [vmem:[%s1716_s0 + $0x124] ss:$8 sps:$4 sm:$0xff]   ;;  %v1141_v23 = vld [vmem:[%s1716_s0 + $0x120] ss:$8 sps:$4 sm:$0xff]  }
   0x9   :  { %574 = vmatprep.subr.bf16.mxu1 %v1120_v9  ;;  %v1142_v24 = vld [vmem:[%s1716_s0 + $0x14] ss:$8 sps:$4 sm:$0xff]   ;;  %v1146_v26 = vld [vmem:[%s1716_s0 + $0x10] ss:$8 sps:$4 sm:$0xff]   ;;  %v1148_v28 = vld [vmem:[%s1716_s0 + $0x4] ss:$8 sps:$4 sm:$0xff]  }
   0xa   :  { %v1144_v25 = vld [vmem:[%s1716_s0 + $0x114] ss:$8 sps:$4 sm:$0xff]   ;;  %v1147_v27 = vld [vmem:[%s1716_s0 + $0x110] ss:$8 sps:$4 sm:$0xff]   ;;  %v1150_v29 = vld [vmem:[%s1716_s0 + $0x104] ss:$8 sps:$4 sm:$0xff]  }
   0xb   :  { %502 = vmatpush1.bf16.msra.mxu0 %v1122_v10  ;;  %v1152_v30 = vld [vmem:[%s1716_s0] ss:$8 sps:$4 sm:$0xff]   ;;  %v1154_v32 = vld [vmem:[%s1716_s0 + $0xf4] ss:$8 sps:$4 sm:$0xff]   ;;  %v1158_v34 = vld [vmem:[%s1716_s0 + $0xf0] ss:$8 sps:$4 sm:$0xff]  }
   0xc   :  { %575 = vmatpush1.bf16.msra.mxu1 %v1123_v11  ;;  %503 = vmatprep.subr.bf16.mxu0 %v1124_v12  ;;  %v1153_v31 = vld [vmem:[%s1716_s0 + $0x100] ss:$8 sps:$4 sm:$0xff]   ;;  %v1156_v33 = vld [vmem:[%s1716_s0 + $0x1f4] ss:$8 sps:$4 sm:$0xff]   ;;  %v1159_v35 = vld [vmem:[%s1716_s0 + $0x1f0] ss:$8 sps:$4 sm:$0xff]  }
   0xd   :  { %576 = vmatprep.subr.bf16.mxu1 %v1126_v13  ;;  %v1160_v36 = vld [vmem:[%s1716_s0 + $0xe4] ss:$8 sps:$4 sm:$0xff]   ;;  %v1164_v38 = vld [vmem:[%s1716_s0 + $0xe0] ss:$8 sps:$4 sm:$0xff]   ;;  %v1166_v40 = vld [vmem:[%s1716_s0 + $0xd4] ss:$8 sps:$4 sm:$0xff]  }
   0xe   :  { %v1162_v37 = vld [vmem:[%s1716_s0 + $0x1e4] ss:$8 sps:$4 sm:$0xff]   ;;  %v1165_v39 = vld [vmem:[%s1716_s0 + $0x1e0] ss:$8 sps:$4 sm:$0xff]   ;;  %v1168_v41 = vld [vmem:[%s1716_s0 + $0x1d4] ss:$8 sps:$4 sm:$0xff]  }
   0xf   :  { %504 = vmatpush1.bf16.msra.mxu0 %v1128_v14  ;;  %v1170_v42 = vld [vmem:[%s1716_s0 + $0xd0] ss:$8 sps:$4 sm:$0xff]   ;;  %v1172_v44 = vld [vmem:[%s1716_s0 + $0xc4] ss:$8 sps:$4 sm:$0xff]   ;;  %v1176_v46 = vld [vmem:[%s1716_s0 + $0xc0] ss:$8 sps:$4 sm:$0xff]  }
  0x10   :  { %577 = vmatpush1.bf16.msra.mxu1 %v1129_v15  ;;  %505 = vmatprep.subr.bf16.mxu0 %v1130_v16  ;;  %v1171_v43 = vld [vmem:[%s1716_s0 + $0x1d0] ss:$8 sps:$4 sm:$0xff]   ;;  %v1174_v45 = vld [vmem:[%s1716_s0 + $0x1c4] ss:$8 sps:$4 sm:$0xff]   ;;  %v1177_v47 = vld [vmem:[%s1716_s0 + $0x1c0] ss:$8 sps:$4 sm:$0xff]  }
  0x11   :  { %578 = vmatprep.subr.bf16.mxu1 %v1132_v17  ;;  %v1178_v48 = vld [vmem:[%s1716_s0 + $0xb4] ss:$8 sps:$4 sm:$0xff]   ;;  %v1182_v52 = vld [vmem:[%s1716_s0 + $0xb0] ss:$8 sps:$4 sm:$0xff]   ;;  %v1184_v54 = vld [vmem:[%s1716_s0 + $0xa4] ss:$8 sps:$4 sm:$0xff]  }
  0x12   :  { %v1204_v49 = vld [vmem:[%s1717_s1 + $0x4] ss:$16 sps:$4 sm:$0xff]   ;;  %v1207_v51 = vld [vmem:[%s1717_s1 + $0xc] ss:$16 sps:$4 sm:$0xff]   ;;  %v1183_v53 = vld [vmem:[%s1716_s0 + $0x1b0] ss:$8 sps:$4 sm:$0xff]  }
  0x13   :  { %506 = vmatpush1.bf16.msra.mxu0 %v1134_v18  ;;  %v1180_v50 = vld [vmem:[%s1716_s0 + $0x1b4] ss:$8 sps:$4 sm:$0xff]   ;;  %529 = vmatprep.mubr.bf16.mxu0 %v1204_v49  ;;  %v1186_v55 = vld [vmem:[%s1716_s0 + $0x1a4] ss:$8 sps:$4 sm:$0xff]   ;;  %v1188_v56 = vld [vmem:[%s1716_s0 + $0xa0] ss:$8 sps:$4 sm:$0xff]  }
  0x14   :  { %579 = vmatpush1.bf16.msra.mxu1 %v1135_v19  ;;  %507 = vmatprep.subr.bf16.mxu0 %v1136_v20  ;;  %v1189_v57 = vld [vmem:[%s1716_s0 + $0x1a0] ss:$8 sps:$4 sm:$0xff]   ;;  %v1190_v58 = vld [vmem:[%s1716_s0 + $0x94] ss:$8 sps:$4 sm:$0xff]   ;;  %v1194_v60 = vld [vmem:[%s1716_s0 + $0x90] ss:$8 sps:$4 sm:$0xff]  }
  0x15   :  { %580 = vmatprep.subr.bf16.mxu1 %v1138_v21  ;;  %602 = vmatprep.mubr.bf16.mxu1 %v1207_v51  ;;  %v1192_v59 = vld [vmem:[%s1716_s0 + $0x194] ss:$8 sps:$4 sm:$0xff]   ;;  %v1195_v61 = vld [vmem:[%s1716_s0 + $0x190] ss:$8 sps:$4 sm:$0xff]   ;;  %v1196_v62 = vld [vmem:[%s1716_s0 + $0x84] ss:$8 sps:$4 sm:$0xff]  }
  0x16   :  { %v1198_v63 = vld [vmem:[%s1716_s0 + $0x184] ss:$8 sps:$4 sm:$0xff]   ;;  %v1200_v0 = vld [vmem:[%s1716_s0 + $0x80] ss:$8 sps:$4 sm:$0xff]  }
  0x17   :  { %508 = vmatpush1.bf16.msra.mxu0 %v1140_v22  ;;  %v1201_v1 = vld [vmem:[%s1716_s0 + $0x180] ss:$8 sps:$4 sm:$0xff]   ;;  %v1208_v4 = vld [vmem:[%s1717_s1 + $0x24] ss:$16 sps:$4 sm:$0xff]   ;;  %v1210_v5 = vld [vmem:[%s1717_s1 + $0x2c] ss:$16 sps:$4 sm:$0xff]  }
  0x18   :  { %581 = vmatpush1.bf16.msra.mxu1 %v1141_v23  ;;  %509 = vmatprep.subr.bf16.mxu0 %v1142_v24  ;;  %v1202_v2 = vld [vmem:[%s1717_s1] ss:$16 sps:$4 sm:$0xff]   ;;  %v1205_v3 = vld [vmem:[%s1717_s1 + $0x8] ss:$16 sps:$4 sm:$0xff]   ;;  %v1214_v8 = vld [vmem:[%s1717_s1 + $0x44] ss:$16 sps:$4 sm:$0xff]  }
  0x19   :  { %582 = vmatprep.subr.bf16.mxu1 %v1144_v25  ;;  %v1212_v6 = vld [vmem:[%s1717_s1 + $0x20] ss:$16 sps:$4 sm:$0xff]   ;;  %v1213_v7 = vld [vmem:[%s1717_s1 + $0x28] ss:$16 sps:$4 sm:$0xff]   ;;  %v1216_v9 = vld [vmem:[%s1717_s1 + $0x4c] ss:$16 sps:$4 sm:$0xff]  }
  0x1a   :  { %v1218_v10 = vld [vmem:[%s1717_s1 + $0x40] ss:$16 sps:$4 sm:$0xff]   ;;  %v1219_v11 = vld [vmem:[%s1717_s1 + $0x48] ss:$16 sps:$4 sm:$0xff]   ;;  %v1220_v12 = vld [vmem:[%s1717_s1 + $0x64] ss:$16 sps:$4 sm:$0xff]  }
  0x1b   :  { %510 = vmatpush1.bf16.msra.mxu0 %v1146_v26  ;;  %v1222_v13 = vld [vmem:[%s1717_s1 + $0x6c] ss:$16 sps:$4 sm:$0xff]   ;;  %v1224_v14 = vld [vmem:[%s1717_s1 + $0x60] ss:$16 sps:$4 sm:$0xff]   ;;  %v1225_v15 = vld [vmem:[%s1717_s1 + $0x68] ss:$16 sps:$4 sm:$0xff]  }
  0x1c   :  { %583 = vmatpush1.bf16.msra.mxu1 %v1147_v27  ;;  %511 = vmatprep.subr.bf16.mxu0 %v1148_v28 }
  0x1d   :  { %584 = vmatprep.subr.bf16.mxu1 %v1150_v29 }
  0x1f   :  { %512 = vmatpush1.bf16.msra.mxu0 %v1152_v30 }
  0x20   :  { %585 = vmatpush1.bf16.msra.mxu1 %v1153_v31  ;;  %513 = vmatprep.subr.bf16.mxu0 %v1154_v32 }
  0x21   :  { %586 = vmatprep.subr.bf16.mxu1 %v1156_v33 }
  0x23   :  { %514 = vmatpush2.bf16.msra.mxu0 %v1158_v34 }
  0x24   :  { %587 = vmatpush2.bf16.msra.mxu1 %v1159_v35  ;;  %515 = vmatprep.subr.bf16.mxu0 %v1160_v36 }
  0x25   :  { %588 = vmatprep.subr.bf16.mxu1 %v1162_v37 }
  0x27   :  { %516 = vmatpush2.bf16.msra.mxu0 %v1164_v38 }
  0x28   :  { %589 = vmatpush2.bf16.msra.mxu1 %v1165_v39  ;;  %517 = vmatprep.subr.bf16.mxu0 %v1166_v40 }
  0x29   :  { %590 = vmatprep.subr.bf16.mxu1 %v1168_v41 }
  0x2b   :  { %518 = vmatpush2.bf16.msra.mxu0 %v1170_v42 }
  0x2c   :  { %591 = vmatpush2.bf16.msra.mxu1 %v1171_v43  ;;  %519 = vmatprep.subr.bf16.mxu0 %v1172_v44 }
  0x2d   :  { %592 = vmatprep.subr.bf16.mxu1 %v1174_v45 }
  0x2f   :  { %520 = vmatpush2.bf16.msra.mxu0 %v1176_v46 }
  0x30   :  { %593 = vmatpush2.bf16.msra.mxu1 %v1177_v47  ;;  %521 = vmatprep.subr.bf16.mxu0 %v1178_v48 }
  0x31   :  { %594 = vmatprep.subr.bf16.mxu1 %v1180_v50 }
  0x33   :  { %522 = vmatpush2.bf16.msra.mxu0 %v1182_v52 }
  0x34   :  { %595 = vmatpush2.bf16.msra.mxu1 %v1183_v53  ;;  %523 = vmatprep.subr.bf16.mxu0 %v1184_v54 }
  0x35   :  { %596 = vmatprep.subr.bf16.mxu1 %v1186_v55 }
  0x37   :  { %524 = vmatpush2.bf16.msra.mxu0 %v1188_v56 }
  0x38   :  { %597 = vmatpush2.bf16.msra.mxu1 %v1189_v57  ;;  %525 = vmatprep.subr.bf16.mxu0 %v1190_v58 }
  0x39   :  { %598 = vmatprep.subr.bf16.mxu1 %v1192_v59 }
  0x3b   :  { %526 = vmatpush2.bf16.msra.mxu0 %v1194_v60 }
  0x3c   :  { %599 = vmatpush2.bf16.msra.mxu1 %v1195_v61  ;;  %527 = vmatprep.subr.bf16.mxu0 %v1196_v62 }
  0x3d   :  { %600 = vmatprep.subr.bf16.mxu1 %v1198_v63 }
  0x3f   :  { %528 = vmatpush2.bf16.msra.mxu0 %v1200_v0 }
  0x40   :  { %601 = vmatpush2.bf16.msra.mxu1 %v1201_v1 }
  0x42   :  { %530 = vmatmul.mubr.bf16.vlgmr.msra.gmra.mxu0 %v1202_v2 }
  0x43   :  { %603 = vmatmul.mubr.bf16.vlgmr.msra.gmra.mxu1 %v1205_v3  ;;  %539 = vmatprep.mubr.bf16.mxu0 %v1208_v4 }
  0x44   :  { %612 = vmatprep.mubr.bf16.mxu1 %v1210_v5 }
  0x4a   :  { %540 = vmatmul.mubr.bf16.gmra.mxu0 %v1212_v6 }
  0x4b   :  { %613 = vmatmul.mubr.bf16.gmra.mxu1 %v1213_v7  ;;  %549 = vmatprep.mubr.bf16.mxu0 %v1214_v8 }
  0x4c   :  { %622 = vmatprep.mubr.bf16.mxu1 %v1216_v9 }
  0x52   :  { %550 = vmatmul.mubr.bf16.gmra.mxu0 %v1218_v10 }
  0x53   :  { %623 = vmatmul.mubr.bf16.gmra.mxu1 %v1219_v11  ;;  %559 = vmatprep.mubr.bf16.mxu0 %v1220_v12 }
  0x54   :  { %632 = vmatprep.mubr.bf16.mxu1 %v1222_v13 }
  0x5a   :  { %560 = vmatmul.mubr.bf16.gmra.mxu0 %v1224_v14 }
  0x5b   :  { %633 = vmatmul.mubr.bf16.gmra.mxu1 %v1225_v15 }
 0x102   :  { %v531_v16 = vpop.f32.mrf.mxu0 }
 0x103   :  { %v604_v17 = vpop.f32.mrf.mxu1 }
 0x104   :  { %v533_v18 = vpop.f32.mrf.mxu0  ;;  %v1508_v20 = vadd.f32 %v604_v17, %v531_v16 }
 0x105   :  { %v606_v19 = vpop.f32.mrf.mxu1 }
 0x106   :  { %v1510_v21 = vadd.f32 %v606_v19, %v533_v18  ;;  %v535_v22 = vpop.f32.mrf.mxu0  ;;  %v667_v30 = vmul.f32 %v1508_v20, %v1508_v20 }
 0x107   :  { %v608_v23 = vpop.f32.mrf.mxu1 }
 0x108   :  { %v1512_v24 = vadd.f32 %v608_v23, %v535_v22  ;;  %v643_v25 = vadd.f32 %v1510_v21, %v1508_v20  ;;  %v668_v26 = vmul.f32 %v1510_v21, %v1510_v21  ;;  %v537_v27 = vpop.f32.mrf.mxu0 }
 0x109   :  { %v610_v28 = vpop.f32.mrf.mxu1 }
 0x10a   :  { %v1518_v29 = vadd.f32 %v610_v28, %v537_v27  ;;  %644 = vadd.xlane.f32.xlu0 %v643_v25  ;;  %v541_v31 = vpop.f32.mrf.mxu0  ;;  %v683_v34 = vadd.f32 %v668_v26, %v667_v30  ;;  %v669_v35 = vmul.f32 %v1512_v24, %v1512_v24 }
 0x10b   :  { %v614_v32 = vpop.f32.mrf.mxu1 }
 0x10c   :  { %v1522_v33 = vadd.f32 %v614_v32, %v541_v31  ;;  %v670_v36 = vmul.f32 %v1518_v29, %v1518_v29  ;;  %v543_v37 = vpop.f32.mrf.mxu0  ;;  %v646_v44 = vadd.f32 %v1518_v29, %v1512_v24 }
 0x10d   :  { %v616_v38 = vpop.f32.mrf.mxu1 }
 0x10e   :  { %v1528_v39 = vadd.f32 %v616_v38, %v543_v37  ;;  %684 = vadd.xlane.f32.xlu0 %v683_v34  ;;  %v686_v40 = vadd.f32 %v670_v36, %v669_v35  ;;  %v671_v41 = vmul.f32 %v1522_v33, %v1522_v33  ;;  %v545_v42 = vpop.f32.mrf.mxu0  ;;  %v1242_v37 = vmov 0  }
 0x10f   :  { %v618_v43 = vpop.f32.mrf.mxu1  ;;  %1104 = vset.pattern.permute.xlu0 %v1242_v37  ;;  %1105 = vset.pattern.permute.xlu1 %v1242_v37 }
 0x110   :  { %687 = vadd.xlane.f32.xlu1 %v686_v40  ;;  %v649_v45 = vadd.f32 %v1528_v39, %v1522_v33  ;;  %v672_v46 = vmul.f32 %v1528_v39, %v1528_v39  ;;  %v1538_v47 = vadd.f32 %v618_v43, %v545_v42  ;;  %v547_v48 = vpop.f32.mrf.mxu0 }
 0x111   :  { %v620_v49 = vpop.f32.mrf.mxu1 }
 0x112   :  { %v1540_v50 = vadd.f32 %v620_v49, %v547_v48  ;;  %647 = vadd.xlane.f32.xlu0 %v646_v44  ;;  %v689_v51 = vadd.f32 %v672_v46, %v671_v41  ;;  %v551_v52 = vpop.f32.mrf.mxu0  ;;  %v673_v57 = vmul.f32 %v1538_v47, %v1538_v47 }
 0x113   :  { %v624_v53 = vpop.f32.mrf.mxu1 }
 0x114   :  { %v1542_v54 = vadd.f32 %v624_v53, %v551_v52  ;;  %650 = vadd.xlane.f32.xlu1 %v649_v45  ;;  %v553_v55 = vpop.f32.mrf.mxu0  ;;  %v652_v59 = vadd.f32 %v1540_v50, %v1538_v47  ;;  %v674_v60 = vmul.f32 %v1540_v50, %v1540_v50 }
 0x115   :  { %v626_v56 = vpop.f32.mrf.mxu1 }
 0x116   :  { %v1546_v58 = vadd.f32 %v626_v56, %v553_v55  ;;  %690 = vadd.xlane.f32.xlu0 %v689_v51  ;;  %v675_v61 = vmul.f32 %v1542_v54, %v1542_v54  ;;  %v555_v62 = vpop.f32.mrf.mxu0  ;;  %v692_v6 = vadd.f32 %v674_v60, %v673_v57 }
 0x117   :  { %v628_v63 = vpop.f32.mrf.mxu1 }
 0x118   :  { %v1554_v0 = vadd.f32 %v628_v63, %v555_v62  ;;  %653 = vadd.xlane.f32.xlu1 %v652_v59  ;;  %v655_v1 = vadd.f32 %v1546_v58, %v1542_v54  ;;  %v676_v2 = vmul.f32 %v1546_v58, %v1546_v58  ;;  %v557_v3 = vpop.f32.mrf.mxu0 }
 0x119   :  { %v630_v4 = vpop.f32.mrf.mxu1 }
 0x11a   :  { %v1560_v5 = vadd.f32 %v630_v4, %v557_v3  ;;  %656 = vadd.xlane.f32.xlu0 %v655_v1  ;;  %v695_v7 = vadd.f32 %v676_v2, %v675_v61  ;;  %v561_v8 = vpop.f32.mrf.mxu0  ;;  %v677_v12 = vmul.f32 %v1554_v0, %v1554_v0 }
 0x11b   :  { %v634_v9 = vpop.f32.mrf.mxu1 }
 0x11c   :  { %v1562_v10 = vadd.f32 %v634_v9, %v561_v8  ;;  %693 = vadd.xlane.f32.xlu1 %v692_v6  ;;  %v658_v11 = vadd.f32 %v1560_v5, %v1554_v0  ;;  %v678_v13 = vmul.f32 %v1560_v5, %v1560_v5  ;;  %v563_v14 = vpop.f32.mrf.mxu0 }
 0x11d   :  { %v636_v15 = vpop.f32.mrf.mxu1 }
 0x11e   :  { %v1570_v16 = vadd.f32 %v636_v15, %v563_v14  ;;  %696 = vadd.xlane.f32.xlu0 %v695_v7  ;;  %v679_v17 = vmul.f32 %v1562_v10, %v1562_v10  ;;  %v565_v18 = vpop.f32.mrf.mxu0  ;;  %v698_v25 = vadd.f32 %v678_v13, %v677_v12 }
 0x11f   :  { %v638_v19 = vpop.f32.mrf.mxu1 }
 0x120   :  { %659 = vadd.xlane.f32.xlu1 %v658_v11  ;;  %v1574_v22 = vadd.f32 %v638_v19, %v565_v18  ;;  %v661_v23 = vadd.f32 %v1570_v16, %v1562_v10  ;;  %v680_v26 = vmul.f32 %v1570_v16, %v1570_v16  ;;  %v567_v27 = vpop.f32.mrf.mxu0 }
 0x121   :  { %v640_v28 = vpop.f32.mrf.mxu1 }
 0x122   :  { %662 = vadd.xlane.f32.xlu0 %v661_v23  ;;  %v1580_v30 = vadd.f32 %v640_v28, %v567_v27  ;;  %v701_v31 = vadd.f32 %v680_v26, %v679_v17  ;;  %v681_v34 = vmul.f32 %v1574_v22, %v1574_v22 }
 0x124   :  { %699 = vadd.xlane.f32.xlu1 %v698_v25  ;;  %v664_v32 = vadd.f32 %v1580_v30, %v1574_v22  ;;  %v682_v35 = vmul.f32 %v1580_v30, %v1580_v30 }
 0x126   :  { %702 = vadd.xlane.f32.xlu0 %v701_v31  ;;  %v704_v36 = vadd.f32 %v682_v35, %v681_v34  ;;  %v747_v31 = vld [vmem:[%s1718_s2] sm:$0xff] }
 0x128   :  { %665 = vadd.xlane.f32.xlu1 %v664_v32 }
 0x12c   :  { %705 = vadd.xlane.f32.xlu1 %v704_v36 }
 0x193   :  { %v645_v38 = vpop.xlane.xlu0 %644 }
 0x194   :  { %v1588_v40 = vmul.f32 0.00390625, %v645_v38 }
 0x196   :  { %v723_v42 = vmul.f32 %v1588_v40, %v1588_v40 }
 0x197   :  { %v685_v41 = vpop.xlane.xlu0 %684 }
 0x198   :  { %v715_v43 = vmul.f32 0.00390625, %v685_v41 }
 0x199   :  { %v688_v44 = vpop.xlane.xlu1 %687 }
 0x19a   :  { %v731_v45 = vsub.f32 %v715_v43, %v723_v42  ;;  %v716_v53 = vmul.f32 0.00390625, %v688_v44  ;;  %v748_v43 = vld [vmem:[%s1718_s2 + $0x8] sm:$0xff] }
 0x19b   :  { %v648_v46 = vpop.xlane.xlu0 %647 }
 0x19c   :  { %v739_v48 = vmax.f32 %v731_v45, 0.0  ;;  %v1592_v49 = vmul.f32 0.00390625, %v648_v46 }
 0x19d   :  { %v651_v51 = vpop.xlane.xlu1 %650 }
 0x19e   :  { %v755_v52 = vadd.f32 1e-05, %v739_v48  ;;  %v724_v55 = vmul.f32 %v1592_v49, %v1592_v49  ;;  %v1596_v56 = vmul.f32 0.00390625, %v651_v51 }
 0x19f   :  { %v691_v57 = vpop.xlane.xlu0 %690 }
 0x1a0   :  { %1226 = vrsqrt.f32 %v755_v52  ;;  %v732_v59 = vsub.f32 %v716_v53, %v724_v55  ;;  %v725_v60 = vmul.f32 %v1596_v56, %v1596_v56  ;;  %v717_v61 = vmul.f32 0.00390625, %v691_v57 }
 0x1a1   :  { %v654_v62 = vpop.xlane.xlu1 %653 }
 0x1a2   :  { %v740_v63 = vmax.f32 %v732_v59, 0.0  ;;  %v733_v1 = vsub.f32 %v717_v61, %v725_v60  ;;  %v1600_v2 = vmul.f32 0.00390625, %v654_v62  ;;  %v780_v62 = vld [vmem:[%s1719_s3 + $0x8] sm:$0xff] }
 0x1a3   :  { %v657_v3 = vpop.xlane.xlu0 %656 }
 0x1a4   :  { %v756_v4 = vadd.f32 1e-05, %v740_v63  ;;  %v741_v6 = vmax.f32 %v733_v1, 0.0  ;;  %v1602_v7 = vmul.f32 0.00390625, %v657_v3  ;;  %v726_v9 = vmul.f32 %v1600_v2, %v1600_v2  ;;  %v779_v63 = vld [vmem:[%s1719_s3] sm:$0xff] }
 0x1a5   :  { %v694_v8 = vpop.xlane.xlu1 %693 }
 0x1a6   :  { %1228 = vrsqrt.f32 %v756_v4  ;;  %v718_v11 = vmul.f32 0.00390625, %v694_v8  ;;  %v727_v12 = vmul.f32 %v1602_v7, %v1602_v7  ;;  %v757_v14 = vadd.f32 1e-05, %v741_v6 }
 0x1a7   :  { %v697_v13 = vpop.xlane.xlu0 %696 }
 0x1a8   :  { %v734_v15 = vsub.f32 %v718_v11, %v726_v9  ;;  %v719_v17 = vmul.f32 0.00390625, %v697_v13  ;;  %1230 = vrsqrt.f32 %v757_v14  ;;  %v749_v11 = vld [vmem:[%s1718_s2 + $0x10] sm:$0xff] }
 0x1a9   :  { %v660_v18 = vpop.xlane.xlu1 %659 }
 0x1aa   :  { %v742_v19 = vmax.f32 %v734_v15, 0.0  ;;  %v1608_v23 = vmul.f32 0.00390625, %v660_v18  ;;  %v735_v25 = vsub.f32 %v719_v17, %v727_v12  ;;  %v750_v12 = vld [vmem:[%s1718_s2 + $0x18] sm:$0xff] }
 0x1ab   :  { %v663_v26 = vpop.xlane.xlu0 %662 }
 0x1ac   :  { %v758_v27 = vadd.f32 1e-05, %v742_v19  ;;  %v728_v28 = vmul.f32 %v1608_v23, %v1608_v23  ;;  %v743_v36 = vmax.f32 %v735_v25, 0.0  ;;  %v1615_v37 = vmul.f32 0.00390625, %v663_v26  ;;  %v782_v19 = vld [vmem:[%s1719_s3 + $0x18] sm:$0xff] }
 0x1ad   :  { %v1227_v32 = vpop.eup %1226  ;;  %v700_v34 = vpop.xlane.xlu1 %699 }
 0x1ae   :  { %1232 = vrsqrt.f32 %v758_v27  ;;  %v720_v35 = vmul.f32 0.00390625, %v700_v34  ;;  %v771_v38 = vmul.f32 %v1227_v32, %v747_v31  ;;  %v759_v51 = vadd.f32 1e-05, %v743_v36  ;;  %v781_v31 = vld [vmem:[%s1719_s3 + $0x10] sm:$0xff]  ;;  %v752_v32 = vld [vmem:[%s1718_s2 + $0x28] sm:$0xff] }
 0x1af   :  { %v703_v42 = vpop.xlane.xlu0 %702  ;;  %v729_v52 = vmul.f32 %v1615_v37, %v1615_v37 }
 0x1b0   :  { %v736_v41 = vsub.f32 %v720_v35, %v728_v28  ;;  %805 = vperm.xlu0 %1104, %v771_v38   ;;  %v721_v53 = vmul.f32 0.00390625, %v703_v42  ;;  %v787_v60 = vmul.f32 %v771_v38, %v1588_v40 }
 0x1b1   :  { %v666_v44 = vpop.xlane.xlu1 %665 }
 0x1b2   :  { %v744_v45 = vmax.f32 %v736_v41, 0.0  ;;  %v1620_v46 = vmul.f32 0.00390625, %v666_v44  ;;  %v737_v4 = vsub.f32 %v721_v53, %v729_v52  ;;  %v795_v9 = vsub.f32 %v779_v63, %v787_v60  ;;  %v754_v44 = vld [vmem:[%s1718_s2 + $0x38] sm:$0xff]  ;;  %v783_v52 = vld [vmem:[%s1719_s3 + $0x20] sm:$0xff]  ;;  %v753_v60 = vld [vmem:[%s1718_s2 + $0x30] sm:$0xff] }
 0x1b3   :  { %v1229_v48 = vpop.eup %1228 }
 0x1b4   :  { %v772_v55 = vmul.f32 %v1229_v48, %v748_v43  ;;  %v760_v57 = vadd.f32 1e-05, %v744_v45  ;;  %v730_v59 = vmul.f32 %v1620_v46, %v1620_v46  ;;  %v745_v14 = vmax.f32 %v737_v4, 0.0 }
 0x1b5   :  { %v706_v61 = vpop.xlane.xlu1 %705  ;;  %v1231_v40 = vpop.eup %1230 }
 0x1b6   :  { %v788_v1 = vmul.f32 %v772_v55, %v1592_v49  ;;  %1234 = vrsqrt.f32 %v760_v57  ;;  %v722_v3 = vmul.f32 0.00390625, %v706_v61  ;;  %810 = vperm.xlu1 %1105, %v772_v55   ;;  %v773_v17 = vmul.f32 %v1231_v40, %v749_v11 }
 0x1b7   :  { %1236 = vrsqrt.f32 %v759_v51  ;;  %v761_v26 = vadd.f32 1e-05, %v745_v14 }
 0x1b8   :  { %v738_v6 = vsub.f32 %v722_v3, %v730_v59  ;;  %v796_v8 = vsub.f32 %v780_v62, %v788_v1  ;;  %v789_v28 = vmul.f32 %v773_v17, %v1596_v56  ;;  %v751_v56 = vld [vmem:[%s1718_s2 + $0x20] sm:$0xff]  ;;  %v785_v62 = vld [vmem:[%s1719_s3 + $0x30] sm:$0xff] }
 0x1ba   :  { %v746_v13 = vmax.f32 %v738_v6, 0.0  ;;  %866 = vperm.xlu0 %1104, %v796_v8   ;;  %861 = vperm.xlu1 %1105, %v795_v9   ;;  %v797_v36 = vsub.f32 %v781_v31, %v789_v28 }
 0x1bb   :  { %v1233_v49 = vpop.eup %1232 }
 0x1bc   :  { %v762_v15 = vadd.f32 1e-05, %v746_v13  ;;  %v774_v18 = vmul.f32 %v1233_v49, %v750_v12 }
 0x1be   :  { %1238 = vrsqrt.f32 %v762_v15  ;;  %815 = vperm.xlu1 %1105, %v773_v17   ;;  %v790_v25 = vmul.f32 %v774_v18, %v1600_v2  ;;  %v784_v2 = vld [vmem:[%s1719_s3 + $0x28] sm:$0xff] }
 0x1bf   :  { %1240 = vrsqrt.f32 %v761_v26 }
 0x1c0   :  { %v798_v27 = vsub.f32 %v782_v19, %v790_v25 }
 0x1c2   :  { %876 = vperm.xlu0 %1104, %v798_v27   ;;  %820 = vperm.xlu1 %1105, %v774_v18  }
 0x1c3   :  { %v1235_v34 = vpop.eup %1234 }
 0x1c4   :  { %v1237_v35 = vpop.eup %1236  ;;  %v776_v38 = vmul.f32 %v1235_v34, %v752_v32 }
 0x1c5   :  { %v775_v43 = vmul.f32 %v1237_v35, %v751_v56 }
 0x1c6   :  { %871 = vperm.xlu1 %1105, %v797_v36   ;;  %v792_v41 = vmul.f32 %v776_v38, %v1608_v23  ;;  %v786_v23 = vld [vmem:[%s1719_s3 + $0x38] sm:$0xff] }
 0x1c7   :  { %v791_v48 = vmul.f32 %v775_v43, %v1602_v7 }
 0x1c8   :  { %v800_v42 = vsub.f32 %v784_v2, %v792_v41 }
 0x1c9   :  { %v799_v55 = vsub.f32 %v783_v52, %v791_v48 }
 0x1ca   :  { %886 = vperm.xlu0 %1104, %v800_v42   ;;  %825 = vperm.xlu1 %1105, %v775_v43  }
 0x1cb   :  { %v1239_v45 = vpop.eup %1238 }
 0x1cc   :  { %v778_v51 = vmul.f32 %v1239_v45, %v754_v44  ;;  %v1241_v59 = vpop.eup %1240 }
 0x1cd   :  { %v777_v7 = vmul.f32 %v1241_v59, %v753_v60 }
 0x1ce   :  { %830 = vperm.xlu1 %1105, %v776_v38   ;;  %v794_v53 = vmul.f32 %v778_v51, %v1620_v46 }
 0x1cf   :  { %v793_v61 = vmul.f32 %v777_v7, %v1615_v37 }
 0x1d0   :  { %v802_v57 = vsub.f32 %v786_v23, %v794_v53 }
 0x1d1   :  { %v801_v63 = vsub.f32 %v785_v62, %v793_v61 }
 0x1d2   :  { %881 = vperm.xlu1 %1105, %v799_v55   ;;  %896 = vperm.xlu0 %1104, %v802_v57  }
 0x1d6   :  { %835 = vperm.xlu1 %1105, %v777_v7  }
 0x1da   :  { %840 = vperm.xlu1 %1105, %v778_v51  }
 0x1de   :  { %891 = vperm.xlu1 %1105, %v801_v63  }
 0x22b   :  { %v806_v46 = vpop.permute.xlu0 %805 }
 0x22c   :  { %v843_v3 = vmul.f32 %v806_v46, %v1508_v20  ;;  %v844_v4 = vmul.f32 %v806_v46, %v1510_v21 }
 0x231   :  { %v811_v1 = vpop.permute.xlu1 %810 }
 0x232   :  { %v845_v6 = vmul.f32 %v811_v1, %v1512_v24  ;;  %v846_v8 = vmul.f32 %v811_v1, %v1518_v29 }
 0x235   :  { %v867_v9 = vpop.permute.xlu0 %866  ;;  %v862_v40 = vpop.permute.xlu1 %861 }
 0x236   :  { %v901_v37 = vadd.f32 %v867_v9, %v845_v6  ;;  %v902_v11 = vadd.f32 %v867_v9, %v846_v8  ;;  %v899_v12 = vadd.f32 %v862_v40, %v843_v3  ;;  %v900_v13 = vadd.f32 %v862_v40, %v844_v4 }
 0x238   :  { %v917_v49 = vmul.f32 0.2, %v901_v37  ;;  %v918_v14 = vmul.f32 0.2, %v902_v11  ;;  %v915_v15 = vmul.f32 0.2, %v899_v12 }
 0x239   :  { %v916_v17 = vmul.f32 0.2, %v900_v13  ;;  %v816_v18 = vpop.permute.xlu1 %815 }
 0x23a   :  { %v933_v19 = vmax.f32 %v901_v37, %v917_v49  ;;  %v934_v25 = vmax.f32 %v902_v11, %v918_v14  ;;  %v931_v20 = vmax.f32 %v899_v12, %v915_v15  ;;  %v847_v32 = vmul.f32 %v816_v18, %v1522_v33 }
 0x23b   :  { %v932_v26 = vmax.f32 %v900_v13, %v916_v17  ;;  %v848_v34 = vmul.f32 %v816_v18, %v1528_v39 }
 0x23c   :  { %v1096_v21 = vpack.c.bf16 %v934_v25, %v933_v19 }
 0x23d   :  { %v1095_v27 = vpack.c.bf16 %v932_v26, %v931_v20  ;;  %v821_v24 = vpop.permute.xlu1 %820  ;;  %v877_v31 = vpop.permute.xlu0 %876 }
 0x23e   :  { %996 = vst [vmem:[%s1720_s4 + $0x8] sm:$0xff] %v1096_v21  ;;  %v849_v29 = vmul.f32 %v821_v24, %v1538_v47  ;;  %v850_v28 = vmul.f32 %v821_v24, %v1540_v50 }
 0x23f   :  { %995 = vst [vmem:[%s1720_s4] sm:$0xff] %v1095_v27 }
 0x240   :  { %v905_v35 = vadd.f32 %v877_v31, %v849_v29  ;;  %v906_v36 = vadd.f32 %v877_v31, %v850_v28 }
 0x241   :  { %v872_v38 = vpop.permute.xlu1 %871 }
 0x242   :  { %v921_v2 = vmul.f32 0.2, %v905_v35  ;;  %v922_v56 = vmul.f32 0.2, %v906_v36  ;;  %v903_v41 = vadd.f32 %v872_v38, %v847_v32  ;;  %v904_v42 = vadd.f32 %v872_v38, %v848_v34 }
 0x244   :  { %v937_v43 = vmax.f32 %v905_v35, %v921_v2  ;;  %v938_v47 = vmax.f32 %v906_v36, %v922_v56  ;;  %v919_v44 = vmul.f32 0.2, %v903_v41  ;;  %v920_v50 = vmul.f32 0.2, %v904_v42 }
 0x245   :  { %v826_v45 = vpop.permute.xlu1 %825  ;;  %v887_v55 = vpop.permute.xlu0 %886 }
 0x246   :  { %v1098_v48 = vpack.c.bf16 %v938_v47, %v937_v43  ;;  %v935_v51 = vmax.f32 %v903_v41, %v919_v44  ;;  %v936_v52 = vmax.f32 %v904_v42, %v920_v50  ;;  %v851_v57 = vmul.f32 %v826_v45, %v1542_v54 }
 0x247   :  { %v852_v59 = vmul.f32 %v826_v45, %v1546_v58 }
 0x248   :  { %998 = vst [vmem:[%s1720_s4 + $0x18] sm:$0xff] %v1098_v48  ;;  %v1097_v33 = vpack.c.bf16 %v936_v52, %v935_v51 }
 0x249   :  { %v831_v39 = vpop.permute.xlu1 %830 }
 0x24a   :  { %997 = vst [vmem:[%s1720_s4 + $0x10] sm:$0xff] %v1097_v33  ;;  %v853_v23 = vmul.f32 %v831_v39, %v1554_v0  ;;  %v854_v53 = vmul.f32 %v831_v39, %v1560_v5 }
 0x24c   :  { %v909_v60 = vadd.f32 %v887_v55, %v853_v23  ;;  %v910_v7 = vadd.f32 %v887_v55, %v854_v53 }
 0x24d   :  { %v882_v61 = vpop.permute.xlu1 %881  ;;  %v897_v12 = vpop.permute.xlu0 %896 }
 0x24e   :  { %v925_v62 = vmul.f32 0.2, %v909_v60  ;;  %v926_v63 = vmul.f32 0.2, %v910_v7  ;;  %v907_v46 = vadd.f32 %v882_v61, %v851_v57  ;;  %v908_v1 = vadd.f32 %v882_v61, %v852_v59 }
 0x250   :  { %v941_v3 = vmax.f32 %v909_v60, %v925_v62  ;;  %v942_v4 = vmax.f32 %v910_v7, %v926_v63  ;;  %v923_v6 = vmul.f32 0.2, %v907_v46  ;;  %v924_v8 = vmul.f32 0.2, %v908_v1 }
 0x251   :  { %v836_v9 = vpop.permute.xlu1 %835 }
 0x252   :  { %v1100_v0 = vpack.c.bf16 %v942_v4, %v941_v3  ;;  %v939_v40 = vmax.f32 %v907_v46, %v923_v6  ;;  %v940_v5 = vmax.f32 %v908_v1, %v924_v8  ;;  %v855_v13 = vmul.f32 %v836_v9, %v1562_v10 }
 0x253   :  { %v856_v49 = vmul.f32 %v836_v9, %v1570_v16 }
 0x254   :  { %1000 = vst [vmem:[%s1720_s4 + $0x28] sm:$0xff] %v1100_v0  ;;  %v1099_v54 = vpack.c.bf16 %v940_v5, %v939_v40 }
 0x255   :  { %v841_v58 = vpop.permute.xlu1 %840 }
 0x256   :  { %999 = vst [vmem:[%s1720_s4 + $0x20] sm:$0xff] %v1099_v54  ;;  %v857_v37 = vmul.f32 %v841_v58, %v1574_v22  ;;  %v858_v11 = vmul.f32 %v841_v58, %v1580_v30 }
 0x258   :  { %v913_v14 = vadd.f32 %v897_v12, %v857_v37  ;;  %v914_v15 = vadd.f32 %v897_v12, %v858_v11 }
 0x259   :  { %v892_v17 = vpop.permute.xlu1 %891 }
 0x25a   :  { %v929_v18 = vmul.f32 0.2, %v913_v14  ;;  %v930_v19 = vmul.f32 0.2, %v914_v15  ;;  %v911_v25 = vadd.f32 %v892_v17, %v855_v13  ;;  %v912_v20 = vadd.f32 %v892_v17, %v856_v49 }
 0x25c   :  { %v945_v26 = vmax.f32 %v913_v14, %v929_v18  ;;  %v946_v21 = vmax.f32 %v914_v15, %v930_v19  ;;  %v927_v27 = vmul.f32 0.2, %v911_v25  ;;  %v928_v24 = vmul.f32 0.2, %v912_v20 }
 0x25e   :  { %v1102_v29 = vpack.c.bf16 %v946_v21, %v945_v26  ;;  %v943_v22 = vmax.f32 %v911_v25, %v927_v27  ;;  %v944_v28 = vmax.f32 %v912_v20, %v928_v24 }
 0x260   :  { %1002 = vst [vmem:[%s1720_s4 + $0x38] sm:$0xff] %v1102_v29  ;;  %v1101_v10 = vpack.c.bf16 %v944_v28, %v943_v22 }
 0x262   :  { %1001 = vst [vmem:[%s1720_s4 + $0x30] sm:$0xff] %v1101_v10 }

</bundles_post_ra>
